<compile_context>
chip_gen: v7x
topology: tpu7x:2x2x1
jax: 0.10.0
libtpu: 0.0.40
codegen_flags: <defaults>
</compile_context>

<pallas_src>
import functools

import jax
import jax.numpy as jnp
from jax.experimental import pallas as pl
from jax.experimental.pallas import tpu as pltpu

LANE = 128
COL0 = 8          # sublane-aligned column where the image interior starts


def _round_up(x, m):
    return (x + m - 1) // m * m


def _pick_row_tile(H):
    """Largest row tile in {32,16,8,4,2} that divides H with >= 2 tiles."""
    for t in (32, 16, 8, 4, 2):
        if t < H and H % t == 0:
            return t
    return H


def _lane_pad(v, cp):
    """Pad the last (lane) dim of a value with zeros up to cp."""
    c = v.shape[-1]
    if c == cp:
        return v
    zeros = jnp.zeros(v.shape[:-1] + (cp - c,), v.dtype)
    return jnp.concatenate([v, zeros], axis=-1)


def _prep_weight(w_oihw, cp, cdtype):
    """(O, I, 3, 3) -> K-folded (9*cp, cp): row = (kh*3+kw)*cp + ci, col = co."""
    o, i, kh, kw = w_oihw.shape
    assert kh == 3 and kw == 3
    w = jnp.transpose(w_oihw, (2, 3, 1, 0))                  # HWIO
    w = jnp.pad(w, ((0, 0), (0, 0), (0, cp - i), (0, cp - o)))
    return w.reshape(9 * cp, cp).astype(cdtype)


def _basic_block_kernel(x_ref, w1_ref, w2_ref, out_ref,
                        xpad_ref, ypad_ref, col_ref, *,
                        TH, H, W, c_in, c_out, cp, Wbuf, no_relu, cdtype):
    """One (batch, row-tile) per grid step; fully fused BasicBlock.

    x_ref   : (1, H, W, c_in)      whole image of batch n (DMA'd once per n)
    w1_ref  : (9*cp, cp)           conv1 weights, K-folded, channel-padded
    w2_ref  : (9*cp, cp)           conv2 weights
    out_ref : (1, TH, W, c_out)    this row tile's output
    xpad_ref: VMEM (TH+4, Wbuf, cp)  padded conv1 input  (rows row0-2..row0+TH+1)
    ypad_ref: VMEM (TH+2, Wbuf, cp)  padded conv2 input  (rows row0-1..row0+TH)
    col_ref : VMEM (TH+2, W, 9*cp)   shared im2col staging buffer
    """
    r = pl.program_id(1)
    n_r = pl.num_programs(1)
    row0 = r * TH
    f32 = jnp.float32

    # ---- stage conv1 input (in-kernel "SAME" padding, lane-dense) -----------
    # Zero only the halo: edge rows (may be out of image) and halo columns.
    zrow2 = jnp.zeros((2, Wbuf, cp), cdtype)
    xpad_ref[0:2, :, :] = zrow2
    xpad_ref[TH + 2:TH + 4, :, :] = zrow2
    zcol_x = jnp.zeros((TH + 4, 1, cp), cdtype)
    xpad_ref[:, COL0 - 1:COL0, :] = zcol_x
    xpad_ref[:, COL0 + W:COL0 + W + 1, :] = zcol_x

    body = x_ref[0, pl.ds(row0, TH), :, :]
    xpad_ref[2:TH + 2, COL0:COL0 + W, :] = _lane_pad(body.astype(cdtype), cp)

    @pl.when(r > 0)
    def _():                                   # top 2-row halo (in-image)
        top = x_ref[0, pl.ds(row0 - 2, 2), :, :]
        xpad_ref[0:2, COL0:COL0 + W, :] = _lane_pad(top.astype(cdtype), cp)

    @pl.when(r < n_r - 1)
    def _():                                   # bottom 2-row halo (in-image)
        bot = x_ref[0, pl.ds(row0 + TH, 2), :, :]
        xpad_ref[TH + 2:TH + 4, COL0:COL0 + W, :] = _lane_pad(bot.astype(cdtype), cp)

    # ---- 3x3 conv: im2col (taps folded into K) + one MXU matmul -------------
    def conv3x3(src_ref, w_ref, rows_out):
        for kh in range(3):
            for kw in range(3):
                k = kh * 3 + kw
                tap = src_ref[kh:kh + rows_out,
                              COL0 - 1 + kw:COL0 - 1 + kw + W, :]
                # lane offset k*cp is a multiple of 128 -> aligned store.
                col_ref[0:rows_out, :, k * cp:(k + 1) * cp] = tap
        lhs = col_ref[0:rows_out, :, :].reshape(rows_out * W, 9 * cp)
        return jnp.dot(lhs, w_ref[...], preferred_element_type=f32)

    # conv1 + relu -> ypad (conv2's padded input); never leaves VMEM.
    h1 = conv3x3(xpad_ref, w1_ref, TH + 2)                     # ((TH+2)*W, cp)
    h1 = jnp.maximum(h1, 0.0).astype(cdtype).reshape(TH + 2, W, cp)
    ypad_ref[:, COL0:COL0 + W, :] = h1
    zcol_y = jnp.zeros((TH + 2, 1, cp), cdtype)
    ypad_ref[:, COL0 - 1:COL0, :] = zcol_y
    ypad_ref[:, COL0 + W:COL0 + W + 1, :] = zcol_y
    # conv2 zero-pads conv1's HxW output: rows outside the image must be zero.
    zrow1 = jnp.zeros((1, Wbuf, cp), cdtype)

    @pl.when(r == 0)
    def _():
        ypad_ref[0:1, :, :] = zrow1

    @pl.when(r == n_r - 1)
    def _():
        ypad_ref[TH + 1:TH + 2, :, :] = zrow1

    # conv2 + identity residual (+ relu); epilogue stays f32.
    h2 = conv3x3(ypad_ref, w2_ref, TH).reshape(TH, W, cp)
    res = x_ref[0, pl.ds(row0, TH), :, :].astype(f32)
    out = h2[:, :, 0:c_out] + res
    if not no_relu:
        out = jnp.maximum(out, 0.0)
    out_ref[0] = out.astype(out_ref.dtype)


def basic_block_forward_nhwc(x_nhwc, w1_oihw, w2_oihw, no_relu=False,
                             compute_dtype=jnp.bfloat16, row_tile=None):
    """Fused BasicBlock (stride=1, downsample=None). NHWC activations."""
    N, H, W, c_in = x_nhwc.shape
    planes = w1_oihw.shape[0]
    c_out = w2_oihw.shape[0]
    assert w1_oihw.shape[1] == c_in and w2_oihw.shape[1] == planes
    assert c_out == planes
    assert c_out == c_in, "identity residual requires inplanes == planes"
    assert W % 8 == 0, "W must be a multiple of 8 (sublane alignment)"

    TH = row_tile if row_tile is not None else _pick_row_tile(H)
    assert TH <= H and H % TH == 0 and (TH >= 2 or TH == H), \
        "row_tile must divide H and be >= 2 (unless it equals H)"

    cp = _round_up(c_in, LANE)                 # c_in == planes == c_out
    Wbuf = _round_up(COL0 + W + 1, 8)

    w1 = _prep_weight(w1_oihw, cp, compute_dtype)
    w2 = _prep_weight(w2_oihw, cp, compute_dtype)

    # VMEM budget derived from the chip (64 MiB on v7x, 128 MiB on v5e/v6e).
    try:
        cap = pltpu.get_tpu_info().vmem_capacity_bytes
        vmem_limit = min(int(cap * 3 // 4), 100 * 1024 * 1024)
    except Exception:
        vmem_limit = 64 * 1024 * 1024

    kernel = functools.partial(
        _basic_block_kernel, TH=TH, H=H, W=W, c_in=c_in, c_out=c_out, cp=cp,
        Wbuf=Wbuf, no_relu=no_relu, cdtype=compute_dtype)

    return pl.pallas_call(
        kernel,
        out_shape=jax.ShapeDtypeStruct((N, H, W, c_out), x_nhwc.dtype),
        grid=(N, H // TH),
        in_specs=[
            # Full image per batch element; constant index over the row axis so
            # it is DMA'd once per image and re-used across row tiles.
            pl.BlockSpec((1, H, W, c_in), lambda n, r: (n, 0, 0, 0)),
            pl.BlockSpec((9 * cp, cp), lambda n, r: (0, 0)),
            pl.BlockSpec((9 * cp, cp), lambda n, r: (0, 0)),
        ],
        out_specs=pl.BlockSpec((1, TH, W, c_out), lambda n, r: (n, r, 0, 0)),
        scratch_shapes=[
            pltpu.VMEM((TH + 4, Wbuf, cp), compute_dtype),    # padded conv1 in
            pltpu.VMEM((TH + 2, Wbuf, cp), compute_dtype),    # padded conv2 in
            pltpu.VMEM((TH + 2, W, 9 * cp), compute_dtype),   # shared im2col
        ],
        compiler_params=pltpu.CompilerParams(
            dimension_semantics=("parallel", "parallel"),
            vmem_limit_bytes=vmem_limit),
    )(x_nhwc, w1, w2)


def basic_block_forward(x_nchw, w1_oihw, w2_oihw, no_relu=False,
                        compute_dtype=jnp.bfloat16, row_tile=None):
    """NCHW adapter matching the PyTorch module interface.

    A full network should stay in NHWC between layers (chain
    basic_block_forward_nhwc) so layout transposes are paid once at the
    network boundary rather than per block.
    """
    x = jnp.transpose(x_nchw, (0, 2, 3, 1))
    out = basic_block_forward_nhwc(x, w1_oihw, w2_oihw, no_relu,
                                   compute_dtype, row_tile)
    return jnp.transpose(out, (0, 3, 1, 2))


def _reference_forward(x_nchw, w1_oihw, w2_oihw, no_relu=False):
    """Pure-JAX f32 reference using lax conv for verification."""
    dn = ("NCHW", "OIHW", "NCHW")
    out = jax.lax.conv_general_dilated(x_nchw, w1_oihw, (1, 1), "SAME",
                                       dimension_numbers=dn)
    out = jnp.maximum(out, 0.0)
    out = jax.lax.conv_general_dilated(out, w2_oihw, (1, 1), "SAME",
                                       dimension_numbers=dn)
    out = out + x_nchw
    return out if no_relu else jnp.maximum(out, 0.0)


if __name__ == "__main__":
    # Small shapes: batch=2, inplanes=planes=4, spatial=16x16, stride=1.
    N, C, H, W = 2, 4, 16, 16

    key = jax.random.PRNGKey(0)
    kx, k1, k2 = jax.random.split(key, 3)

    x = jax.random.normal(kx, (N, C, H, W), dtype=jnp.float32)
    # Deterministic kaiming-like init for the two conv3x3 weights (OIHW, no bias).
    fan_in = C * 3 * 3
    std = (2.0 / fan_in) ** 0.5
    w1 = jax.random.normal(k1, (C, C, 3, 3), dtype=jnp.float32) * std
    w2 = jax.random.normal(k2, (C, C, 3, 3), dtype=jnp.float32) * std

    for no_relu in (False, True):
        # row_tile=8 exercises the multi-tile halo path; 16 the single-tile path.
        for row_tile in (8, 16):
            out = basic_block_forward(x, w1, w2, no_relu=no_relu,
                                      row_tile=row_tile)
            out = jax.block_until_ready(out)
            ref = _reference_forward(x, w1, w2, no_relu=no_relu)
            assert out.shape == (N, C, H, W)
            # bf16 matmul inputs / bf16 conv1 intermediate with f32 accumulation
            # => loosened tolerance vs the f32 reference.
            assert jnp.allclose(out, ref, atol=5e-2, rtol=5e-2), \
                f"mismatch vs reference (no_relu={no_relu}, row_tile={row_tile})"

    print("KERNEL_OK")
</pallas_src>

<mosaic_0001>
module attributes {stable_mosaic.version = 11 : i64} {
  func.func @_basic_block_kernel(%arg0: i32, %arg1: i32, %arg2: memref<1x16x16x4xf32, #tpu.memory_space<vmem>>, %arg3: memref<1152x128xbf16, #tpu.memory_space<vmem>>, %arg4: memref<1152x128xbf16, #tpu.memory_space<vmem>>, %arg5: memref<1x8x16x4xf32, #tpu.memory_space<vmem>>, %arg6: memref<12x32x128xbf16, #tpu.memory_space<vmem>>, %arg7: memref<10x32x128xbf16, #tpu.memory_space<vmem>>, %arg8: memref<10x16x1152xbf16, #tpu.memory_space<vmem>>) attributes {dimension_semantics = [#tpu.dimension_semantics<parallel>, #tpu.dimension_semantics<parallel>], iteration_bounds = array<i64: 2, 2>, scalar_prefetch = 0 : i64, scratch_operands = 3 : i64, tpu.core_type = #tpu.core_type<tc>, window_params = [{transform_indices = @transform_0, window_bounds = array<i64: 1, 16, 16, 4>}, {pipeline_mode = #tpu.pipeline_mode<synchronous>, transform_indices = @transform_1, window_bounds = array<i64: 1152, 128>}, {pipeline_mode = #tpu.pipeline_mode<synchronous>, transform_indices = @transform_2, window_bounds = array<i64: 1152, 128>}, {transform_indices = @transform_3, window_bounds = array<i64: 1, 8, 16, 4>}]} {
    %c8_i32 = arith.constant 8 : i32
    %0 = arith.muli %arg1, %c8_i32 : i32
    %cst = arith.constant 0.000000e+00 : bf16
    %1 = vector.broadcast %cst : bf16 to vector<2x32x128xbf16>
    %c0 = arith.constant 0 : index
    %c0_0 = arith.constant 0 : index
    %c0_1 = arith.constant 0 : index
    %2 = vector.load %arg6[%c0, %c0_0, %c0_1] : memref<12x32x128xbf16, #tpu.memory_space<vmem>>, vector<2x32x128xbf16>
    tpu.vector_store %arg6[%c0, %c0_0, %c0_1], %1 {strides = array<i32>} : memref<12x32x128xbf16, #tpu.memory_space<vmem>>, vector<2x32x128xbf16>,
    %c10 = arith.constant 10 : index
    %c0_2 = arith.constant 0 : index
    %c0_3 = arith.constant 0 : index
    %3 = vector.load %arg6[%c10, %c0_2, %c0_3] : memref<12x32x128xbf16, #tpu.memory_space<vmem>>, vector<2x32x128xbf16>
    tpu.vector_store %arg6[%c10, %c0_2, %c0_3], %1 {strides = array<i32>} : memref<12x32x128xbf16, #tpu.memory_space<vmem>>, vector<2x32x128xbf16>,
    %cst_4 = arith.constant 0.000000e+00 : bf16
    %4 = vector.broadcast %cst_4 : bf16 to vector<12x1x128xbf16>
    %c0_5 = arith.constant 0 : index
    %c7 = arith.constant 7 : index
    %c0_6 = arith.constant 0 : index
    %5 = vector.load %arg6[%c0_5, %c7, %c0_6] : memref<12x32x128xbf16, #tpu.memory_space<vmem>>, vector<12x1x128xbf16>
    tpu.vector_store %arg6[%c0_5, %c7, %c0_6], %4 {strides = array<i32>} : memref<12x32x128xbf16, #tpu.memory_space<vmem>>, vector<12x1x128xbf16>,
    %c0_7 = arith.constant 0 : index
    %c24 = arith.constant 24 : index
    %c0_8 = arith.constant 0 : index
    %6 = vector.load %arg6[%c0_7, %c24, %c0_8] : memref<12x32x128xbf16, #tpu.memory_space<vmem>>, vector<12x1x128xbf16>
    tpu.vector_store %arg6[%c0_7, %c24, %c0_8], %4 {strides = array<i32>} : memref<12x32x128xbf16, #tpu.memory_space<vmem>>, vector<12x1x128xbf16>,
    %c0_9 = arith.constant 0 : index
    %7 = arith.index_cast %0 : i32 to index
    %c0_10 = arith.constant 0 : index
    %c0_11 = arith.constant 0 : index
    %8 = vector.load %arg2[%c0_9, %7, %c0_10, %c0_11] : memref<1x16x16x4xf32, #tpu.memory_space<vmem>>, vector<1x8x16x4xf32>
    %9 = vector.shape_cast %8 : vector<1x8x16x4xf32> to vector<8x16x4xf32>
    %10 = arith.truncf %9 : vector<8x16x4xf32> to vector<8x16x4xbf16>
    %cst_12 = arith.constant 0.000000e+00 : bf16
    %11 = vector.broadcast %cst_12 : bf16 to vector<8x16x124xbf16>
    %12 = tpu.concatenate %10, %11 in 2 : vector<8x16x4xbf16>, vector<8x16x124xbf16> -> vector<8x16x128xbf16>
    %c2 = arith.constant 2 : index
    %c8 = arith.constant 8 : index
    %c0_13 = arith.constant 0 : index
    %13 = vector.load %arg6[%c2, %c8, %c0_13] : memref<12x32x128xbf16, #tpu.memory_space<vmem>>, vector<8x16x128xbf16>
    tpu.vector_store %arg6[%c2, %c8, %c0_13], %12 {strides = array<i32>} : memref<12x32x128xbf16, #tpu.memory_space<vmem>>, vector<8x16x128xbf16>,
    %c0_i32 = arith.constant 0 : i32
    %14 = arith.cmpi sgt, %arg1, %c0_i32 : i32
    %15 = arith.extui %14 : i1 to i32
    %c0_i32_14 = arith.constant 0 : i32
    %16 = arith.cmpi ne, %15, %c0_i32_14 : i32
    scf.if %16 {
      %c2_i32 = arith.constant 2 : i32
      %90 = arith.subi %0, %c2_i32 : i32
      %c0_150 = arith.constant 0 : index
      %91 = arith.index_cast %90 : i32 to index
      %c0_151 = arith.constant 0 : index
      %c0_152 = arith.constant 0 : index
      %92 = vector.load %arg2[%c0_150, %91, %c0_151, %c0_152] : memref<1x16x16x4xf32, #tpu.memory_space<vmem>>, vector<1x2x16x4xf32>
      %93 = vector.shape_cast %92 : vector<1x2x16x4xf32> to vector<2x16x4xf32>
      %94 = arith.truncf %93 : vector<2x16x4xf32> to vector<2x16x4xbf16>
      %cst_153 = arith.constant 0.000000e+00 : bf16
      %95 = vector.broadcast %cst_153 : bf16 to vector<2x16x124xbf16>
      %96 = tpu.concatenate %94, %95 in 2 : vector<2x16x4xbf16>, vector<2x16x124xbf16> -> vector<2x16x128xbf16>
      %c0_154 = arith.constant 0 : index
      %c8_155 = arith.constant 8 : index
      %c0_156 = arith.constant 0 : index
      %97 = vector.load %arg6[%c0_154, %c8_155, %c0_156] : memref<12x32x128xbf16, #tpu.memory_space<vmem>>, vector<2x16x128xbf16>
      tpu.vector_store %arg6[%c0_154, %c8_155, %c0_156], %96 {strides = array<i32>} : memref<12x32x128xbf16, #tpu.memory_space<vmem>>, vector<2x16x128xbf16>,
    } else {
    }
    %c1_i32 = arith.constant 1 : i32
    %17 = arith.cmpi slt, %arg1, %c1_i32 : i32
    %18 = arith.extui %17 : i1 to i32
    %c0_i32_15 = arith.constant 0 : i32
    %19 = arith.cmpi ne, %18, %c0_i32_15 : i32
    scf.if %19 {
      %c8_i32_150 = arith.constant 8 : i32
      %90 = arith.addi %0, %c8_i32_150 : i32
      %c0_151 = arith.constant 0 : index
      %91 = arith.index_cast %90 : i32 to index
      %c0_152 = arith.constant 0 : index
      %c0_153 = arith.constant 0 : index
      %92 = vector.load %arg2[%c0_151, %91, %c0_152, %c0_153] : memref<1x16x16x4xf32, #tpu.memory_space<vmem>>, vector<1x2x16x4xf32>
      %93 = vector.shape_cast %92 : vector<1x2x16x4xf32> to vector<2x16x4xf32>
      %94 = arith.truncf %93 : vector<2x16x4xf32> to vector<2x16x4xbf16>
      %cst_154 = arith.constant 0.000000e+00 : bf16
      %95 = vector.broadcast %cst_154 : bf16 to vector<2x16x124xbf16>
      %96 = tpu.concatenate %94, %95 in 2 : vector<2x16x4xbf16>, vector<2x16x124xbf16> -> vector<2x16x128xbf16>
      %c10_155 = arith.constant 10 : index
      %c8_156 = arith.constant 8 : index
      %c0_157 = arith.constant 0 : index
      %97 = vector.load %arg6[%c10_155, %c8_156, %c0_157] : memref<12x32x128xbf16, #tpu.memory_space<vmem>>, vector<2x16x128xbf16>
      tpu.vector_store %arg6[%c10_155, %c8_156, %c0_157], %96 {strides = array<i32>} : memref<12x32x128xbf16, #tpu.memory_space<vmem>>, vector<2x16x128xbf16>,
    } else {
    }
    %c0_16 = arith.constant 0 : index
    %c7_17 = arith.constant 7 : index
    %c0_18 = arith.constant 0 : index
    %20 = vector.load %arg6[%c0_16, %c7_17, %c0_18] : memref<12x32x128xbf16, #tpu.memory_space<vmem>>, vector<10x16x128xbf16>
    %c0_19 = arith.constant 0 : index
    %c0_20 = arith.constant 0 : index
    %c0_21 = arith.constant 0 : index
    %21 = vector.load %arg8[%c0_19, %c0_20, %c0_21] : memref<10x16x1152xbf16, #tpu.memory_space<vmem>>, vector<10x16x128xbf16>
    tpu.vector_store %arg8[%c0_19, %c0_20, %c0_21], %20 {strides = array<i32>} : memref<10x16x1152xbf16, #tpu.memory_space<vmem>>, vector<10x16x128xbf16>,
    %c0_22 = arith.constant 0 : index
    %c8_23 = arith.constant 8 : index
    %c0_24 = arith.constant 0 : index
    %22 = vector.load %arg6[%c0_22, %c8_23, %c0_24] : memref<12x32x128xbf16, #tpu.memory_space<vmem>>, vector<10x16x128xbf16>
    %c0_25 = arith.constant 0 : index
    %c0_26 = arith.constant 0 : index
    %c128 = arith.constant 128 : index
    %23 = vector.load %arg8[%c0_25, %c0_26, %c128] : memref<10x16x1152xbf16, #tpu.memory_space<vmem>>, vector<10x16x128xbf16>
    tpu.vector_store %arg8[%c0_25, %c0_26, %c128], %22 {strides = array<i32>} : memref<10x16x1152xbf16, #tpu.memory_space<vmem>>, vector<10x16x128xbf16>,
    %c0_27 = arith.constant 0 : index
    %c9 = arith.constant 9 : index
    %c0_28 = arith.constant 0 : index
    %24 = vector.load %arg6[%c0_27, %c9, %c0_28] : memref<12x32x128xbf16, #tpu.memory_space<vmem>>, vector<10x16x128xbf16>
    %c0_29 = arith.constant 0 : index
    %c0_30 = arith.constant 0 : index
    %c256 = arith.constant 256 : index
    %25 = vector.load %arg8[%c0_29, %c0_30, %c256] : memref<10x16x1152xbf16, #tpu.memory_space<vmem>>, vector<10x16x128xbf16>
    tpu.vector_store %arg8[%c0_29, %c0_30, %c256], %24 {strides = array<i32>} : memref<10x16x1152xbf16, #tpu.memory_space<vmem>>, vector<10x16x128xbf16>,
    %c1 = arith.constant 1 : index
    %c7_31 = arith.constant 7 : index
    %c0_32 = arith.constant 0 : index
    %26 = vector.load %arg6[%c1, %c7_31, %c0_32] : memref<12x32x128xbf16, #tpu.memory_space<vmem>>, vector<10x16x128xbf16>
    %c0_33 = arith.constant 0 : index
    %c0_34 = arith.constant 0 : index
    %c384 = arith.constant 384 : index
    %27 = vector.load %arg8[%c0_33, %c0_34, %c384] : memref<10x16x1152xbf16, #tpu.memory_space<vmem>>, vector<10x16x128xbf16>
    tpu.vector_store %arg8[%c0_33, %c0_34, %c384], %26 {strides = array<i32>} : memref<10x16x1152xbf16, #tpu.memory_space<vmem>>, vector<10x16x128xbf16>,
    %c1_35 = arith.constant 1 : index
    %c8_36 = arith.constant 8 : index
    %c0_37 = arith.constant 0 : index
    %28 = vector.load %arg6[%c1_35, %c8_36, %c0_37] : memref<12x32x128xbf16, #tpu.memory_space<vmem>>, vector<10x16x128xbf16>
    %c0_38 = arith.constant 0 : index
    %c0_39 = arith.constant 0 : index
    %c512 = arith.constant 512 : index
    %29 = vector.load %arg8[%c0_38, %c0_39, %c512] : memref<10x16x1152xbf16, #tpu.memory_space<vmem>>, vector<10x16x128xbf16>
    tpu.vector_store %arg8[%c0_38, %c0_39, %c512], %28 {strides = array<i32>} : memref<10x16x1152xbf16, #tpu.memory_space<vmem>>, vector<10x16x128xbf16>,
    %c1_40 = arith.constant 1 : index
    %c9_41 = arith.constant 9 : index
    %c0_42 = arith.constant 0 : index
    %30 = vector.load %arg6[%c1_40, %c9_41, %c0_42] : memref<12x32x128xbf16, #tpu.memory_space<vmem>>, vector<10x16x128xbf16>
    %c0_43 = arith.constant 0 : index
    %c0_44 = arith.constant 0 : index
    %c640 = arith.constant 640 : index
    %31 = vector.load %arg8[%c0_43, %c0_44, %c640] : memref<10x16x1152xbf16, #tpu.memory_space<vmem>>, vector<10x16x128xbf16>
    tpu.vector_store %arg8[%c0_43, %c0_44, %c640], %30 {strides = array<i32>} : memref<10x16x1152xbf16, #tpu.memory_space<vmem>>, vector<10x16x128xbf16>,
    %c2_45 = arith.constant 2 : index
    %c7_46 = arith.constant 7 : index
    %c0_47 = arith.constant 0 : index
    %32 = vector.load %arg6[%c2_45, %c7_46, %c0_47] : memref<12x32x128xbf16, #tpu.memory_space<vmem>>, vector<10x16x128xbf16>
    %c0_48 = arith.constant 0 : index
    %c0_49 = arith.constant 0 : index
    %c768 = arith.constant 768 : index
    %33 = vector.load %arg8[%c0_48, %c0_49, %c768] : memref<10x16x1152xbf16, #tpu.memory_space<vmem>>, vector<10x16x128xbf16>
    tpu.vector_store %arg8[%c0_48, %c0_49, %c768], %32 {strides = array<i32>} : memref<10x16x1152xbf16, #tpu.memory_space<vmem>>, vector<10x16x128xbf16>,
    %c2_50 = arith.constant 2 : index
    %c8_51 = arith.constant 8 : index
    %c0_52 = arith.constant 0 : index
    %34 = vector.load %arg6[%c2_50, %c8_51, %c0_52] : memref<12x32x128xbf16, #tpu.memory_space<vmem>>, vector<10x16x128xbf16>
    %c0_53 = arith.constant 0 : index
    %c0_54 = arith.constant 0 : index
    %c896 = arith.constant 896 : index
    %35 = vector.load %arg8[%c0_53, %c0_54, %c896] : memref<10x16x1152xbf16, #tpu.memory_space<vmem>>, vector<10x16x128xbf16>
    tpu.vector_store %arg8[%c0_53, %c0_54, %c896], %34 {strides = array<i32>} : memref<10x16x1152xbf16, #tpu.memory_space<vmem>>, vector<10x16x128xbf16>,
    %c2_55 = arith.constant 2 : index
    %c9_56 = arith.constant 9 : index
    %c0_57 = arith.constant 0 : index
    %36 = vector.load %arg6[%c2_55, %c9_56, %c0_57] : memref<12x32x128xbf16, #tpu.memory_space<vmem>>, vector<10x16x128xbf16>
    %c0_58 = arith.constant 0 : index
    %c0_59 = arith.constant 0 : index
    %c1024 = arith.constant 1024 : index
    %37 = vector.load %arg8[%c0_58, %c0_59, %c1024] : memref<10x16x1152xbf16, #tpu.memory_space<vmem>>, vector<10x16x128xbf16>
    tpu.vector_store %arg8[%c0_58, %c0_59, %c1024], %36 {strides = array<i32>} : memref<10x16x1152xbf16, #tpu.memory_space<vmem>>, vector<10x16x128xbf16>,
    %c0_60 = arith.constant 0 : index
    %c0_61 = arith.constant 0 : index
    %c0_62 = arith.constant 0 : index
    %38 = vector.load %arg8[%c0_60, %c0_61, %c0_62] : memref<10x16x1152xbf16, #tpu.memory_space<vmem>>, vector<10x16x1152xbf16>
    %39 = vector.shape_cast %38 : vector<10x16x1152xbf16> to vector<160x1152xbf16>
    %c0_63 = arith.constant 0 : index
    %c0_64 = arith.constant 0 : index
    %40 = vector.load %arg3[%c0_63, %c0_64] : memref<1152x128xbf16, #tpu.memory_space<vmem>>, vector<1152x128xbf16>
    %cst_65 = arith.constant dense<0.000000e+00> : vector<160x128xf32>
    %41 = tpu.matmul %39, %40, %cst_65 {dimension_numbers = #tpu.dot_dimension_numbers<[1], [0], [0], [1], [0, 0, 1, 1], [], []>} : vector<160x1152xbf16>, vector<1152x128xbf16>, vector<160x128xf32> -> vector<160x128xf32>
    %cst_66 = arith.constant 0.000000e+00 : f32
    %42 = vector.broadcast %cst_66 : f32 to vector<160x128xf32>
    %43 = arith.maximumf %41, %42 : vector<160x128xf32>
    %44 = arith.truncf %43 : vector<160x128xf32> to vector<160x128xbf16>
    %45 = vector.shape_cast %44 : vector<160x128xbf16> to vector<10x16x128xbf16>
    %c0_67 = arith.constant 0 : index
    %c8_68 = arith.constant 8 : index
    %c0_69 = arith.constant 0 : index
    %46 = vector.load %arg7[%c0_67, %c8_68, %c0_69] : memref<10x32x128xbf16, #tpu.memory_space<vmem>>, vector<10x16x128xbf16>
    tpu.vector_store %arg7[%c0_67, %c8_68, %c0_69], %45 {strides = array<i32>} : memref<10x32x128xbf16, #tpu.memory_space<vmem>>, vector<10x16x128xbf16>,
    %cst_70 = arith.constant 0.000000e+00 : bf16
    %47 = vector.broadcast %cst_70 : bf16 to vector<10x1x128xbf16>
    %c0_71 = arith.constant 0 : index
    %c7_72 = arith.constant 7 : index
    %c0_73 = arith.constant 0 : index
    %48 = vector.load %arg7[%c0_71, %c7_72, %c0_73] : memref<10x32x128xbf16, #tpu.memory_space<vmem>>, vector<10x1x128xbf16>
    tpu.vector_store %arg7[%c0_71, %c7_72, %c0_73], %47 {strides = array<i32>} : memref<10x32x128xbf16, #tpu.memory_space<vmem>>, vector<10x1x128xbf16>,
    %c0_74 = arith.constant 0 : index
    %c24_75 = arith.constant 24 : index
    %c0_76 = arith.constant 0 : index
    %49 = vector.load %arg7[%c0_74, %c24_75, %c0_76] : memref<10x32x128xbf16, #tpu.memory_space<vmem>>, vector<10x1x128xbf16>
    tpu.vector_store %arg7[%c0_74, %c24_75, %c0_76], %47 {strides = array<i32>} : memref<10x32x128xbf16, #tpu.memory_space<vmem>>, vector<10x1x128xbf16>,
    %cst_77 = arith.constant 0.000000e+00 : bf16
    %50 = vector.broadcast %cst_77 : bf16 to vector<1x32x128xbf16>
    %c0_i32_78 = arith.constant 0 : i32
    %51 = arith.cmpi eq, %arg1, %c0_i32_78 : i32
    %52 = arith.extui %51 : i1 to i32
    %c0_i32_79 = arith.constant 0 : i32
    %53 = arith.cmpi ne, %52, %c0_i32_79 : i32
    scf.if %53 {
      %c0_150 = arith.constant 0 : index
      %c0_151 = arith.constant 0 : index
      %c0_152 = arith.constant 0 : index
      %90 = vector.load %arg7[%c0_150, %c0_151, %c0_152] : memref<10x32x128xbf16, #tpu.memory_space<vmem>>, vector<1x32x128xbf16>
      tpu.vector_store %arg7[%c0_150, %c0_151, %c0_152], %50 {strides = array<i32>} : memref<10x32x128xbf16, #tpu.memory_space<vmem>>, vector<1x32x128xbf16>,
    } else {
    }
    %c1_i32_80 = arith.constant 1 : i32
    %54 = arith.cmpi eq, %arg1, %c1_i32_80 : i32
    %55 = arith.extui %54 : i1 to i32
    %c0_i32_81 = arith.constant 0 : i32
    %56 = arith.cmpi ne, %55, %c0_i32_81 : i32
    scf.if %56 {
      %c9_150 = arith.constant 9 : index
      %c0_151 = arith.constant 0 : index
      %c0_152 = arith.constant 0 : index
      %90 = vector.load %arg7[%c9_150, %c0_151, %c0_152] : memref<10x32x128xbf16, #tpu.memory_space<vmem>>, vector<1x32x128xbf16>
      tpu.vector_store %arg7[%c9_150, %c0_151, %c0_152], %50 {strides = array<i32>} : memref<10x32x128xbf16, #tpu.memory_space<vmem>>, vector<1x32x128xbf16>,
    } else {
    }
    %c0_82 = arith.constant 0 : index
    %c7_83 = arith.constant 7 : index
    %c0_84 = arith.constant 0 : index
    %57 = vector.load %arg7[%c0_82, %c7_83, %c0_84] : memref<10x32x128xbf16, #tpu.memory_space<vmem>>, vector<8x16x128xbf16>
    %c0_85 = arith.constant 0 : index
    %c0_86 = arith.constant 0 : index
    %c0_87 = arith.constant 0 : index
    %58 = vector.load %arg8[%c0_85, %c0_86, %c0_87] : memref<10x16x1152xbf16, #tpu.memory_space<vmem>>, vector<8x16x128xbf16>
    tpu.vector_store %arg8[%c0_85, %c0_86, %c0_87], %57 {strides = array<i32>} : memref<10x16x1152xbf16, #tpu.memory_space<vmem>>, vector<8x16x128xbf16>,
    %c0_88 = arith.constant 0 : index
    %c8_89 = arith.constant 8 : index
    %c0_90 = arith.constant 0 : index
    %59 = vector.load %arg7[%c0_88, %c8_89, %c0_90] : memref<10x32x128xbf16, #tpu.memory_space<vmem>>, vector<8x16x128xbf16>
    %c0_91 = arith.constant 0 : index
    %c0_92 = arith.constant 0 : index
    %c128_93 = arith.constant 128 : index
    %60 = vector.load %arg8[%c0_91, %c0_92, %c128_93] : memref<10x16x1152xbf16, #tpu.memory_space<vmem>>, vector<8x16x128xbf16>
    tpu.vector_store %arg8[%c0_91, %c0_92, %c128_93], %59 {strides = array<i32>} : memref<10x16x1152xbf16, #tpu.memory_space<vmem>>, vector<8x16x128xbf16>,
    %c0_94 = arith.constant 0 : index
    %c9_95 = arith.constant 9 : index
    %c0_96 = arith.constant 0 : index
    %61 = vector.load %arg7[%c0_94, %c9_95, %c0_96] : memref<10x32x128xbf16, #tpu.memory_space<vmem>>, vector<8x16x128xbf16>
    %c0_97 = arith.constant 0 : index
    %c0_98 = arith.constant 0 : index
    %c256_99 = arith.constant 256 : index
    %62 = vector.load %arg8[%c0_97, %c0_98, %c256_99] : memref<10x16x1152xbf16, #tpu.memory_space<vmem>>, vector<8x16x128xbf16>
    tpu.vector_store %arg8[%c0_97, %c0_98, %c256_99], %61 {strides = array<i32>} : memref<10x16x1152xbf16, #tpu.memory_space<vmem>>, vector<8x16x128xbf16>,
    %c1_100 = arith.constant 1 : index
    %c7_101 = arith.constant 7 : index
    %c0_102 = arith.constant 0 : index
    %63 = vector.load %arg7[%c1_100, %c7_101, %c0_102] : memref<10x32x128xbf16, #tpu.memory_space<vmem>>, vector<8x16x128xbf16>
    %c0_103 = arith.constant 0 : index
    %c0_104 = arith.constant 0 : index
    %c384_105 = arith.constant 384 : index
    %64 = vector.load %arg8[%c0_103, %c0_104, %c384_105] : memref<10x16x1152xbf16, #tpu.memory_space<vmem>>, vector<8x16x128xbf16>
    tpu.vector_store %arg8[%c0_103, %c0_104, %c384_105], %63 {strides = array<i32>} : memref<10x16x1152xbf16, #tpu.memory_space<vmem>>, vector<8x16x128xbf16>,
    %c1_106 = arith.constant 1 : index
    %c8_107 = arith.constant 8 : index
    %c0_108 = arith.constant 0 : index
    %65 = vector.load %arg7[%c1_106, %c8_107, %c0_108] : memref<10x32x128xbf16, #tpu.memory_space<vmem>>, vector<8x16x128xbf16>
    %c0_109 = arith.constant 0 : index
    %c0_110 = arith.constant 0 : index
    %c512_111 = arith.constant 512 : index
    %66 = vector.load %arg8[%c0_109, %c0_110, %c512_111] : memref<10x16x1152xbf16, #tpu.memory_space<vmem>>, vector<8x16x128xbf16>
    tpu.vector_store %arg8[%c0_109, %c0_110, %c512_111], %65 {strides = array<i32>} : memref<10x16x1152xbf16, #tpu.memory_space<vmem>>, vector<8x16x128xbf16>,
    %c1_112 = arith.constant 1 : index
    %c9_113 = arith.constant 9 : index
    %c0_114 = arith.constant 0 : index
    %67 = vector.load %arg7[%c1_112, %c9_113, %c0_114] : memref<10x32x128xbf16, #tpu.memory_space<vmem>>, vector<8x16x128xbf16>
    %c0_115 = arith.constant 0 : index
    %c0_116 = arith.constant 0 : index
    %c640_117 = arith.constant 640 : index
    %68 = vector.load %arg8[%c0_115, %c0_116, %c640_117] : memref<10x16x1152xbf16, #tpu.memory_space<vmem>>, vector<8x16x128xbf16>
    tpu.vector_store %arg8[%c0_115, %c0_116, %c640_117], %67 {strides = array<i32>} : memref<10x16x1152xbf16, #tpu.memory_space<vmem>>, vector<8x16x128xbf16>,
    %c2_118 = arith.constant 2 : index
    %c7_119 = arith.constant 7 : index
    %c0_120 = arith.constant 0 : index
    %69 = vector.load %arg7[%c2_118, %c7_119, %c0_120] : memref<10x32x128xbf16, #tpu.memory_space<vmem>>, vector<8x16x128xbf16>
    %c0_121 = arith.constant 0 : index
    %c0_122 = arith.constant 0 : index
    %c768_123 = arith.constant 768 : index
    %70 = vector.load %arg8[%c0_121, %c0_122, %c768_123] : memref<10x16x1152xbf16, #tpu.memory_space<vmem>>, vector<8x16x128xbf16>
    tpu.vector_store %arg8[%c0_121, %c0_122, %c768_123], %69 {strides = array<i32>} : memref<10x16x1152xbf16, #tpu.memory_space<vmem>>, vector<8x16x128xbf16>,
    %c2_124 = arith.constant 2 : index
    %c8_125 = arith.constant 8 : index
    %c0_126 = arith.constant 0 : index
    %71 = vector.load %arg7[%c2_124, %c8_125, %c0_126] : memref<10x32x128xbf16, #tpu.memory_space<vmem>>, vector<8x16x128xbf16>
    %c0_127 = arith.constant 0 : index
    %c0_128 = arith.constant 0 : index
    %c896_129 = arith.constant 896 : index
    %72 = vector.load %arg8[%c0_127, %c0_128, %c896_129] : memref<10x16x1152xbf16, #tpu.memory_space<vmem>>, vector<8x16x128xbf16>
    tpu.vector_store %arg8[%c0_127, %c0_128, %c896_129], %71 {strides = array<i32>} : memref<10x16x1152xbf16, #tpu.memory_space<vmem>>, vector<8x16x128xbf16>,
    %c2_130 = arith.constant 2 : index
    %c9_131 = arith.constant 9 : index
    %c0_132 = arith.constant 0 : index
    %73 = vector.load %arg7[%c2_130, %c9_131, %c0_132] : memref<10x32x128xbf16, #tpu.memory_space<vmem>>, vector<8x16x128xbf16>
    %c0_133 = arith.constant 0 : index
    %c0_134 = arith.constant 0 : index
    %c1024_135 = arith.constant 1024 : index
    %74 = vector.load %arg8[%c0_133, %c0_134, %c1024_135] : memref<10x16x1152xbf16, #tpu.memory_space<vmem>>, vector<8x16x128xbf16>
    tpu.vector_store %arg8[%c0_133, %c0_134, %c1024_135], %73 {strides = array<i32>} : memref<10x16x1152xbf16, #tpu.memory_space<vmem>>, vector<8x16x128xbf16>,
    %c0_136 = arith.constant 0 : index
    %c0_137 = arith.constant 0 : index
    %c0_138 = arith.constant 0 : index
    %75 = vector.load %arg8[%c0_136, %c0_137, %c0_138] : memref<10x16x1152xbf16, #tpu.memory_space<vmem>>, vector<8x16x1152xbf16>
    %76 = vector.shape_cast %75 : vector<8x16x1152xbf16> to vector<128x1152xbf16>
    %c0_139 = arith.constant 0 : index
    %c0_140 = arith.constant 0 : index
    %77 = vector.load %arg4[%c0_139, %c0_140] : memref<1152x128xbf16, #tpu.memory_space<vmem>>, vector<1152x128xbf16>
    %cst_141 = arith.constant dense<0.000000e+00> : vector<128x128xf32>
    %78 = tpu.matmul %76, %77, %cst_141 {dimension_numbers = #tpu.dot_dimension_numbers<[1], [0], [0], [1], [0, 0, 1, 1], [], []>} : vector<128x1152xbf16>, vector<1152x128xbf16>, vector<128x128xf32> -> vector<128x128xf32>
    %79 = vector.shape_cast %78 : vector<128x128xf32> to vector<8x16x128xf32>
    %c0_142 = arith.constant 0 : index
    %80 = arith.index_cast %0 : i32 to index
    %c0_143 = arith.constant 0 : index
    %c0_144 = arith.constant 0 : index
    %81 = vector.load %arg2[%c0_142, %80, %c0_143, %c0_144] : memref<1x16x16x4xf32, #tpu.memory_space<vmem>>, vector<1x8x16x4xf32>
    %82 = vector.shape_cast %81 : vector<1x8x16x4xf32> to vector<8x16x4xf32>
    %83 = vector.extract_strided_slice %79 {offsets = [0, 0, 0], sizes = [8, 16, 4], strides = [1, 1, 1]} : vector<8x16x128xf32> to vector<8x16x4xf32>
    %84 = arith.addf %83, %82 : vector<8x16x4xf32>
    %cst_145 = arith.constant 0.000000e+00 : f32
    %85 = vector.broadcast %cst_145 : f32 to vector<8x16x4xf32>
    %86 = arith.maximumf %84, %85 : vector<8x16x4xf32>
    %c0_146 = arith.constant 0 : index
    %c0_147 = arith.constant 0 : index
    %c0_148 = arith.constant 0 : index
    %c0_149 = arith.constant 0 : index
    %87 = vector.load %arg5[%c0_146, %c0_147, %c0_148, %c0_149] : memref<1x8x16x4xf32, #tpu.memory_space<vmem>>, vector<1x8x16x4xf32>
    %88 = vector.shape_cast %87 : vector<1x8x16x4xf32> to vector<8x16x4xf32>
    %89 = vector.shape_cast %86 : vector<8x16x4xf32> to vector<1x8x16x4xf32>
    tpu.vector_store %arg5[%c0_146, %c0_147, %c0_148, %c0_149], %89 {strides = array<i32>} : memref<1x8x16x4xf32, #tpu.memory_space<vmem>>, vector<1x8x16x4xf32>,
    return
  }
  func.func @transform_0(%arg0: i32, %arg1: i32) -> (i32, i32, i32, i32) {
    %c0_i32 = arith.constant 0 : i32
    %c0_i32_0 = arith.constant 0 : i32
    %c0_i32_1 = arith.constant 0 : i32
    %c0_i32_2 = arith.constant 0 : i32
    return %arg0, %c0_i32, %c0_i32_0, %c0_i32_1 : i32, i32, i32, i32
  }
  func.func @transform_1(%arg0: i32, %arg1: i32) -> (i32, i32) {
    %c0_i32 = arith.constant 0 : i32
    %c0_i32_0 = arith.constant 0 : i32
    %c0_i32_1 = arith.constant 0 : i32
    return %c0_i32, %c0_i32_0 : i32, i32
  }
  func.func @transform_2(%arg0: i32, %arg1: i32) -> (i32, i32) {
    %c0_i32 = arith.constant 0 : i32
    %c0_i32_0 = arith.constant 0 : i32
    %c0_i32_1 = arith.constant 0 : i32
    return %c0_i32, %c0_i32_0 : i32, i32
  }
  func.func @transform_3(%arg0: i32, %arg1: i32) -> (i32, i32, i32, i32) {
    %c0_i32 = arith.constant 0 : i32
    %c0_i32_0 = arith.constant 0 : i32
    %c0_i32_1 = arith.constant 0 : i32
    return %arg0, %arg1, %c0_i32, %c0_i32_0 : i32, i32, i32, i32
  }
}

</mosaic_0001>

<bundles_post_ra>
// kernel: tpu_custom_call.1
= control target key start
LH: loop header
LB: loop body
LE: loop exit
PB: predicated region body
PF: predicated region fallthrough
CT: control target
= control target key end

     0   :  { %s8191_s0 = inlined_call_operand.hbm [shape: f32[2,16,16,4], index: 0, kind: input, shape index: {}]   ;;  %s8192_s1 = inlined_call_operand.hbm [shape: bf16[1152,128], index: 1, kind: input, shape index: {}]   ;;  %s8193_s2 = inlined_call_operand.hbm [shape: bf16[1152,128], index: 2, kind: input, shape index: {}]   ;;  %s8194_s3 = inlined_call_operand.hbm [shape: f32[2,16,16,4], index: 3, kind: output, shape index: {}]  }
   0x1   :  { %8204 = sst [smem:[#allocation19_spill]] %s8192_s1 }
   0x2   :  { %8205 = sst [smem:[#allocation20_spill]] %s8193_s2 }
   0x3   :  { %8 = vsyncpa [#allocation6], 0 }
   0x4   :  { %10 = vsyncpa [#allocation6 + $0x1], 0 }
   0x5   :  { %11 = vsyncpa [#allocation9], 0 }
   0x6   :  { %12 = vsyncpa [#allocation7], 0 }
   0x7   :  { %14 = vsyncpa [#allocation7 + $0x1], 0  ;;  %s7300_s12 = smov 0   ;;  %s7302_s13 = smov 0  }
   0x8   :  { %s7304_s14 = smov 0   ;;  %s7306_s15 = smov 0  }
   0x9   :  { %s7308_s16 = smov 0   ;;  %s7310_s17 = smov 0  }
   0xa   :  { %s7312_s18 = smov 0   ;;  %s7314_s19 = smov 0  }
   0xb   :  { %s7316_s20 = smov 0   ;;  %s7318_s21 = smov 0  }
   0xc   :  { %s7320_s22 = smov 0  }
   0xd LB: > { %8206 = sst [smem:[#allocation15_spill]] %s7225_s12  ;;  %s5932_s23 = sadd.s32 4294967295, %s7265_s22   ;;  %s7265_s22 = sphi %s7320_s22, %s20_s22   ;;  %s7261_s21 = sphi %s7318_s21, %s8241_s21   ;;  %s7257_s20 = sphi %s7316_s20, %s8233_s20   ;;  %s7253_s19 = sphi %s7314_s19, %s8240_s19   ;;  %s7249_s18 = sphi %s7312_s18, %s8232_s18   ;;  %s7245_s17 = sphi %s7310_s17, %s8239_s17   ;;  %s7241_s16 = sphi %s7308_s16, %s8238_s16   ;;  %s7237_s15 = sphi %s7306_s15, %s8237_s15   ;;  %s7233_s14 = sphi %s7304_s14, %s8236_s14   ;;  %s7229_s13 = sphi %s7302_s13, %s8235_s13   ;;  %s7225_s12 = sphi %s7300_s12, %s8234_s12  }
   0xe   : > { %8207 = sst [smem:[#allocation16_spill]] %s7257_s20  ;;  %s5933_s24 = sadd.s32 4294967294, %s7265_s22  }
   0xf   : > { %p52_p0 = scmp.ne.s32.totalorder %s7241_s16, %s7237_s15  ;;  %p7356_p1 = scmp.eq.s32.totalorder %s5932_s23, 0 }
  0x10   : > { %p119_p2 = scmp.ne.s32.totalorder %s7233_s14, %s7229_s13  ;;  %p120_p4 = scmp.eq.s32.totalorder %s5932_s23, 3 }
  0x11   : > { %s8208_s25 = scalar_select %p7356_p1, 1, 0 }
  0x12   : > { %p7365_p3 = por %p7356_p1, %p52_p0  ;;  %p125_p5 = scmp.ne.s32.totalorder %s7229_s13, %s7225_s12 }
  0x13   : > { %p126_p6 = scmp.eq.s32.totalorder %s5933_s24, 3  ;;  %p7371_p7 = por %p120_p4, %p119_p2 }
  0x14   : > { %s8209_s27 = scalar_select %p7365_p3, 1, 0 }
  0x15   : > { %s8210_s28 = scalar_select %p7371_p7, 1, 0 }
  0x16   : > { %p5934_p8 = scmp.ge.s32.totalorder %s7265_s22, 1  ;;  %p7376_p9 = por %p126_p6, %p125_p5 }
  0x17   : > { %p133_p10 = scmp.lt.s32.totalorder %s7265_s22, 5  ;;  %s7267_s4 = smov [#allocation8]  }
  0x18   : > { %s8211_s29 = scalar_select %p7376_p9, 1, 0 }
  0x19   : > { %p7381_p11 = pnand %p5934_p8, %p133_p10  ;;  %s145_s5 = sshll.u32 %s7267_s4, 4  ;;  %s146_s5 = int_to_ptr.vmem [resolvable:$true] %s145_s5 }
  0x1a   : > { %8212 = sst [smem:[#allocation17_spill]] %s8211_s29  ;;  %s7268_s7 = smov [#allocation10]  }
  0x1b   : > { %s8213_s30 = scalar_select %p7381_p11, 1, 0 }
  0x1c   : > { %p6789_p12 = pneg %p7381_p11  ;;  %s158_s8 = sshll.u32 %s7268_s7, 4  ;;  %s7393_s8 = int_to_ptr.vmem [resolvable:$true] %s158_s8 }
  0x1d   : > { %s8215_s1 = sld [smem:[#allocation19_spill]] }
  0x1e   : > { %p7389_p13 = pnand %p6789_p12, %p7356_p1 }
  0x20   : > { %p7055_p2 = pneg %p7389_p13 }
  0x23   : > { %s7053_s11 = scalar_lea.hbm %s8215_s1, 9216 }
  0x24   : > { %p7054_p0 = scmp.ne.s32.totalorder %s8215_s1, %s7053_s11  ;;  %p7060_p6 = scmp.lt.u32.totalorder %s7053_s11, %s8215_s1 }
  0x26   : > { %p7056_p4 = pnand %p7055_p2, %p7054_p0 }
  0x28   : > { %p7057_p5 = pneg %p7056_p4 }
  0x2a   : > { %p7062_p8 = pnand %p7060_p6, %p7057_p5 }
  0x2c   : > { %7065 = shalt.err (!%p7062_p8)
}
  0x2d   : > { %s7066_s7 = scalar_lea.vmem %s146_s5, 9216  ;;  %p7074_p7 = scmp.lt.s32.totalorder %s146_s5, %s146_s5 }
  0x2e   : > { %p7067_p10 = scmp.ne.s32.totalorder %s146_s5, %s7066_s7  ;;  %p7075_p1 = scmp.lt.s32.totalorder %s7066_s7, %s7066_s7 }
  0x30   : > { %p7069_p12 = pnand %p7067_p10, %p7055_p2  ;;  %p7076_p3 = por %p7075_p1, %p7074_p7 }
  0x32   : > { %p7070_p9 = pneg %p7069_p12 }
  0x34   : > { %p7077_p11 = pnand %p7076_p3, %p7070_p9 }
  0x36   : > { %7080 = shalt.err (!%p7077_p11)
}
  0x37   : > { %s7269_s9 = smov 64   ;;  %s7270_s10 = smov 4  }
  0x38   : > { %6792 = dma.hbm_to_vmem [thread:$0]  (!%p7389_p13), %s8215_s1, 9216, %s146_s5, [#allocation9], %s7269_s9, %s7269_s9, %s7270_s10  }
  0x39   : > { %s8216_s2 = sld [smem:[#allocation20_spill]] }
  0x3f   : > { %s7081_s4 = scalar_lea.hbm %s8216_s2, 9216 }
  0x40   : > { %p7082_p0 = scmp.ne.s32.totalorder %s8216_s2, %s7081_s4  ;;  %p7088_p7 = scmp.lt.u32.totalorder %s7081_s4, %s8216_s2 }
  0x42   : > { %p7084_p1 = pnand %p7082_p0, %p7055_p2 }
  0x44   : > { %p7085_p3 = pneg %p7084_p1 }
  0x46   : > { %p7090_p9 = pnand %p7088_p7, %p7085_p3 }
  0x48   : > { %7093 = shalt.err (!%p7090_p9)
}
  0x49   : > { %s7094_s5 = scalar_lea.vmem %s7393_s8, 9216  ;;  %p7102_p6 = scmp.lt.s32.totalorder %s7393_s8, %s7393_s8 }
  0x4a   : > { %p7095_p11 = scmp.ne.s32.totalorder %s7393_s8, %s7094_s5  ;;  %p7103_p8 = scmp.lt.s32.totalorder %s7094_s5, %s7094_s5 }
  0x4c   : > { %p7097_p4 = pnand %p7095_p11, %p7055_p2  ;;  %p7104_p10 = por %p7103_p8, %p7102_p6 }
  0x4e   : > { %p7098_p5 = pneg %p7097_p4 }
  0x50   : > { %p7105_p12 = pnand %p7104_p10, %p7098_p5 }
  0x52   : > { %7108 = shalt.err (!%p7105_p12)
}
  0x53   : > { %6795 = dma.hbm_to_vmem [thread:$0]  (!%p7389_p13), %s8216_s2, 9216, %s7393_s8, [#allocation9], %s7269_s9, %s7269_s9, %s7270_s10  }
  0x54   : > { %s29_s29 = sadd.s32 1, %s7257_s20  ;;  %s32_s11 = sadd.s32 1, %s7261_s21 }
  0x55   : > { %p30_p2 = scmp.ge.s32.totalorder %s29_s29, 2  ;;  %s39_s6 = sadd.s32 1, %s7245_s17 }
  0x56   : > { %p46_p0 = scmp.ne.s32.totalorder %s7245_s17, %s7241_s16  ;;  %p47_p1 = scmp.eq.s32.totalorder %s7265_s22, 0 }
  0x57   : > { %s8243_s29 = smov (%p30_p2, %s29_s29), 0  ;;  %s8245_s11 = smov (!%p30_p2, %s32_s11), %s7261_s21 }
  0x58   : > { %8217 = sst [smem:[#allocation18_spill]] %s8243_s29  ;;  %p7451_p3 = por %p47_p1, %p46_p0 }
  0x59   : > { %s105_s23 = ssub.s32 %s7257_s20, %s8243_s29  ;;  %p34_p13 = scmp.ge.s32.totalorder %s8245_s11, 2 }
  0x5a   : > { %p6806_p7 = scmp.lt.s32.totalorder %s7265_s22, 4  ;;  %s172_s8 = sand.u32 1, %s7245_s17  }
  0x5b   : > { %s6111_s9 = sshll.u32 %s7261_s21, 12  ;;  %s8247_s11 = smov (%p34_p13, %s8245_s11), 0 }
  0x5c   : > { %s5938_s10 = sshll.u32 %s172_s8, 8  ;;  %s36_s24 = ssub.s32 %s7261_s21, %s8247_s11 }
  0x5d   : > { %p37_p9 = scmp.eq.s32.totalorder %s36_s24, 0  ;;  %s106_s4 = sor.u32 %s105_s23, %s36_s24 }
  0x5e   : > { %p107_p11 = scmp.eq.s32.totalorder %s106_s4, 0  ;;  %s7467_s12 = scalar_lea.hbm %s8191_s0, %s6111_s9 }
  0x5f   : > { %s7470_s26 = scalar_select %p37_p9, %s7245_s17, %s39_s6  }
  0x60   : > { %s8219_s1 = sadd.s32 1, %s7233_s14  ;;  %s176_s29 = scalar_lea.vmem [#allocation5], %s5938_s10 }
  0x61   : > { %s7475_s2 = scalar_select %p107_p11, %s7233_s14, %s8219_s1  }
  0x62   : > { %s183_s20 = sshll.u32 %s176_s29, 4  ;;  %p7481_p4 = pnand %p6806_p7, %p7451_p3  ;;  %s7485_s20 = int_to_ptr.vmem [resolvable:$true] %s183_s20 }
  0x63   : > { %s7487_s9 = scalar_lea.sflag [#allocation6], %s172_s8  ;;  %s7109_s6 = scalar_lea.hbm %s7467_s12, 4096 }
  0x64   : > { %p7110_p5 = scmp.ne.s32.totalorder %s7467_s12, %s7109_s6  ;;  %p7111_p6 = pneg %p7481_p4 }
  0x65   : > { %s7114_s15 = scalar_lea.hbm %s8191_s0, 8192  ;;  %p7115_p12 = scmp.lt.u32.totalorder %s7467_s12, %s8191_s0 }
  0x66   : > { %p7112_p8 = pnand %p7111_p6, %p7110_p5  ;;  %p7116_p2 = scmp.lt.u32.totalorder %s7114_s15, %s7109_s6 }
  0x67   : > { %p7118_p1 = scmp.lt.u32.totalorder %s7109_s6, %s7467_s12 }
  0x68   : > { %p7113_p10 = pneg %p7112_p8  ;;  %p7117_p0 = por %p7116_p2, %p7115_p12 }
  0x6a   : > { %p7119_p3 = por %p7118_p1, %p7117_p0 }
  0x6c   : > { %p7120_p13 = pnand %p7119_p3, %p7113_p10 }
  0x6e   : > { %7123 = shalt.err (!%p7120_p13)
}
  0x6f   : > { %s7124_s8 = scalar_lea.vmem %s7485_s20, 4096  ;;  %s7271_s4 = smov [#allocation5]  }
  0x70   : > { %p7125_p7 = scmp.ne.s32.totalorder %s7485_s20, %s7124_s8  ;;  %s7129_s7 = sshll.u32 %s7271_s4, 4  ;;  %s7130_s7 = int_to_ptr.vmem [resolvable:$false] %s7129_s7 }
  0x71   : > { %s7131_s5 = scalar_lea.vmem %s7130_s7, 8192  ;;  %p7132_p5 = scmp.lt.s32.totalorder %s7485_s20, %s7130_s7 }
  0x72   : > { %p7127_p9 = pnand %p7125_p7, %p7111_p6  ;;  %p7133_p8 = scmp.lt.s32.totalorder %s7131_s5, %s7124_s8 }
  0x74   : > { %p7128_p11 = pneg %p7127_p9  ;;  %p7134_p12 = por %p7133_p8, %p7132_p5 }
  0x76   : > { %p7135_p2 = pnand %p7134_p12, %p7128_p11 }
  0x78   : > { %7138 = shalt.err (!%p7135_p2)
}
  0x79   : > { %s7272_s6 = smov 128   ;;  %s7273_s1 = smov 8  }
  0x7a   : > { %6799 = dma.hbm_to_vmem [thread:$0]  (!%p7481_p4), %s7467_s12, 4096, %s7485_s20, %s7487_s9, %s7272_s6, %s7272_s6, %s7273_s1  }
  0x7b   : > { %p8221_p6 = scmp.ne.s32.totalorder %s8213_s30, 0 }
  0x7c   : > { %s197_s29 = sand.u32 (!%p8221_p6), 1, %s7241_s16   ;;  %p8222_p10 = scmp.ne.s32.totalorder (!%p8221_p6), %s8209_s27, 0 }
  0x7d   : > { %195 = sbr.rel (%p8221_p6) target bundleno = 1063 (0x427), region = 32  ;;  %s7518_s15 = sshll.u32 (!%p8221_p6), %s197_s29, 8 }
  0x7e   : > { %s198_s10 = scalar_lea.sflag (!%p8221_p6), [#allocation6], %s197_s29  ;;  %s201_s24 = scalar_lea.vmem (!%p8221_p6), [#allocation5], %s7518_s15 }
  0x84   : > { %7212 = dma.done.wait (%p8222_p10), %s198_s10, 4096  }
  0x85   : > { %7214 = vsyncadd (%p8222_p10), %s198_s10, 4294963200  ;;  %p8223_p0 = scmp.ne.s32.totalorder %s8208_s25, 0 }
  0x87   : > { %7216 = dma.done.wait (%p8223_p0), [#allocation9], 18432  }
  0x88   : > { %7218 = vsyncadd (%p8223_p0), [#allocation9], 4294948864  ;;  %s229_s20 = sand.u32 1, %s7229_s13   ;;  %s5946_s30 = sshll.u32 %s7249_s18, 3  ;;  %v7274_v0 = vmov 0   ;;  %vm244_vm0 = vcmask 1043459  }
  0x89   : > { %s7533_s12 = sshll.u32 %s229_s20, 7  ;;  %235 = vst [vmem:[#allocation2] sm:$0xff] %v7274_v0  ;;  %236 = vst [vmem:[#allocation2 + $0x8] sm:$0xff] %v7274_v0  ;;  %vm245_vm1 = vsmask.f32 7950  ;;  %s6112_s25 = sshll.u32 %s7249_s18, 7 }
  0x8a   : > { %237 = vst [vmem:[#allocation2 + $0x10] sm:$0xff] %v7274_v0  ;;  %238 = vst [vmem:[#allocation2 + $0x18] sm:$0xff] %v7274_v0  ;;  %vm283_vm3 = vcmask 1044484   ;;  %vm284_vm4 = vsmask.f32 4352  ;;  %s7542_s27 = scalar_lea.vmem %s201_s24, %s6112_s25 [#allocation5]  ;;  %vm348_vm5 = vcmask 31744  }
  0x8b   : > { %240 = vst [vmem:[#allocation2 + $0xa0] sm:$0xff] %v7274_v0  ;;  %241 = vst [vmem:[#allocation2 + $0xa8] sm:$0xff] %v7274_v0  ;;  %v253_v2 = vld [vmem:[#allocation2 + $0x20] sm:$0x8]  ;;  %v256_v3 = vld [vmem:[#allocation2 + $0x30] sm:$0x8] }
  0x8c   : > { %242 = vst [vmem:[#allocation2 + $0xb0] sm:$0xff] %v7274_v0  ;;  %243 = vst [vmem:[#allocation2 + $0xb8] sm:$0xff] %v7274_v0  ;;  %v259_v4 = vld [vmem:[#allocation2 + $0x40] sm:$0x8]  ;;  %v262_v12 = vld [vmem:[#allocation2 + $0x50] sm:$0x8] }
  0x8d   : > { %vm7536_vm2 = vmand %vm244_vm0, %vm245_vm1  ;;  %v265_v14 = vld [vmem:[#allocation2 + $0x60] sm:$0x8]  ;;  %v268_v15 = vld [vmem:[#allocation2 + $0x70] sm:$0x8]  ;;  %s7623_s23 = scalar_lea.vmem [#allocation11], %s7533_s12  ;;  %p5948_p4 = scmp.le.s32.totalorder %s7249_s18, 0 }
  0x8e   : > { %v254_v7 = vsel %vm7536_vm2, 0, %v253_v2  ;;  %v257_v8 = vsel %vm7536_vm2, 0, %v256_v3  ;;  %v260_v11 = vsel %vm7536_vm2, 0, %v259_v4  ;;  %v263_v13 = vsel %vm7536_vm2, 0, %v262_v12  ;;  %v324_v16 = vld [vmem:[%s7542_s27] sm:$0xff]  ;;  %v325_v17 = vld [vmem:[%s7542_s27 + $0x8] sm:$0xff]  ;;  %vm7564_vm6 = vmand %vm283_vm3, %vm284_vm4 }
  0x8f   : > { %255 = vst [vmem:[#allocation2 + $0x20] sm:$0x8] %v254_v7  ;;  %258 = vst [vmem:[#allocation2 + $0x30] sm:$0x8] %v257_v8  ;;  %v266_v18 = vsel %vm7536_vm2, 0, %v265_v14  ;;  %v269_v19 = vsel %vm7536_vm2, 0, %v268_v15  ;;  %v340_v39 = vpack.c.bf16 %v325_v17, %v324_v16 }
  0x90   : > { %v247_v5 = vld [vmem:[#allocation2] sm:$0x8]  ;;  %261 = vst [vmem:[#allocation2 + $0x40] sm:$0x8] %v260_v11  ;;  %264 = vst [vmem:[#allocation2 + $0x50] sm:$0x8] %v263_v13 }
  0x91   : > { %v250_v6 = vld [vmem:[#allocation2 + $0x10] sm:$0x8]  ;;  %v248_v9 = vsel %vm7536_vm2, 0, %v247_v5  ;;  %v271_v20 = vld [vmem:[#allocation2 + $0x80] sm:$0x8]  ;;  %v351_v54 = vsel %vm348_vm5, %v340_v39, 0 }
  0x92   : > { %v251_v10 = vsel %vm7536_vm2, 0, %v250_v6  ;;  %249 = vst [vmem:[#allocation2] sm:$0x8] %v248_v9  ;;  %v274_v21 = vld [vmem:[#allocation2 + $0x90] sm:$0x8]  ;;  %v272_v23 = vsel %vm7536_vm2, 0, %v271_v20 }
  0x93   : > { %252 = vst [vmem:[#allocation2 + $0x10] sm:$0x8] %v251_v10  ;;  %267 = vst [vmem:[#allocation2 + $0x60] sm:$0x8] %v266_v18  ;;  %v275_v24 = vsel %vm7536_vm2, 0, %v274_v21  ;;  %v326_v55 = vld [vmem:[%s7542_s27 + $0x10] sm:$0xff] }
  0x94   : > { %270 = vst [vmem:[#allocation2 + $0x70] sm:$0x8] %v269_v19  ;;  %v277_v25 = vld [vmem:[#allocation2 + $0xa0] sm:$0x8]  ;;  %v280_v26 = vld [vmem:[#allocation2 + $0xb0] sm:$0x8] }
  0x95   : > { %273 = vst [vmem:[#allocation2 + $0x80] sm:$0x8] %v272_v23  ;;  %276 = vst [vmem:[#allocation2 + $0x90] sm:$0x8] %v275_v24  ;;  %v278_v27 = vsel %vm7536_vm2, 0, %v277_v25  ;;  %v281_v28 = vsel %vm7536_vm2, 0, %v280_v26 }
  0x96   : > { %v286_v29 = vld [vmem:[#allocation2 + $0x8] sm:$0x10]  ;;  %v289_v30 = vld [vmem:[#allocation2 + $0x18] sm:$0x10]  ;;  %279 = vst [vmem:[#allocation2 + $0xa0] sm:$0x8] %v278_v27 }
  0x97   : > { %282 = vst [vmem:[#allocation2 + $0xb0] sm:$0x8] %v281_v28  ;;  %v287_v31 = vsel %vm7564_vm6, 0, %v286_v29  ;;  %v290_v32 = vsel %vm7564_vm6, 0, %v289_v30  ;;  %v292_v33 = vld [vmem:[#allocation2 + $0x28] sm:$0x10] }
  0x98   : > { %v295_v34 = vld [vmem:[#allocation2 + $0x38] sm:$0x10]  ;;  %288 = vst [vmem:[#allocation2 + $0x8] sm:$0x10] %v287_v31  ;;  %291 = vst [vmem:[#allocation2 + $0x18] sm:$0x10] %v290_v32 }
  0x99   : > { %v293_v35 = vsel %vm7564_vm6, 0, %v292_v33  ;;  %v296_v36 = vsel %vm7564_vm6, 0, %v295_v34  ;;  %v298_v37 = vld [vmem:[#allocation2 + $0x48] sm:$0x10]  ;;  %v301_v38 = vld [vmem:[#allocation2 + $0x58] sm:$0x10] }
  0x9a   : > { %294 = vst [vmem:[#allocation2 + $0x28] sm:$0x10] %v293_v35  ;;  %297 = vst [vmem:[#allocation2 + $0x38] sm:$0x10] %v296_v36  ;;  %v299_v40 = vsel %vm7564_vm6, 0, %v298_v37  ;;  %v302_v41 = vsel %vm7564_vm6, 0, %v301_v38 }
  0x9b   : > { %v304_v42 = vld [vmem:[#allocation2 + $0x68] sm:$0x10]  ;;  %v307_v43 = vld [vmem:[#allocation2 + $0x78] sm:$0x10]  ;;  %300 = vst [vmem:[#allocation2 + $0x48] sm:$0x10] %v299_v40 }
  0x9c   : > { %303 = vst [vmem:[#allocation2 + $0x58] sm:$0x10] %v302_v41  ;;  %v305_v44 = vsel %vm7564_vm6, 0, %v304_v42  ;;  %v308_v45 = vsel %vm7564_vm6, 0, %v307_v43  ;;  %v310_v46 = vld [vmem:[#allocation2 + $0x88] sm:$0x10] }
  0x9d   : > { %v313_v47 = vld [vmem:[#allocation2 + $0x98] sm:$0x10]  ;;  %306 = vst [vmem:[#allocation2 + $0x68] sm:$0x10] %v305_v44  ;;  %309 = vst [vmem:[#allocation2 + $0x78] sm:$0x10] %v308_v45 }
  0x9e   : > { %v311_v48 = vsel %vm7564_vm6, 0, %v310_v46  ;;  %v314_v49 = vsel %vm7564_vm6, 0, %v313_v47  ;;  %v316_v50 = vld [vmem:[#allocation2 + $0xa8] sm:$0x10]  ;;  %v319_v51 = vld [vmem:[#allocation2 + $0xb8] sm:$0x10] }
  0x9f   : > { %312 = vst [vmem:[#allocation2 + $0x88] sm:$0x10] %v311_v48  ;;  %315 = vst [vmem:[#allocation2 + $0x98] sm:$0x10] %v314_v49  ;;  %v317_v52 = vsel %vm7564_vm6, 0, %v316_v50  ;;  %v320_v53 = vsel %vm7564_vm6, 0, %v319_v51 }
  0xa0   : > { %v327_v56 = vld [vmem:[%s7542_s27 + $0x18] sm:$0xff]  ;;  %v328_v57 = vld [vmem:[%s7542_s27 + $0x20] sm:$0xff]  ;;  %318 = vst [vmem:[#allocation2 + $0xa8] sm:$0x10] %v317_v52  ;;  %321 = vst [vmem:[#allocation2 + $0xb8] sm:$0x10] %v320_v53 }
  0xa1   : > { %v374_v58 = vrot.slane %v351_v54, 4  ;;  %v341_v59 = vpack.c.bf16 %v327_v56, %v326_v55  ;;  %v329_v60 = vld [vmem:[%s7542_s27 + $0x28] sm:$0xff]  ;;  %v330_v61 = vld [vmem:[%s7542_s27 + $0x30] sm:$0xff]  ;;  %v331_v62 = vld [vmem:[%s7542_s27 + $0x38] sm:$0xff]  ;;  %s5949_s9 = sadd.s32 (!%p5948_p4), 4294967294, %s5946_s30 }
  0xa2   : > { %v342_v63 = vpack.c.bf16 %v329_v60, %v328_v57  ;;  %v343_v0 = vpack.c.bf16 %v331_v62, %v330_v61  ;;  %v332_v2 = vld [vmem:[%s7542_s27 + $0x40] sm:$0xff]  ;;  %v333_v3 = vld [vmem:[%s7542_s27 + $0x48] sm:$0xff]  ;;  %v334_v4 = vld [vmem:[%s7542_s27 + $0x50] sm:$0xff]  ;;  %s5950_s8 = sshll.u32 (!%p5948_p4), %s5949_s9, 4 }
  0xa3   : > { %391 = vst [vmem:[#allocation2 + $0x28] ss:$-4 sps:$4 sm:$0xff] %v374_v58   ;;  %v353_v5 = vsel %vm348_vm5, %v341_v59, 0  ;;  %v344_v6 = vpack.c.bf16 %v333_v3, %v332_v2  ;;  %v335_v7 = vld [vmem:[%s7542_s27 + $0x58] sm:$0xff]  ;;  %v336_v8 = vld [vmem:[%s7542_s27 + $0x60] sm:$0xff]  ;;  %v337_v9 = vld [vmem:[%s7542_s27 + $0x68] sm:$0xff]  ;;  %s413_s4 = scalar_lea.vmem (!%p5948_p4), %s201_s24, %s5950_s8 [#allocation5] }
  0xa4   : > { %v375_v10 = vrot.slane %v353_v5, 4  ;;  %v355_v11 = vsel %vm348_vm5, %v342_v63, 0  ;;  %v357_v12 = vsel %vm348_vm5, %v343_v0, 0  ;;  %v345_v13 = vpack.c.bf16 %v335_v7, %v334_v4  ;;  %v338_v14 = vld [vmem:[%s7542_s27 + $0x70] sm:$0xff]  ;;  %v339_v15 = vld [vmem:[%s7542_s27 + $0x78] sm:$0xff]  ;;  %v414_v29 = vld [vmem:[%s413_s4] sm:$0xff] (!%p5948_p4) }
  0xa5   : > { %v376_v16 = vrot.slane %v355_v11, 4  ;;  %v377_v17 = vrot.slane %v357_v12, 4  ;;  %v359_v18 = vsel %vm348_vm5, %v344_v6, 0  ;;  %v346_v19 = vpack.c.bf16 %v337_v9, %v336_v8  ;;  %410 = sbr.rel (%p5948_p4) target bundleno = 173 (0xad), region = 48  ;;  %v415_v30 = vld [vmem:[%s413_s4 + $0x8] sm:$0xff] (!%p5948_p4)  ;;  %v416_v31 = vld [vmem:[%s413_s4 + $0x10] sm:$0xff] (!%p5948_p4) }
  0xa6   : > { %393 = vst [vmem:[#allocation2 + $0x38] ss:$-4 sps:$4 sm:$0xff] %v375_v10   ;;  %v378_v20 = vrot.slane %v359_v18, 4  ;;  %v361_v21 = vsel %vm348_vm5, %v345_v13, 0  ;;  %v347_v23 = vpack.c.bf16 %v339_v15, %v338_v14  ;;  %v418_v32 = vpack.c.bf16 (!%p5948_p4), %v415_v30, %v414_v29  ;;  %v417_v33 = vld [vmem:[%s413_s4 + $0x18] sm:$0xff] (!%p5948_p4) }
  0xa7   : > { %395 = vst [vmem:[#allocation2 + $0x48] ss:$-4 sps:$4 sm:$0xff] %v376_v16   ;;  %397 = vst [vmem:[#allocation2 + $0x58] ss:$-4 sps:$4 sm:$0xff] %v377_v17   ;;  %v379_v24 = vrot.slane %v361_v21, 4  ;;  %v363_v25 = vsel %vm348_vm5, %v346_v19, 0  ;;  %v419_v34 = vpack.c.bf16 (!%p5948_p4), %v417_v33, %v416_v31 }
  0xa8   : > { %399 = vst [vmem:[#allocation2 + $0x68] ss:$-4 sps:$4 sm:$0xff] %v378_v20   ;;  %v380_v26 = vrot.slane %v363_v25, 4  ;;  %v365_v27 = vsel %vm348_vm5, %v347_v23, 0  ;;  %v421_v35 = vsel (!%p5948_p4), %vm348_vm5, %v418_v32, 0 }
  0xa9   : > { %401 = vst [vmem:[#allocation2 + $0x78] ss:$-4 sps:$4 sm:$0xff] %v379_v24   ;;  %v381_v28 = vrot.slane %v365_v27, 4  ;;  %v426_v36 = vrot.slane (!%p5948_p4), %v421_v35, 4  ;;  %v423_v37 = vsel (!%p5948_p4), %vm348_vm5, %v419_v34, 0 }
  0xaa   : > { %403 = vst [vmem:[#allocation2 + $0x88] ss:$-4 sps:$4 sm:$0xff] %v380_v26   ;;  %v427_v38 = vrot.slane (!%p5948_p4), %v423_v37, 4 }
  0xab   : > { %405 = vst [vmem:[#allocation2 + $0x98] ss:$-4 sps:$4 sm:$0xff] %v381_v28   ;;  %430 = vst [vmem:[#allocation2 + $0x8] ss:$-4 sps:$4 sm:$0xff] (!%p5948_p4), %v426_v36  }
  0xac   : > { %432 = vst [vmem:[#allocation2 + $0x18] ss:$-4 sps:$4 sm:$0xff] %v427_v38  }
  0xad PF: > { %p5951_p1 = scmp.ge.s32.totalorder %s7249_s18, 1 }
  0xae   : > { %v5954_v39 = vld [vmem:[%s7542_s27 + $0x80] sm:$0xff] (!%p5951_p1)  ;;  %v5955_v40 = vld [vmem:[%s7542_s27 + $0x88] sm:$0xff] (!%p5951_p1)  ;;  %v5956_v41 = vld [vmem:[%s7542_s27 + $0x90] sm:$0xff] (!%p5951_p1) }
  0xaf   : > { %437 = sbr.rel (%p5951_p1) target bundleno = 182 (0xb6), region = 52  ;;  %v445_v42 = vpack.c.bf16 (!%p5951_p1), %v5955_v40, %v5954_v39  ;;  %v5957_v43 = vld [vmem:[%s7542_s27 + $0x98] sm:$0xff] (!%p5951_p1) }
  0xb0   : > { %v446_v44 = vpack.c.bf16 (!%p5951_p1), %v5957_v43, %v5956_v41 }
  0xb1   : > { %v448_v45 = vsel (!%p5951_p1), %vm348_vm5, %v445_v42, 0 }
  0xb2   : > { %v453_v46 = vrot.slane (!%p5951_p1), %v448_v45, 4  ;;  %v450_v47 = vsel (!%p5951_p1), %vm348_vm5, %v446_v44, 0 }
  0xb3   : > { %v454_v48 = vrot.slane (!%p5951_p1), %v450_v47, 4 }
  0xb4   : > { %457 = vst [vmem:[#allocation2 + $0xa8] ss:$-4 sps:$4 sm:$0xff] (!%p5951_p1), %v453_v46  }
  0xb5   : > { %459 = vst [vmem:[#allocation2 + $0xb8] ss:$-4 sps:$4 sm:$0xff] (!%p5951_p1), %v454_v48  }
  0xb6 PF: > { %v6909_v49 = vld [vmem:[#allocation8 + $0x40] sm:$0xff]   ;;  %v6913_v53 = vld [vmem:[#allocation8 + $0x48] sm:$0xff]   ;;  %v6917_v57 = vld [vmem:[#allocation8 + $0x50] sm:$0xff]   ;;  %vm711_vm7 = vcmask 1043456   ;;  %vm782_vm8 = vsmask.f32 3328 }
  0xb7   : > { %v6910_v50 = vld [vmem:[#allocation8 + $0xc0] sm:$0xff]   ;;  %6115 = vmatprep.subr.bf16.mxu0 %v6909_v49  ;;  %v6914_v54 = vld [vmem:[#allocation8 + $0xc8] sm:$0xff]   ;;  %v6918_v58 = vld [vmem:[#allocation8 + $0xd0] sm:$0xff]   ;;  %p6030_p3 = scmp.ne.s32.totalorder %s7249_s18, 0 }
  0xb8   : > { %v6911_v51 = vld [vmem:[#allocation8] sm:$0xff]   ;;  %6191 = vmatprep.subr.bf16.mxu1 %v6910_v50  ;;  %v6915_v55 = vld [vmem:[#allocation8 + $0x8] sm:$0xff]   ;;  %v6919_v59 = vld [vmem:[#allocation8 + $0x10] sm:$0xff]  }
  0xb9   : > { %v6912_v52 = vld [vmem:[#allocation8 + $0x80] sm:$0xff]   ;;  %6116 = vmatpush3.bf16.msra.mxu0 %v6911_v51  ;;  %v6916_v56 = vld [vmem:[#allocation8 + $0x88] sm:$0xff]   ;;  %v6920_v60 = vld [vmem:[#allocation8 + $0x90] sm:$0xff]  }
  0xba   : > { %6192 = vmatpush3.bf16.msra.mxu1 %v6912_v52  ;;  %6117 = vmatprep.subr.bf16.mxu0 %v6913_v53  ;;  %v6921_v61 = vld [vmem:[#allocation8 + $0x58] sm:$0xff]   ;;  %v6925_v2 = vld [vmem:[#allocation8 + $0x60] sm:$0xff]   ;;  %v6929_v6 = vld [vmem:[#allocation8 + $0x68] sm:$0xff]  }
  0xbb   : > { %6193 = vmatprep.subr.bf16.mxu1 %v6914_v54  ;;  %v6922_v62 = vld [vmem:[#allocation8 + $0xd8] sm:$0xff]   ;;  %v6926_v3 = vld [vmem:[#allocation8 + $0xe0] sm:$0xff]   ;;  %v6930_v7 = vld [vmem:[#allocation8 + $0xe8] sm:$0xff]  }
  0xbc   : > { %v6923_v63 = vld [vmem:[#allocation8 + $0x18] sm:$0xff]   ;;  %v6927_v4 = vld [vmem:[#allocation8 + $0x20] sm:$0xff]   ;;  %v6931_v8 = vld [vmem:[#allocation8 + $0x28] sm:$0xff]  }
  0xbd   : > { %6118 = vmatpush3.bf16.msra.mxu0 %v6915_v55  ;;  %v6924_v0 = vld [vmem:[#allocation8 + $0x98] sm:$0xff]   ;;  %v6928_v5 = vld [vmem:[#allocation8 + $0xa0] sm:$0xff]   ;;  %v6932_v9 = vld [vmem:[#allocation8 + $0xa8] sm:$0xff]  }
  0xbe   : > { %6194 = vmatpush3.bf16.msra.mxu1 %v6916_v56  ;;  %6119 = vmatprep.subr.bf16.mxu0 %v6917_v57  ;;  %v6933_v10 = vld [vmem:[#allocation8 + $0x70] sm:$0xff]   ;;  %v6937_v14 = vld [vmem:[#allocation8 + $0x78] sm:$0xff]   ;;  %v671_v18 = vld [vmem:[#allocation2] sm:$0xf0] }
  0xbf   : > { %6195 = vmatprep.subr.bf16.mxu1 %v6918_v58  ;;  %v6934_v11 = vld [vmem:[#allocation8 + $0xf0] sm:$0xff]   ;;  %v6938_v15 = vld [vmem:[#allocation8 + $0xf8] sm:$0xff]   ;;  %v672_v19 = vld [vmem:[#allocation2 + $0x8] sm:$0xf]  ;;  %v712_v21 = vrot.slane %v671_v18, 4 }
  0xc0   : > { %v6935_v12 = vld [vmem:[#allocation8 + $0x30] sm:$0xff]   ;;  %v6939_v16 = vld [vmem:[#allocation8 + $0x38] sm:$0xff]   ;;  %v713_v23 = vrot.slane %v672_v19, 4  ;;  %v461_v29 = vld [vmem:[#allocation2] sm:$0xf8] }
  0xc1   : > { %6120 = vmatpush3.bf16.msra.mxu0 %v6919_v59  ;;  %v6936_v13 = vld [vmem:[#allocation8 + $0xb0] sm:$0xff]   ;;  %v6940_v17 = vld [vmem:[#allocation8 + $0xb8] sm:$0xff]   ;;  %v462_v30 = vld [vmem:[#allocation2 + $0x8] sm:$0xf]  ;;  %v482_v34 = vshrl.u32 %v461_v29, 16  ;;  %v485_v39 = vshll.u32 %v461_v29, 16 }
  0xc2   : > { %6196 = vmatpush3.bf16.msra.mxu1 %v6920_v60  ;;  %6121 = vmatprep.subr.bf16.mxu0 %v6921_v61  ;;  %v974_v20 = vld [vmem:[#allocation2 + $0x10] sm:$0xf8]  ;;  %v975_v24 = vld [vmem:[#allocation2 + $0x18] sm:$0xf]  ;;  %v714_v31 = vsel %vm711_vm7, %v712_v21, %v713_v23  ;;  %v762_v35 = vld [vmem:[#allocation2] sm:$0xf0] }
  0xc3   : > { %6197 = vmatprep.subr.bf16.mxu1 %v6922_v62  ;;  %v995_v25 = vshrl.u32 %v974_v20, 16  ;;  %v998_v26 = vshll.u32 %v974_v20, 16  ;;  %v1003_v27 = vshrl.u32 %v975_v24, 16  ;;  %v1006_v28 = vshll.u32 %v975_v24, 16  ;;  %v6941_v36 = vld [vmem:[#allocation8 + $0x140] sm:$0xff]   ;;  %2692 = vmatprep.mubr.bf16.mxu0 %v714_v31  ;;  %v6945_v23 = vld [vmem:[#allocation8 + $0x150] sm:$0xff]  }
  0xc4   : > { %v490_v40 = vshrl.u32 %v462_v30, 16  ;;  %v763_v41 = vld [vmem:[#allocation2 + $0x8] sm:$0x1f]  ;;  %v484_v43 = vrot.slane %v482_v34, 3  ;;  %v493_v44 = vshll.u32 %v462_v30, 16  ;;  %v487_v46 = vrot.slane %v485_v39, 4 }
  0xc5   : > { %6122 = vmatpush3.bf16.msra.mxu0 %v6923_v63  ;;  %v997_v32 = vrot.slane %v995_v25, 3  ;;  %v1000_v33 = vrot.slane %v998_v26, 4  ;;  %v1005_v37 = vrot.slane %v1003_v27, 3  ;;  %v1008_v38 = vrot.slane %v1006_v28, 4  ;;  %v6942_v56 = vld [vmem:[#allocation8 + $0x100] sm:$0xff]   ;;  %v6943_v63 = vld [vmem:[#allocation8 + $0x148] sm:$0xff]  }
  0xc6   : > { %6198 = vmatpush3.bf16.msra.mxu1 %v6924_v0  ;;  %6123 = vmatprep.subr.bf16.mxu0 %v6925_v2  ;;  %v492_v47 = vrot.slane %v490_v40, 3  ;;  %v784_v48 = vshrl.u32 %v762_v35, 16  ;;  %v495_v49 = vrot.slane %v493_v44, 4  ;;  %v787_v50 = vshll.u32 %v762_v35, 16  ;;  %v673_v57 = vld [vmem:[#allocation2 + $0x10] sm:$0xf0] }
  0xc7   : > { %6199 = vmatprep.subr.bf16.mxu1 %v6926_v3  ;;  %v1001_v42 = vor.u32 %v1000_v33, %v997_v32  ;;  %v1009_v45 = vor.u32 %v1008_v38, %v1005_v37  ;;  %v792_v51 = vshrl.u32 %v763_v41, 16  ;;  %v795_v52 = vshll.u32 %v763_v41, 16  ;;  %v674_v62 = vld [vmem:[#allocation2 + $0x18] sm:$0xf]  ;;  %v976_v3 = vld [vmem:[#allocation2 + $0x20] sm:$0xf8] }
  0xc8   : > { %v488_v54 = vor.u32 %v487_v46, %v484_v43  ;;  %v786_v55 = vrot.slane %v784_v48, 4  ;;  %v496_v58 = vor.u32 %v495_v49, %v492_v47  ;;  %v789_v59 = vrot.slane %v787_v50, 5  ;;  %v765_v21 = vld [vmem:[#allocation2 + $0x18] sm:$0x1f]  ;;  %v6946_v32 = vld [vmem:[#allocation8 + $0x110] sm:$0xff]   ;;  %v6949_v48 = vld [vmem:[#allocation8 + $0x1c0] sm:$0xff]  }
  0xc9   : > { %6124 = vmatpush3.bf16.msra.mxu0 %v6927_v4  ;;  %v1010_v53 = vsel %vm284_vm4, %v1001_v42, %v1009_v45  ;;  %v794_v60 = vrot.slane %v792_v51, 4  ;;  %v797_v61 = vrot.slane %v795_v52, 5  ;;  %v715_v0 = vrot.slane %v673_v57, 4  ;;  %v977_v4 = vld [vmem:[#allocation2 + $0x28] sm:$0xf]  ;;  %v6947_v42 = vld [vmem:[#allocation8 + $0x158] sm:$0xff]  }
  0xca   : > { %6200 = vmatpush3.bf16.msra.mxu1 %v6928_v5  ;;  %6125 = vmatprep.subr.bf16.mxu0 %v6929_v6  ;;  %v716_v2 = vrot.slane %v674_v62, 4  ;;  %v497_v5 = vsel %vm284_vm4, %v488_v54, %v496_v58  ;;  %v790_v6 = vor.u32 %v789_v59, %v786_v55  ;;  %v809_v40 = vshrl.u32 %v765_v21, 16  ;;  %v675_v41 = vld [vmem:[#allocation2 + $0x20] sm:$0xf0]  ;;  %v676_v46 = vld [vmem:[#allocation2 + $0x28] sm:$0xf] }
  0xcb   : > { %6201 = vmatprep.subr.bf16.mxu1 %v6930_v7  ;;  %2805 = vmatprep.mubr.bf16.mxu1 %v1010_v53  ;;  %v798_v7 = vor.u32 %v797_v61, %v794_v60  ;;  %v812_v45 = vshll.u32 %v765_v21, 16  ;;  %v718_v47 = vrot.slane %v675_v41, 4  ;;  %v719_v51 = vrot.slane %v676_v46, 4  ;;  %v978_v52 = vld [vmem:[#allocation2 + $0x30] sm:$0xf8]  ;;  %v6948_v54 = vld [vmem:[#allocation8 + $0x118] sm:$0xff]  }
  0xcc   : > { %v811_v50 = vrot.slane %v809_v40, 4  ;;  %v979_v53 = vld [vmem:[#allocation2 + $0x38] sm:$0xf]  ;;  %v1029_v57 = vshrl.u32 %v978_v52, 16  ;;  %v1032_v58 = vshll.u32 %v978_v52, 16  ;;  %v6950_v60 = vld [vmem:[#allocation8 + $0x180] sm:$0xff]  }
  0xcd   : > { %6126 = vmatpush3.bf16.msra.mxu0 %v6931_v8  ;;  %v1012_v8 = vshrl.u32 %v976_v3, 16  ;;  %v465_v59 = vld [vmem:[#allocation2 + $0x20] sm:$0xf8]  ;;  %v720_v62 = vsel %vm711_vm7, %v718_v47, %v719_v51  ;;  %v6953_v40 = vld [vmem:[#allocation8 + $0x1c8] sm:$0xff]   ;;  %v768_v51 = vld [vmem:[#allocation2 + $0x30] sm:$0xf0] }
  0xce   : > { %6202 = vmatpush3.bf16.msra.mxu1 %v6932_v9  ;;  %6127 = vmatprep.subr.bf16.mxu0 %v6933_v10  ;;  %v463_v9 = vld [vmem:[#allocation2 + $0x10] sm:$0xf8]  ;;  %v464_v10 = vld [vmem:[#allocation2 + $0x18] sm:$0xf]  ;;  %v6954_v52 = vld [vmem:[#allocation8 + $0x188] sm:$0xff]  }
  0xcf   : > { %6203 = vmatprep.subr.bf16.mxu1 %v6934_v11  ;;  %v717_v11 = vsel %vm711_vm7, %v715_v0, %v716_v2  ;;  %v1014_v18 = vrot.slane %v1012_v8, 3  ;;  %v499_v19 = vshrl.u32 %v463_v9, 16  ;;  %v502_v20 = vshll.u32 %v463_v9, 16  ;;  %v466_v2 = vld [vmem:[#allocation2 + $0x28] sm:$0xf]  ;;  %v6951_v9 = vld [vmem:[#allocation8 + $0x160] sm:$0xff]  }
  0xd0   : > { %v507_v27 = vshrl.u32 %v464_v10, 16  ;;  %v510_v30 = vshll.u32 %v464_v10, 16  ;;  %v1040_v0 = vshll.u32 %v979_v53, 16  ;;  %v767_v8 = vld [vmem:[#allocation2 + $0x28] sm:$0x1f] }
  0xd1   : > { %6128 = vmatpush3.bf16.msra.mxu0 %v6935_v12  ;;  %v1015_v12 = vshll.u32 %v976_v3, 16  ;;  %v501_v28 = vrot.slane %v499_v19, 3  ;;  %v504_v29 = vrot.slane %v502_v20, 4  ;;  %v766_v3 = vld [vmem:[#allocation2 + $0x20] sm:$0xf0] }
  0xd2   : > { %6204 = vmatpush3.bf16.msra.mxu1 %v6936_v13  ;;  %6129 = vmatprep.subr.bf16.mxu0 %v6937_v14  ;;  %v1020_v13 = vshrl.u32 %v977_v4, 16  ;;  %v1023_v14 = vshll.u32 %v977_v4, 16  ;;  %v509_v35 = vrot.slane %v507_v27, 3  ;;  %v512_v38 = vrot.slane %v510_v30, 4  ;;  %v3344_v1 = vld [vmem:[#allocation3 + $0x38] sm:$0x10] }
  0xd3   : > { %6205 = vmatprep.subr.bf16.mxu1 %v6938_v15  ;;  %v764_v15 = vld [vmem:[#allocation2 + $0x10] sm:$0xf0]  ;;  %v1017_v24 = vrot.slane %v1015_v12, 4  ;;  %v505_v37 = vor.u32 %v504_v29, %v501_v28  ;;  %v519_v12 = vshll.u32 %v465_v59, 16  ;;  %v818_v21 = vshrl.u32 %v766_v3, 16 }
  0xd4   : > { %v1022_v25 = vrot.slane %v1020_v13, 3  ;;  %v1025_v26 = vrot.slane %v1023_v14, 4  ;;  %v801_v31 = vshrl.u32 %v764_v15, 16  ;;  %v513_v49 = vor.u32 %v512_v38, %v509_v35  ;;  %v677_v28 = vld [vmem:[#allocation2 + $0x30] sm:$0xf0] }
  0xd5   : > { %6130 = vmatpush3.bf16.msra.mxu0 %v6939_v16  ;;  %v6944_v16 = vld [vmem:[#allocation8 + $0x108] sm:$0xff]   ;;  %v1018_v33 = vor.u32 %v1017_v24, %v1014_v18  ;;  %v524_v13 = vshrl.u32 %v466_v2, 16  ;;  %v521_v19 = vrot.slane %v519_v12, 4  ;;  %v829_v27 = vshll.u32 %v767_v8, 16 }
  0xd6   : > { %6206 = vmatpush3.bf16.msra.mxu1 %v6940_v17  ;;  %6267 = vmatprep.subr.bf16.mxu0 %v6941_v36  ;;  %v799_v17 = vsel %vm782_vm8, %v790_v6, %v798_v7  ;;  %v1026_v34 = vor.u32 %v1025_v26, %v1022_v25  ;;  %v804_v36 = vshll.u32 %v764_v15, 16  ;;  %v803_v39 = vrot.slane %v801_v31, 4 }
  0xd7   : > { %6343 = vmatprep.subr.bf16.mxu1 %v6949_v48  ;;  %v514_v61 = vsel %vm284_vm4, %v505_v37, %v513_v49  ;;  %v1034_v6 = vrot.slane %v1032_v58, 4  ;;  %v516_v7 = vshrl.u32 %v465_v59, 16  ;;  %v526_v20 = vrot.slane %v524_v13, 3  ;;  %v6955_v58 = vld [vmem:[#allocation8 + $0x168] sm:$0xff]  }
  0xd8   : > { %2693 = vmatmul.mubr.bf16.vlgmr.msra.gmra.mrb[0].mxu0 %v497_v5  ;;  %v1027_v43 = vsel %vm284_vm4, %v1018_v33, %v1026_v34  ;;  %v806_v44 = vrot.slane %v804_v36, 5  ;;  %v1031_v5 = vrot.slane %v1029_v57, 3  ;;  %v821_v25 = vshll.u32 %v766_v3, 16  ;;  %v980_v34 = vld [vmem:[#allocation2 + $0x40] sm:$0xf8] }
  0xd9   : > { %6268 = vmatpush3.bf16.msra.mxu0 %v6942_v56  ;;  %2700 = vmatprep.mubr.bf16.mxu0 %v717_v11  ;;  %v814_v56 = vrot.slane %v812_v45, 5  ;;  %v1042_v11 = vrot.slane %v1040_v0, 4  ;;  %v826_v26 = vshrl.u32 %v767_v8, 16  ;;  %v820_v31 = vrot.slane %v818_v21, 4  ;;  %v467_v45 = vld [vmem:[#allocation2 + $0x30] sm:$0xf8] }
  0xda   : > { %2806 = vmatmul.mubr.bf16.vlgmr.msra.gmra.mrb[0].mxu1 %v799_v17  ;;  %6269 = vmatprep.subr.bf16.mxu0 %v6943_v63  ;;  %v807_v55 = vor.u32 %v806_v44, %v803_v39  ;;  %v1037_v63 = vshrl.u32 %v979_v53, 16  ;;  %v1035_v15 = vor.u32 %v1034_v6, %v1031_v5  ;;  %v527_v17 = vshll.u32 %v466_v2, 16  ;;  %v981_v39 = vld [vmem:[#allocation2 + $0x48] sm:$0xf]  ;;  %v769_v57 = vld [vmem:[#allocation2 + $0x38] sm:$0x1f] }
  0xdb   : > { %2813 = vmatprep.mubr.bf16.mxu1 %v1027_v43  ;;  %v815_v4 = vor.u32 %v814_v56, %v811_v50  ;;  %6344 = vmatpush3.bf16.msra.mxu1 %v6950_v60  ;;  %v721_v33 = vrot.slane %v677_v28, 4  ;;  %v823_v36 = vrot.slane %v821_v25, 5  ;;  %v828_v37 = vrot.slane %v826_v26, 4  ;;  %v468_v50 = vld [vmem:[#allocation2 + $0x38] sm:$0xf]  ;;  %v6957_v5 = vld [vmem:[#allocation8 + $0x1d0] sm:$0xff]  }
  0xdc   : > { %v1039_v10 = vrot.slane %v1037_v63, 3  ;;  %v529_v24 = vrot.slane %v527_v17, 4  ;;  %v831_v38 = vrot.slane %v829_v27, 5  ;;  %v1049_v43 = vshll.u32 %v980_v34, 16  ;;  %6345 = vmatprep.subr.bf16.mxu1 %v6953_v40  ;;  %v6956_v63 = vld [vmem:[#allocation8 + $0x128] sm:$0xff]   ;;  %v6959_v28 = vld [vmem:[#allocation8 + $0x170] sm:$0xff]  }
  0xdd   : > { %6270 = vmatpush3.bf16.msra.mxu0 %v6944_v16  ;;  %v816_v14 = vsel %vm782_vm8, %v807_v55, %v815_v4  ;;  %v518_v16 = vrot.slane %v516_v7, 3  ;;  %v1054_v44 = vshrl.u32 %v981_v39, 16  ;;  %v824_v47 = vor.u32 %v823_v36, %v820_v31  ;;  %v982_v21 = vld [vmem:[#allocation2 + $0x50] sm:$0xf8] }
  0xde   : > { %6271 = vmatprep.subr.bf16.mxu0 %v6945_v23  ;;  %v1043_v18 = vor.u32 %v1042_v11, %v1039_v10  ;;  %v6952_v23 = vld [vmem:[#allocation8 + $0x120] sm:$0xff]   ;;  %v530_v35 = vor.u32 %v529_v24, %v526_v20  ;;  %v832_v48 = vor.u32 %v831_v38, %v828_v37  ;;  %v1057_v49 = vshll.u32 %v981_v39, 16  ;;  %v6958_v11 = vld [vmem:[#allocation8 + $0x190] sm:$0xff]   ;;  %v470_v39 = vld [vmem:[#allocation2 + $0x48] sm:$0xf] }
  0xdf   : > { %v522_v30 = vor.u32 %v521_v19, %v518_v16  ;;  %v1051_v55 = vrot.slane %v1049_v43, 4  ;;  %v1056_v56 = vrot.slane %v1054_v44, 3  ;;  %6346 = vmatpush3.bf16.msra.mxu1 %v6954_v52  ;;  %v541_v2 = vshrl.u32 %v468_v50, 16  ;;  %v679_v10 = vld [vmem:[#allocation2 + $0x40] sm:$0xf0] }
  0xe0   : > { %2701 = vmatmul.mubr.bf16.gmra.mrb[4].mxu0 %v514_v61  ;;  %v1044_v29 = vsel %vm284_vm4, %v1035_v15, %v1043_v18  ;;  %v833_v59 = vsel %vm782_vm8, %v824_v47, %v832_v48  ;;  %v1059_v60 = vrot.slane %v1057_v49, 4  ;;  %v533_v61 = vshrl.u32 %v467_v45, 16  ;;  %v680_v16 = vld [vmem:[#allocation2 + $0x48] sm:$0xf]  ;;  %6347 = vmatprep.subr.bf16.mxu1 %v6957_v5  ;;  %v469_v38 = vld [vmem:[#allocation2 + $0x40] sm:$0xf8] }
  0xe1   : > { %6272 = vmatpush3.bf16.msra.mxu0 %v6946_v32  ;;  %2708 = vmatprep.mubr.bf16.mxu0 %v720_v62  ;;  %v678_v32 = vld [vmem:[#allocation2 + $0x38] sm:$0xf]  ;;  %v531_v46 = vsel %vm284_vm4, %v522_v30, %v530_v35  ;;  %v536_v62 = vshll.u32 %v467_v45, 16  ;;  %v544_v3 = vshll.u32 %v468_v50, 16  ;;  %v835_v4 = vshrl.u32 %v768_v51, 16 }
  0xe2   : > { %6273 = vmatprep.subr.bf16.mxu0 %v6947_v42  ;;  %2814 = vmatmul.mubr.bf16.gmra.mrb[4].mxu1 %v816_v14  ;;  %v722_v41 = vrot.slane %v678_v32, 4  ;;  %v1046_v42 = vshrl.u32 %v980_v34, 16  ;;  %v1060_v6 = vor.u32 %v1059_v60, %v1056_v56  ;;  %v535_v7 = vrot.slane %v533_v61, 3  ;;  %v770_v44 = vld [vmem:[#allocation2 + $0x40] sm:$0xf0]  ;;  %v6961_v45 = vld [vmem:[#allocation8 + $0x1d8] sm:$0xff]  }
  0xe3   : > { %2821 = vmatprep.mubr.bf16.mxu1 %v1044_v29  ;;  %v538_v8 = vrot.slane %v536_v62, 4  ;;  %v543_v12 = vrot.slane %v541_v2, 3  ;;  %v546_v13 = vrot.slane %v544_v3, 4  ;;  %v837_v14 = vrot.slane %v835_v4, 4  ;;  %6348 = vmatpush3.bf16.msra.mxu1 %v6958_v11  ;;  %v771_v50 = vld [vmem:[#allocation2 + $0x48] sm:$0x1f] }
  0xe4   : > { %v723_v53 = vsel %vm711_vm7, %v721_v33, %v722_v41  ;;  %v843_v15 = vshrl.u32 %v769_v57, 16  ;;  %v846_v20 = vshll.u32 %v769_v57, 16  ;;  %v724_v26 = vrot.slane %v679_v10, 4  ;;  %v6960_v33 = vld [vmem:[#allocation8 + $0x130] sm:$0xff]   ;;  %6349 = vmatprep.subr.bf16.mxu1 %v6961_v45  ;;  %v682_v5 = vld [vmem:[#allocation2 + $0x58] sm:$0xf] }
  0xe5   : > { %6274 = vmatpush3.bf16.msra.mxu0 %v6948_v54  ;;  %v1048_v54 = vrot.slane %v1046_v42, 3  ;;  %v539_v18 = vor.u32 %v538_v8, %v535_v7  ;;  %v547_v24 = vor.u32 %v546_v13, %v543_v12  ;;  %v725_v27 = vrot.slane %v680_v16, 4  ;;  %v681_v4 = vld [vmem:[#allocation2 + $0x50] sm:$0xf0]  ;;  %v984_v11 = vld [vmem:[#allocation2 + $0x60] sm:$0xf8] }
  0xe6   : > { %6275 = vmatprep.subr.bf16.mxu0 %v6951_v9  ;;  %v838_v9 = vshll.u32 %v768_v51, 16  ;;  %v845_v25 = vrot.slane %v843_v15, 4  ;;  %v848_v30 = vrot.slane %v846_v20, 5  ;;  %v1063_v31 = vshrl.u32 %v982_v21, 16  ;;  %v6964_v12 = vld [vmem:[#allocation8 + $0x1a0] sm:$0xff]  }
  0xe7   : > { %v1052_v0 = vor.u32 %v1051_v55, %v1048_v54  ;;  %v1066_v32 = vshll.u32 %v982_v21, 16  ;;  %v548_v34 = vsel %vm284_vm4, %v539_v18, %v547_v24  ;;  %v726_v35 = vsel %vm711_vm7, %v724_v26, %v725_v27  ;;  %v985_v15 = vld [vmem:[#allocation2 + $0x68] sm:$0xf]  ;;  %v472_v24 = vld [vmem:[#allocation2 + $0x58] sm:$0xf] }
  0xe8   : > { %2709 = vmatmul.mubr.bf16.gmra.mrb[8].mxu0 %v531_v46  ;;  %v840_v19 = vrot.slane %v838_v9, 5  ;;  %v849_v40 = vor.u32 %v848_v30, %v845_v25  ;;  %v1065_v41 = vrot.slane %v1063_v31, 3  ;;  %v550_v43 = vshrl.u32 %v469_v38, 16  ;;  %v6965_v25 = vld [vmem:[#allocation8 + $0x178] sm:$0xff]   ;;  %v772_v30 = vld [vmem:[#allocation2 + $0x50] sm:$0xf0] }
  0xe9   : > { %6276 = vmatpush3.bf16.msra.mxu0 %v6952_v23  ;;  %2716 = vmatprep.mubr.bf16.mxu0 %v723_v53  ;;  %v1061_v17 = vsel %vm284_vm4, %v1052_v0, %v1060_v6  ;;  %v983_v23 = vld [vmem:[#allocation2 + $0x58] sm:$0xf]  ;;  %v1068_v42 = vrot.slane %v1066_v32, 4  ;;  %v553_v48 = vshll.u32 %v469_v38, 16  ;;  %v558_v49 = vshrl.u32 %v470_v39, 16  ;;  %v6963_v6 = vld [vmem:[#allocation8 + $0x1e0] sm:$0xff]  }
  0xea   : > { %2822 = vmatmul.mubr.bf16.gmra.mrb[8].mxu1 %v833_v59  ;;  %6277 = vmatprep.subr.bf16.mxu0 %v6955_v58  ;;  %v841_v29 = vor.u32 %v840_v19, %v837_v14  ;;  %v1071_v36 = vshrl.u32 %v983_v23, 16  ;;  %v1074_v37 = vshll.u32 %v983_v23, 16  ;;  %v552_v53 = vrot.slane %v550_v43, 3  ;;  %v6962_v59 = vld [vmem:[#allocation8 + $0x198] sm:$0xff]   ;;  %v471_v23 = vld [vmem:[#allocation2 + $0x50] sm:$0xf8] }
  0xeb   : > { %2829 = vmatprep.mubr.bf16.mxu1 %v1061_v17  ;;  %v1069_v52 = vor.u32 %v1068_v42, %v1065_v41  ;;  %v561_v54 = vshll.u32 %v470_v39, 16  ;;  %v555_v56 = vrot.slane %v553_v48, 4  ;;  %v560_v57 = vrot.slane %v558_v49, 3  ;;  %6350 = vmatpush3.bf16.msra.mxu1 %v6962_v59  ;;  %v6966_v31 = vld [vmem:[#allocation8 + $0x1e8] sm:$0xff]  }
  0xec   : > { %v1073_v46 = vrot.slane %v1071_v36, 3  ;;  %v1076_v47 = vrot.slane %v1074_v37, 4  ;;  %v850_v51 = vsel %vm782_vm8, %v841_v29, %v849_v40  ;;  %v852_v58 = vshrl.u32 %v770_v44, 16  ;;  %6351 = vmatprep.subr.bf16.mxu1 %v6963_v6  ;;  %v773_v36 = vld [vmem:[#allocation2 + $0x58] sm:$0x1f]  ;;  %v6968_v42 = vld [vmem:[#allocation8 + $0x1a8] sm:$0xff]  }
  0xed   : > { %6278 = vmatpush3.bf16.msra.mxu0 %v6956_v63  ;;  %v563_v60 = vrot.slane %v561_v54, 4  ;;  %v855_v61 = vshll.u32 %v770_v44, 16  ;;  %v860_v62 = vshrl.u32 %v771_v50, 16  ;;  %v863_v63 = vshll.u32 %v771_v50, 16  ;;  %v6967_v37 = vld [vmem:[#allocation8 + $0x138] sm:$0xff]  }
  0xee   : > { %6279 = vmatprep.subr.bf16.mxu0 %v6959_v28  ;;  %v1077_v55 = vor.u32 %v1076_v47, %v1073_v46  ;;  %v556_v2 = vor.u32 %v555_v56, %v552_v53  ;;  %v854_v3 = vrot.slane %v852_v58, 4  ;;  %v727_v13 = vrot.slane %v681_v4, 4  ;;  %v6970_v56 = vld [vmem:[#allocation8 + $0x1b0] sm:$0xff]  }
  0xef   : > { %v564_v7 = vor.u32 %v563_v60, %v560_v57  ;;  %v857_v8 = vrot.slane %v855_v61, 5  ;;  %v862_v9 = vrot.slane %v860_v62, 4  ;;  %v865_v10 = vrot.slane %v863_v63, 5  ;;  %6352 = vmatpush3.bf16.msra.mxu1 %v6964_v12  ;;  %v6971_v60 = vld [vmem:[#allocation8 + $0x1f8] sm:$0xff]   ;;  %v683_v63 = vld [vmem:[#allocation2 + $0x60] sm:$0xf0] }
  0xf0   : > { %2717 = vmatmul.mubr.bf16.gmra.mrb[12].mxu0 %v548_v34  ;;  %v1078_v0 = vsel %vm284_vm4, %v1069_v52, %v1077_v55  ;;  %v728_v14 = vrot.slane %v682_v5, 4  ;;  %v1080_v16 = vshrl.u32 %v984_v11, 16  ;;  %v1083_v17 = vshll.u32 %v984_v11, 16  ;;  %6353 = vmatprep.subr.bf16.mxu1 %v6966_v31  ;;  %v986_v6 = vld [vmem:[#allocation2 + $0x70] sm:$0xf8]  ;;  %v7662_v12 = vld [vmem:[#allocation8 + $0x200] sm:$0xff]  }
  0xf1   : > { %2724 = vmatprep.mubr.bf16.mxu0 %v726_v35  ;;  %6280 = vmatpush3.bf16.msra.mxu0 %v6960_v33  ;;  %v565_v18 = vsel %vm284_vm4, %v556_v2, %v564_v7  ;;  %v858_v19 = vor.u32 %v857_v8, %v854_v3  ;;  %v866_v20 = vor.u32 %v865_v10, %v862_v9  ;;  %v1088_v21 = vshrl.u32 %v985_v15, 16  ;;  %v6972_v2 = vld [vmem:[#allocation8 + $0x1b8] sm:$0xff]  }
  0xf2   : > { %2830 = vmatmul.mubr.bf16.gmra.mrb[12].mxu1 %v850_v51  ;;  %v729_v26 = vsel %vm711_vm7, %v727_v13, %v728_v14  ;;  %v1082_v27 = vrot.slane %v1080_v16, 3  ;;  %v1085_v28 = vrot.slane %v1083_v17, 4  ;;  %v1091_v29 = vshll.u32 %v985_v15, 16  ;;  %6281 = vmatprep.subr.bf16.mxu0 %v6965_v25  ;;  %v6969_v51 = vld [vmem:[#allocation8 + $0x1f0] sm:$0xff]   ;;  %v987_v7 = vld [vmem:[#allocation2 + $0x78] sm:$0xf] }
  0xf3   : > { %2837 = vmatprep.mubr.bf16.mxu1 %v1078_v0  ;;  %v867_v32 = vsel %vm782_vm8, %v858_v19, %v866_v20  ;;  %v1090_v33 = vrot.slane %v1088_v21, 3  ;;  %v567_v34 = vshrl.u32 %v471_v23, 16  ;;  %v570_v35 = vshll.u32 %v471_v23, 16  ;;  %6354 = vmatpush3.bf16.msra.mxu1 %v6968_v42  ;;  %v684_v0 = vld [vmem:[#allocation2 + $0x68] sm:$0xf] }
  0xf4   : > { %v1086_v38 = vor.u32 %v1085_v28, %v1082_v27  ;;  %v1093_v39 = vrot.slane %v1091_v29, 4  ;;  %v575_v40 = vshrl.u32 %v472_v24, 16  ;;  %v578_v41 = vshll.u32 %v472_v24, 16  ;;  %6355 = vmatprep.subr.bf16.mxu1 %v6969_v51  ;;  %v473_v15 = vld [vmem:[#allocation2 + $0x60] sm:$0xf8] }
  0xf5   : > { %v569_v43 = vrot.slane %v567_v34, 3  ;;  %v572_v44 = vrot.slane %v570_v35, 4  ;;  %v869_v45 = vshrl.u32 %v772_v30, 16  ;;  %v872_v46 = vshll.u32 %v772_v30, 16  ;;  %6282 = vmatpush3.bf16.msra.mxu0 %v6967_v37  ;;  %v474_v20 = vld [vmem:[#allocation2 + $0x68] sm:$0xf] }
  0xf6   : > { %v1094_v47 = vor.u32 %v1093_v39, %v1090_v33  ;;  %v577_v48 = vrot.slane %v575_v40, 3  ;;  %v580_v49 = vrot.slane %v578_v41, 4  ;;  %v877_v50 = vshrl.u32 %v773_v36, 16  ;;  %6709 = vmatprep.subr.bf16.mxu0 %v7662_v12  ;;  %v775_v29 = vld [vmem:[#allocation2 + $0x68] sm:$0x1f] }
  0xf7   : > { %v573_v52 = vor.u32 %v572_v44, %v569_v43  ;;  %v871_v53 = vrot.slane %v869_v45, 4  ;;  %v874_v54 = vrot.slane %v872_v46, 5  ;;  %v880_v55 = vshll.u32 %v773_v36, 16  ;;  %6356 = vmatpush3.bf16.msra.mxu1 %v6970_v56  ;;  %v685_v45 = vld [vmem:[#allocation2 + $0x70] sm:$0xf0] }
  0xf8   : > { %2725 = vmatmul.mubr.bf16.gmra.mrb[16].mxu0 %v565_v18  ;;  %v1095_v57 = vsel %vm284_vm4, %v1086_v38, %v1094_v47  ;;  %v581_v58 = vor.u32 %v580_v49, %v577_v48  ;;  %v879_v59 = vrot.slane %v877_v50, 4  ;;  %v730_v4 = vrot.slane %v683_v63, 4  ;;  %6357 = vmatprep.subr.bf16.mxu1 %v6971_v60  ;;  %v686_v46 = vld [vmem:[#allocation2 + $0x78] sm:$0xf]  ;;  %v988_v51 = vld [vmem:[#allocation2 + $0x80] sm:$0xf8] }
  0xf9   : > { %2732 = vmatprep.mubr.bf16.mxu0 %v729_v26  ;;  %v875_v61 = vor.u32 %v874_v54, %v871_v53  ;;  %v882_v62 = vrot.slane %v880_v55, 5  ;;  %v731_v5 = vrot.slane %v684_v0, 4  ;;  %v1097_v9 = vshrl.u32 %v986_v6, 16  ;;  %v774_v26 = vld [vmem:[#allocation2 + $0x60] sm:$0xf0] }
  0xfa   : > { %2838 = vmatmul.mubr.bf16.gmra.mrb[16].mxu1 %v867_v32  ;;  %v582_v3 = vsel %vm284_vm4, %v573_v52, %v581_v58  ;;  %v1100_v10 = vshll.u32 %v986_v6, 16  ;;  %v1105_v11 = vshrl.u32 %v987_v7, 16  ;;  %v1108_v14 = vshll.u32 %v987_v7, 16  ;;  %v989_v53 = vld [vmem:[#allocation2 + $0x88] sm:$0xf] }
  0xfb   : > { %2845 = vmatprep.mubr.bf16.mxu1 %v1095_v57  ;;  %v883_v8 = vor.u32 %v882_v62, %v879_v59  ;;  %v732_v13 = vsel %vm711_vm7, %v730_v4, %v731_v5  ;;  %v1099_v17 = vrot.slane %v1097_v9, 3  ;;  %v584_v23 = vshrl.u32 %v473_v15, 16  ;;  %6358 = vmatpush3.bf16.msra.mxu1 %v6972_v2  ;;  %v475_v56 = vld [vmem:[#allocation2 + $0x70] sm:$0xf8]  ;;  %v777_v4 = vld [vmem:[#allocation2 + $0x78] sm:$0x1f] }
  0xfc   : > { %v1102_v18 = vrot.slane %v1100_v10, 4  ;;  %v1107_v19 = vrot.slane %v1105_v11, 3  ;;  %v1110_v21 = vrot.slane %v1108_v14, 4  ;;  %v587_v24 = vshll.u32 %v473_v15, 16  ;;  %v776_v62 = vld [vmem:[#allocation2 + $0x70] sm:$0xf0] }
  0xfd   : > { %v884_v16 = vsel %vm782_vm8, %v875_v61, %v883_v8  ;;  %v592_v25 = vshrl.u32 %v474_v20, 16  ;;  %v595_v28 = vshll.u32 %v474_v20, 16  ;;  %v886_v30 = vshrl.u32 %v774_v26, 16  ;;  %v476_v61 = vld [vmem:[#allocation2 + $0x78] sm:$0xf] }
  0xfe   : > { %v1103_v27 = vor.u32 %v1102_v18, %v1099_v17  ;;  %v889_v31 = vshll.u32 %v774_v26, 16  ;;  %v1111_v32 = vor.u32 %v1110_v21, %v1107_v19  ;;  %v586_v33 = vrot.slane %v584_v23, 3 }
  0xff   : > { %v589_v34 = vrot.slane %v587_v24, 4  ;;  %v594_v35 = vrot.slane %v592_v25, 3  ;;  %v597_v36 = vrot.slane %v595_v28, 4  ;;  %v888_v37 = vrot.slane %v886_v30, 4  ;;  %v687_v30 = vld [vmem:[#allocation2 + $0x80] sm:$0xf0] }
 0x100   : > { %2733 = vmatmul.mubr.bf16.gmra.mrb[20].mxu0 %v582_v3  ;;  %v891_v38 = vrot.slane %v889_v31, 5  ;;  %v894_v39 = vshrl.u32 %v775_v29, 16  ;;  %v1112_v40 = vsel %vm284_vm4, %v1103_v27, %v1111_v32  ;;  %v897_v42 = vshll.u32 %v775_v29, 16 }
 0x101   : > { %2740 = vmatprep.mubr.bf16.mxu0 %v732_v13  ;;  %v590_v41 = vor.u32 %v589_v34, %v586_v33  ;;  %v598_v43 = vor.u32 %v597_v36, %v594_v35  ;;  %v733_v49 = vrot.slane %v685_v45, 4  ;;  %v734_v50 = vrot.slane %v686_v46, 4  ;;  %v688_v33 = vld [vmem:[#allocation2 + $0x88] sm:$0xf]  ;;  %v990_v35 = vld [vmem:[#allocation2 + $0x90] sm:$0xf8] }
 0x102   : > { %2846 = vmatmul.mubr.bf16.gmra.mrb[20].mxu1 %v884_v16  ;;  %v896_v44 = vrot.slane %v894_v39, 4  ;;  %v892_v47 = vor.u32 %v891_v38, %v888_v37  ;;  %v899_v48 = vrot.slane %v897_v42, 5  ;;  %v1114_v54 = vshrl.u32 %v988_v51, 16  ;;  %v991_v37 = vld [vmem:[#allocation2 + $0x98] sm:$0xf] }
 0x103   : > { %2853 = vmatprep.mubr.bf16.mxu1 %v1112_v40  ;;  %v599_v52 = vsel %vm284_vm4, %v590_v41, %v598_v43  ;;  %v1117_v55 = vshll.u32 %v988_v51, 16  ;;  %v735_v58 = vsel %vm711_vm7, %v733_v49, %v734_v50  ;;  %v1122_v59 = vshrl.u32 %v989_v53, 16  ;;  %v477_v46 = vld [vmem:[#allocation2 + $0x80] sm:$0xf8] }
 0x104   : > { %v900_v57 = vor.u32 %v899_v48, %v896_v44  ;;  %v1125_v60 = vshll.u32 %v989_v53, 16  ;;  %v1116_v63 = vrot.slane %v1114_v54, 3  ;;  %v601_v2 = vshrl.u32 %v475_v56, 16 }
 0x105   : > { %v1119_v0 = vrot.slane %v1117_v55, 4  ;;  %v604_v3 = vshll.u32 %v475_v56, 16  ;;  %v1124_v6 = vrot.slane %v1122_v59, 3  ;;  %v609_v8 = vshrl.u32 %v476_v61, 16  ;;  %v779_v56 = vld [vmem:[#allocation2 + $0x88] sm:$0x1f] }
 0x106   : > { %v901_v5 = vsel %vm782_vm8, %v892_v47, %v900_v57  ;;  %v1127_v7 = vrot.slane %v1125_v60, 4  ;;  %v603_v10 = vrot.slane %v601_v2, 3  ;;  %v612_v13 = vshll.u32 %v476_v61, 16  ;;  %v478_v47 = vld [vmem:[#allocation2 + $0x88] sm:$0xf] }
 0x107   : > { %v1120_v9 = vor.u32 %v1119_v0, %v1116_v63  ;;  %v606_v11 = vrot.slane %v604_v3, 4  ;;  %v611_v15 = vrot.slane %v609_v8, 3  ;;  %v903_v16 = vshrl.u32 %v776_v62, 16 }
 0x108   : > { %2741 = vmatmul.mubr.bf16.gmra.mrb[24].mxu0 %v599_v52  ;;  %v1128_v14 = vor.u32 %v1127_v7, %v1124_v6  ;;  %v906_v17 = vshll.u32 %v776_v62, 16  ;;  %v614_v19 = vrot.slane %v612_v13, 4  ;;  %v911_v20 = vshrl.u32 %v777_v4, 16  ;;  %v778_v52 = vld [vmem:[#allocation2 + $0x80] sm:$0xf0] }
 0x109   : > { %2748 = vmatprep.mubr.bf16.mxu0 %v735_v58  ;;  %v607_v18 = vor.u32 %v606_v11, %v603_v10  ;;  %v914_v21 = vshll.u32 %v777_v4, 16  ;;  %v905_v24 = vrot.slane %v903_v16, 4  ;;  %v736_v34 = vrot.slane %v687_v30, 4  ;;  %v689_v13 = vld [vmem:[#allocation2 + $0x90] sm:$0xf0] }
 0x10a   : > { %2854 = vmatmul.mubr.bf16.gmra.mrb[24].mxu1 %v901_v5  ;;  %v1129_v23 = vsel %vm284_vm4, %v1120_v9, %v1128_v14  ;;  %v908_v25 = vrot.slane %v906_v17, 5  ;;  %v615_v26 = vor.u32 %v614_v19, %v611_v15  ;;  %v913_v27 = vrot.slane %v911_v20, 4  ;;  %v690_v14 = vld [vmem:[#allocation2 + $0x98] sm:$0xf]  ;;  %v992_v15 = vld [vmem:[#allocation2 + $0xa0] sm:$0xf8] }
 0x10b   : > { %2861 = vmatprep.mubr.bf16.mxu1 %v1129_v23  ;;  %v916_v28 = vrot.slane %v914_v21, 5  ;;  %v737_v36 = vrot.slane %v688_v33, 4  ;;  %v1131_v38 = vshrl.u32 %v990_v35, 16  ;;  %v1134_v39 = vshll.u32 %v990_v35, 16  ;;  %v993_v19 = vld [vmem:[#allocation2 + $0xa8] sm:$0xf] }
 0x10c   : > { %v909_v29 = vor.u32 %v908_v25, %v905_v24  ;;  %v616_v31 = vsel %vm284_vm4, %v607_v18, %v615_v26  ;;  %v1139_v41 = vshrl.u32 %v991_v37, 16  ;;  %v1142_v42 = vshll.u32 %v991_v37, 16  ;;  %v780_v33 = vld [vmem:[#allocation2 + $0x90] sm:$0xf0] }
 0x10d   : > { %v917_v32 = vor.u32 %v916_v28, %v913_v27  ;;  %v738_v43 = vsel %vm711_vm7, %v736_v34, %v737_v36  ;;  %v1133_v44 = vrot.slane %v1131_v38, 3  ;;  %v1136_v45 = vrot.slane %v1134_v39, 4  ;;  %v781_v38 = vld [vmem:[#allocation2 + $0x98] sm:$0x1f] }
 0x10e   : > { %v1141_v48 = vrot.slane %v1139_v41, 3  ;;  %v1144_v49 = vrot.slane %v1142_v42, 4  ;;  %v618_v50 = vshrl.u32 %v477_v46, 16  ;;  %v621_v51 = vshll.u32 %v477_v46, 16 }
 0x10f   : > { %v918_v40 = vsel %vm782_vm8, %v909_v29, %v917_v32  ;;  %v1137_v53 = vor.u32 %v1136_v45, %v1133_v44  ;;  %v626_v54 = vshrl.u32 %v478_v47, 16  ;;  %v629_v55 = vshll.u32 %v478_v47, 16  ;;  %v480_v32 = vld [vmem:[#allocation2 + $0x98] sm:$0xf] }
 0x110   : > { %2749 = vmatmul.mubr.bf16.gmra.mrb[28].mxu0 %v616_v31  ;;  %v920_v57 = vshrl.u32 %v778_v52, 16  ;;  %v1145_v58 = vor.u32 %v1144_v49, %v1141_v48  ;;  %v620_v59 = vrot.slane %v618_v50, 3  ;;  %v623_v60 = vrot.slane %v621_v51, 4  ;;  %v479_v31 = vld [vmem:[#allocation2 + $0x90] sm:$0xf8] }
 0x111   : > { %2756 = vmatprep.mubr.bf16.mxu0 %v738_v43  ;;  %v923_v61 = vshll.u32 %v778_v52, 16  ;;  %v628_v62 = vrot.slane %v626_v54, 3  ;;  %v631_v63 = vrot.slane %v629_v55, 4  ;;  %v928_v2 = vshrl.u32 %v779_v56, 16 }
 0x112   : > { %2862 = vmatmul.mubr.bf16.gmra.mrb[28].mxu1 %v918_v40  ;;  %v922_v0 = vrot.slane %v920_v57, 4  ;;  %v1146_v3 = vsel %vm284_vm4, %v1137_v53, %v1145_v58  ;;  %v624_v4 = vor.u32 %v623_v60, %v620_v59  ;;  %v931_v6 = vshll.u32 %v779_v56, 16  ;;  %v1274_v56 = vld [vmem:[#allocation2 + $0x10] sm:$0xf0]  ;;  %v1275_v57 = vld [vmem:[#allocation2 + $0x18] sm:$0x1f] }
 0x113   : > { %v925_v5 = vrot.slane %v923_v61, 5  ;;  %2869 = vmatprep.mubr.bf16.mxu1 %v1146_v3  ;;  %v632_v7 = vor.u32 %v631_v63, %v628_v62  ;;  %v930_v8 = vrot.slane %v928_v2, 4  ;;  %v739_v17 = vrot.slane %v689_v13, 4  ;;  %v1185_v2 = vld [vmem:[#allocation2 + $0x18] sm:$0xf] }
 0x114   : > { %v933_v10 = vrot.slane %v931_v6, 5  ;;  %v740_v18 = vrot.slane %v690_v14, 4  ;;  %v1148_v20 = vshrl.u32 %v992_v15, 16  ;;  %v1151_v21 = vshll.u32 %v992_v15, 16  ;;  %v1694_v13 = vld [vmem:[#allocation2 + $0x20] sm:$0xf0] }
 0x115   : > { %v926_v9 = vor.u32 %v925_v5, %v922_v0  ;;  %v633_v11 = vsel %vm284_vm4, %v624_v4, %v632_v7  ;;  %v1156_v23 = vshrl.u32 %v993_v19, 16  ;;  %v1159_v24 = vshll.u32 %v993_v19, 16  ;;  %v1184_v0 = vld [vmem:[#allocation2 + $0x10] sm:$0xf0]  ;;  %v1695_v14 = vld [vmem:[#allocation2 + $0x28] sm:$0xf] }
 0x116   : > { %v934_v16 = vor.u32 %v933_v10, %v930_v8  ;;  %v741_v26 = vsel %vm711_vm7, %v739_v17, %v740_v18  ;;  %v1150_v27 = vrot.slane %v1148_v20, 3  ;;  %v1153_v28 = vrot.slane %v1151_v21, 4  ;;  %v1484_v15 = vld [vmem:[#allocation2 + $0x20] sm:$0xf8]  ;;  %v1485_v20 = vld [vmem:[#allocation2 + $0x28] sm:$0xf] }
 0x117   : > { %v1158_v29 = vrot.slane %v1156_v23, 3  ;;  %v1161_v30 = vrot.slane %v1159_v24, 4  ;;  %v635_v36 = vshrl.u32 %v479_v31, 16  ;;  %v638_v37 = vshll.u32 %v479_v31, 16  ;;  %v1276_v21 = vld [vmem:[#allocation2 + $0x20] sm:$0xf0] }
 0x118   : > { %2757 = vmatmul.mubr.bf16.gmra.mrb[32].mxu0 %v633_v11  ;;  %v935_v25 = vsel %vm782_vm8, %v926_v9, %v934_v16  ;;  %v1154_v34 = vor.u32 %v1153_v28, %v1150_v27  ;;  %v643_v39 = vshrl.u32 %v480_v32, 16  ;;  %v646_v40 = vshll.u32 %v480_v32, 16  ;;  %v1277_v27 = vld [vmem:[#allocation2 + $0x28] sm:$0x1f] }
 0x119   : > { %2764 = vmatprep.mubr.bf16.mxu0 %v741_v26  ;;  %v1162_v35 = vor.u32 %v1161_v30, %v1158_v29  ;;  %v937_v41 = vshrl.u32 %v780_v33, 16  ;;  %v940_v42 = vshll.u32 %v780_v33, 16  ;;  %v637_v44 = vrot.slane %v635_v36, 3  ;;  %v6974_v28 = vld [vmem:[#allocation8 + $0x208] sm:$0xff]   ;;  %v1186_v33 = vld [vmem:[#allocation2 + $0x20] sm:$0xf0] }
 0x11a   : > { %2870 = vmatmul.mubr.bf16.gmra.mrb[32].mxu1 %v935_v25  ;;  %v640_v45 = vrot.slane %v638_v37, 4  ;;  %v945_v46 = vshrl.u32 %v781_v38, 16  ;;  %v645_v47 = vrot.slane %v643_v39, 3  ;;  %v648_v48 = vrot.slane %v646_v40, 4  ;;  %v1696_v39 = vld [vmem:[#allocation2 + $0x30] sm:$0xf0] }
 0x11b   : > { %v1163_v43 = vsel %vm284_vm4, %v1154_v34, %v1162_v35  ;;  %v939_v49 = vrot.slane %v937_v41, 4  ;;  %v942_v50 = vrot.slane %v940_v42, 5  ;;  %v948_v53 = vshll.u32 %v781_v38, 16  ;;  %v1187_v34 = vld [vmem:[#allocation2 + $0x28] sm:$0xf] }
 0x11c   : > { %2877 = vmatprep.mubr.bf16.mxu1 %v1163_v43  ;;  %v641_v51 = vor.u32 %v640_v45, %v637_v44  ;;  %v947_v52 = vrot.slane %v945_v46, 4  ;;  %v649_v54 = vor.u32 %v648_v48, %v645_v47  ;;  %v1295_v59 = vshrl.u32 %v1274_v56, 16  ;;  %v1697_v44 = vld [vmem:[#allocation2 + $0x38] sm:$0xf] }
 0x11d   : > { %v943_v55 = vor.u32 %v942_v50, %v939_v49  ;;  %v950_v58 = vrot.slane %v948_v53, 5  ;;  %v1298_v60 = vshll.u32 %v1274_v56, 16  ;;  %v1303_v61 = vshrl.u32 %v1275_v57, 16  ;;  %v1486_v49 = vld [vmem:[#allocation2 + $0x30] sm:$0xf8] }
 0x11e   : > { %v650_v62 = vsel %vm284_vm4, %v641_v51, %v649_v54  ;;  %v1306_v63 = vshll.u32 %v1275_v57, 16  ;;  %v1297_v4 = vrot.slane %v1295_v59, 4  ;;  %v1224_v8 = vrot.slane %v1184_v0, 4  ;;  %v1487_v50 = vld [vmem:[#allocation2 + $0x38] sm:$0xf] }
 0x11f   : > { %v951_v3 = vor.u32 %v950_v58, %v947_v52  ;;  %v1300_v5 = vrot.slane %v1298_v60, 5  ;;  %v1305_v6 = vrot.slane %v1303_v61, 4  ;;  %v1225_v9 = vrot.slane %v1185_v2, 4  ;;  %v1278_v60 = vld [vmem:[#allocation2 + $0x30] sm:$0xf0] }
 0x120   : > { %2765 = vmatmul.mubr.bf16.gmra.mrb[36].mxu0 %v650_v62  ;;  %v1308_v7 = vrot.slane %v1306_v63, 5  ;;  %v1734_v18 = vrot.slane %v1694_v13, 4  ;;  %v1735_v19 = vrot.slane %v1695_v14, 4  ;;  %v1505_v23 = vshrl.u32 %v1484_v15, 16  ;;  %v1279_v2 = vld [vmem:[#allocation2 + $0x38] sm:$0x1f] }
 0x121   : > { %v952_v10 = vsel %vm782_vm8, %v943_v55, %v951_v3  ;;  %v1301_v11 = vor.u32 %v1300_v5, %v1297_v4  ;;  %v1226_v17 = vsel %vm711_vm7, %v1224_v8, %v1225_v9  ;;  %v1508_v24 = vshll.u32 %v1484_v15, 16  ;;  %v6975_v55 = vld [vmem:[#allocation8 + $0x210] sm:$0xff]   ;;  %v6976_v13 = vld [vmem:[#allocation8 + $0x218] sm:$0xff]  }
 0x122   : > { %2878 = vmatmul.mubr.bf16.gmra.mrb[36].mxu1 %v952_v10  ;;  %v1309_v16 = vor.u32 %v1308_v7, %v1305_v6  ;;  %v1513_v25 = vshrl.u32 %v1485_v20, 16  ;;  %v1516_v26 = vshll.u32 %v1485_v20, 16  ;;  %v1736_v30 = vsel %vm711_vm7, %v1734_v18, %v1735_v19  ;;  %v1188_v6 = vld [vmem:[#allocation2 + $0x30] sm:$0xf0]  ;;  %v1698_v18 = vld [vmem:[#allocation2 + $0x40] sm:$0xf0] }
 0x123   : > { %v1312_v31 = vshrl.u32 %v1276_v21, 16  ;;  %v1315_v32 = vshll.u32 %v1276_v21, 16  ;;  %3031 = vmatprep.mubr.bf16.mxu1 %v1736_v30  ;;  %v1507_v35 = vrot.slane %v1505_v23, 3  ;;  %v1510_v36 = vrot.slane %v1508_v24, 4  ;;  %v1699_v24 = vld [vmem:[#allocation2 + $0x48] sm:$0xf] }
 0x124   : > { %v1310_v29 = vsel %vm782_vm8, %v1301_v11, %v1309_v16  ;;  %v1515_v37 = vrot.slane %v1513_v25, 3  ;;  %v1518_v38 = vrot.slane %v1516_v26, 4  ;;  %v1320_v42 = vshrl.u32 %v1277_v27, 16  ;;  %v1189_v11 = vld [vmem:[#allocation2 + $0x38] sm:$0xf] }
 0x125   : > { %2918 = vmatprep.mubr.bf16.mxu0 %v1310_v29  ;;  %v1314_v40 = vrot.slane %v1312_v31, 4  ;;  %v1317_v41 = vrot.slane %v1315_v32, 5  ;;  %v1323_v43 = vshll.u32 %v1277_v27, 16  ;;  %v1511_v45 = vor.u32 %v1510_v36, %v1507_v35  ;;  %v1488_v25 = vld [vmem:[#allocation2 + $0x40] sm:$0xf8] }
 0x126   : > { %v1519_v46 = vor.u32 %v1518_v38, %v1515_v37  ;;  %v1227_v47 = vrot.slane %v1186_v33, 4  ;;  %v1228_v48 = vrot.slane %v1187_v34, 4  ;;  %v1322_v52 = vrot.slane %v1320_v42, 4  ;;  %v1489_v30 = vld [vmem:[#allocation2 + $0x48] sm:$0xf] }
 0x127   : > { %v1318_v51 = vor.u32 %v1317_v41, %v1314_v40  ;;  %v1325_v53 = vrot.slane %v1323_v43, 5  ;;  %v1737_v54 = vrot.slane %v1696_v39, 4  ;;  %v1738_v58 = vrot.slane %v1697_v44, 4  ;;  %v1280_v39 = vld [vmem:[#allocation2 + $0x40] sm:$0xf0] }
 0x128   : > { %2919 = vmatmul.mubr.bf16.vlgmr.msra.gmra.mrb[40].mxu0 %v1226_v17  ;;  %v1520_v56 = vsel %vm284_vm4, %v1511_v45, %v1519_v46  ;;  %v1229_v57 = vsel %vm711_vm7, %v1227_v47, %v1228_v48  ;;  %v1522_v59 = vshrl.u32 %v1486_v49, 16  ;;  %v1525_v62 = vshll.u32 %v1486_v49, 16  ;;  %v6977_v40 = vld [vmem:[#allocation8 + $0x220] sm:$0xff]   ;;  %v1281_v43 = vld [vmem:[#allocation2 + $0x48] sm:$0x1f] }
 0x129   : > { %6710 = vmatpush3.bf16.msra.mxu0 %v7662_v12  ;;  %v1326_v61 = vor.u32 %v1325_v53, %v1322_v52  ;;  %v1530_v63 = vshrl.u32 %v1487_v50, 16  ;;  %v1533_v0 = vshll.u32 %v1487_v50, 16  ;;  %v1739_v12 = vsel %vm711_vm7, %v1737_v54, %v1738_v58  ;;  %v1190_v50 = vld [vmem:[#allocation2 + $0x40] sm:$0xf0] }
 0x12a   : > { %6711 = vmatprep.subr.bf16.mxu0 %v6974_v28  ;;  %3032 = vmatmul.mubr.bf16.vlgmr.msra.gmra.mrb[40].mxu1 %v1520_v56  ;;  %v1524_v3 = vrot.slane %v1522_v59, 3  ;;  %v1329_v4 = vshrl.u32 %v1278_v60, 16  ;;  %v1332_v5 = vshll.u32 %v1278_v60, 16  ;;  %v1527_v8 = vrot.slane %v1525_v62, 4  ;;  %v1191_v56 = vld [vmem:[#allocation2 + $0x48] sm:$0xf] }
 0x12b   : > { %v1327_v7 = vsel %vm782_vm8, %v1318_v51, %v1326_v61  ;;  %3039 = vmatprep.mubr.bf16.mxu1 %v1739_v12  ;;  %v1532_v9 = vrot.slane %v1530_v63, 3  ;;  %v1535_v10 = vrot.slane %v1533_v0, 4  ;;  %v1337_v16 = vshrl.u32 %v1279_v2, 16  ;;  %v6978_v51 = vld [vmem:[#allocation8 + $0x228] sm:$0xff]   ;;  %v1700_v61 = vld [vmem:[#allocation2 + $0x50] sm:$0xf0] }
 0x12c   : > { %2926 = vmatprep.mubr.bf16.mxu0 %v1327_v7  ;;  %v1331_v14 = vrot.slane %v1329_v4, 4  ;;  %v1334_v15 = vrot.slane %v1332_v5, 5  ;;  %v1340_v17 = vshll.u32 %v1279_v2, 16  ;;  %v1528_v19 = vor.u32 %v1527_v8, %v1524_v3  ;;  %v1701_v62 = vld [vmem:[#allocation2 + $0x58] sm:$0xf] }
 0x12d   : > { %6712 = vmatpush3.bf16.msra.mxu0 %v6974_v28  ;;  %v1536_v20 = vor.u32 %v1535_v10, %v1532_v9  ;;  %v1230_v21 = vrot.slane %v1188_v6, 4  ;;  %v1231_v23 = vrot.slane %v1189_v11, 4  ;;  %v1339_v27 = vrot.slane %v1337_v16, 4  ;;  %v1490_v3 = vld [vmem:[#allocation2 + $0x50] sm:$0xf8] }
 0x12e   : > { %6713 = vmatprep.subr.bf16.mxu0 %v6975_v55  ;;  %v1335_v26 = vor.u32 %v1334_v15, %v1331_v14  ;;  %v1342_v29 = vrot.slane %v1340_v17, 5  ;;  %v1740_v28 = vrot.slane %v1698_v18, 4  ;;  %v1741_v33 = vrot.slane %v1699_v24, 4  ;;  %v1491_v7 = vld [vmem:[#allocation2 + $0x58] sm:$0xf]  ;;  %v6979_v18 = vld [vmem:[#allocation8 + $0x230] sm:$0xff]  }
 0x12f   : > { %v1537_v31 = vsel %vm284_vm4, %v1528_v19, %v1536_v20  ;;  %v1232_v32 = vsel %vm711_vm7, %v1230_v21, %v1231_v23  ;;  %v1539_v34 = vshrl.u32 %v1488_v25, 16  ;;  %v1542_v36 = vshll.u32 %v1488_v25, 16  ;;  %v1282_v16 = vld [vmem:[#allocation2 + $0x50] sm:$0xf0]  ;;  %v1283_v17 = vld [vmem:[#allocation2 + $0x58] sm:$0x1f] }
 0x130   : > { %2927 = vmatmul.mubr.bf16.gmra.mrb[44].mxu0 %v1229_v57  ;;  %v1343_v35 = vor.u32 %v1342_v29, %v1339_v27  ;;  %v1547_v37 = vshrl.u32 %v1489_v30, 16  ;;  %v1550_v38 = vshll.u32 %v1489_v30, 16  ;;  %v1742_v41 = vsel %vm711_vm7, %v1740_v28, %v1741_v33  ;;  %v1192_v24 = vld [vmem:[#allocation2 + $0x50] sm:$0xf0]  ;;  %v1193_v28 = vld [vmem:[#allocation2 + $0x58] sm:$0xf] }
 0x131   : > { %6714 = vmatpush3.bf16.msra.mxu0 %v6975_v55  ;;  %v1541_v42 = vrot.slane %v1539_v34, 3  ;;  %v1346_v44 = vshrl.u32 %v1280_v39, 16  ;;  %v1349_v45 = vshll.u32 %v1280_v39, 16  ;;  %v1544_v47 = vrot.slane %v1542_v36, 4  ;;  %v6980_v30 = vld [vmem:[#allocation8 + $0x238] sm:$0xff]  }
 0x132   : > { %6715 = vmatprep.subr.bf16.mxu0 %v6976_v13  ;;  %3040 = vmatmul.mubr.bf16.gmra.mrb[44].mxu1 %v1537_v31  ;;  %v1344_v46 = vsel %vm782_vm8, %v1335_v26, %v1343_v35  ;;  %v1549_v48 = vrot.slane %v1547_v37, 3  ;;  %v1552_v49 = vrot.slane %v1550_v38, 4  ;;  %v1354_v54 = vshrl.u32 %v1281_v43, 16  ;;  %v1702_v35 = vld [vmem:[#allocation2 + $0x60] sm:$0xf0] }
 0x133   : > { %3047 = vmatprep.mubr.bf16.mxu1 %v1742_v41  ;;  %2934 = vmatprep.mubr.bf16.mxu0 %v1344_v46  ;;  %v1348_v52 = vrot.slane %v1346_v44, 4  ;;  %v1351_v53 = vrot.slane %v1349_v45, 5  ;;  %v1357_v55 = vshll.u32 %v1281_v43, 16  ;;  %v1545_v57 = vor.u32 %v1544_v47, %v1541_v42  ;;  %v1703_v36 = vld [vmem:[#allocation2 + $0x68] sm:$0xf] }
 0x134   : > { %v1553_v58 = vor.u32 %v1552_v49, %v1549_v48  ;;  %v1233_v59 = vrot.slane %v1190_v50, 4  ;;  %v1234_v60 = vrot.slane %v1191_v56, 4  ;;  %v1356_v0 = vrot.slane %v1354_v54, 4  ;;  %v1492_v41 = vld [vmem:[#allocation2 + $0x60] sm:$0xf8] }
 0x135   : > { %6716 = vmatpush3.bf16.msra.mxu0 %v6976_v13  ;;  %v1352_v63 = vor.u32 %v1351_v53, %v1348_v52  ;;  %v1359_v2 = vrot.slane %v1357_v55, 5  ;;  %v1743_v12 = vrot.slane %v1700_v61, 4  ;;  %v1744_v6 = vrot.slane %v1701_v62, 4  ;;  %v1493_v46 = vld [vmem:[#allocation2 + $0x68] sm:$0xf] }
 0x136   : > { %6717 = vmatprep.subr.bf16.mxu0 %v6977_v40  ;;  %v1554_v4 = vsel %vm284_vm4, %v1545_v57, %v1553_v58  ;;  %v1235_v5 = vsel %vm711_vm7, %v1233_v59, %v1234_v60  ;;  %v1556_v8 = vshrl.u32 %v1490_v3, 16  ;;  %v1559_v10 = vshll.u32 %v1490_v3, 16  ;;  %v1284_v47 = vld [vmem:[#allocation2 + $0x60] sm:$0xf0]  ;;  %v1195_v58 = vld [vmem:[#allocation2 + $0x68] sm:$0xf] }
 0x137   : > { %v1360_v9 = vor.u32 %v1359_v2, %v1356_v0  ;;  %v1564_v11 = vshrl.u32 %v1491_v7, 16  ;;  %v1567_v13 = vshll.u32 %v1491_v7, 16  ;;  %v1745_v14 = vsel %vm711_vm7, %v1743_v12, %v1744_v6  ;;  %v1194_v53 = vld [vmem:[#allocation2 + $0x60] sm:$0xf0]  ;;  %v1704_v7 = vld [vmem:[#allocation2 + $0x70] sm:$0xf0] }
 0x138   : > { %2935 = vmatmul.mubr.bf16.gmra.mrb[48].mxu0 %v1232_v32  ;;  %v1558_v15 = vrot.slane %v1556_v8, 3  ;;  %v1561_v20 = vrot.slane %v1559_v10, 4  ;;  %v1363_v25 = vshrl.u32 %v1282_v16, 16  ;;  %v1366_v26 = vshll.u32 %v1282_v16, 16 }
 0x139   : > { %6718 = vmatpush3.bf16.msra.mxu0 %v6977_v40  ;;  %v1361_v19 = vsel %vm782_vm8, %v1352_v63, %v1360_v9  ;;  %v1566_v21 = vrot.slane %v1564_v11, 3  ;;  %v1569_v23 = vrot.slane %v1567_v13, 4  ;;  %v1371_v27 = vshrl.u32 %v1283_v17, 16  ;;  %v1705_v11 = vld [vmem:[#allocation2 + $0x78] sm:$0xf] }
 0x13a   : > { %6719 = vmatprep.subr.bf16.mxu0 %v6978_v51  ;;  %3048 = vmatmul.mubr.bf16.gmra.mrb[48].mxu1 %v1554_v4  ;;  %v1374_v29 = vshll.u32 %v1283_v17, 16  ;;  %v1562_v31 = vor.u32 %v1561_v20, %v1558_v15  ;;  %v1236_v33 = vrot.slane %v1192_v24, 4  ;;  %v1237_v34 = vrot.slane %v1193_v28, 4  ;;  %v1494_v17 = vld [vmem:[#allocation2 + $0x70] sm:$0xf8] }
 0x13b   : > { %2942 = vmatprep.mubr.bf16.mxu0 %v1361_v19  ;;  %3055 = vmatprep.mubr.bf16.mxu1 %v1745_v14  ;;  %v1570_v32 = vor.u32 %v1569_v23, %v1566_v21  ;;  %v1365_v37 = vrot.slane %v1363_v25, 4  ;;  %v1368_v38 = vrot.slane %v1366_v26, 5  ;;  %v1373_v39 = vrot.slane %v1371_v27, 4  ;;  %v1286_v24 = vld [vmem:[#allocation2 + $0x70] sm:$0xf0] }
 0x13c   : > { %v1376_v40 = vrot.slane %v1374_v29, 5  ;;  %v1238_v43 = vsel %vm711_vm7, %v1236_v33, %v1237_v34  ;;  %v1746_v44 = vrot.slane %v1702_v35, 4  ;;  %v1747_v45 = vrot.slane %v1703_v36, 4  ;;  %v1287_v25 = vld [vmem:[#allocation2 + $0x78] sm:$0x1f] }
 0x13d   : > { %6720 = vmatpush3.bf16.msra.mxu0 %v6978_v51  ;;  %v1571_v42 = vsel %vm284_vm4, %v1562_v31, %v1570_v32  ;;  %v1369_v48 = vor.u32 %v1368_v38, %v1365_v37  ;;  %v1573_v50 = vshrl.u32 %v1492_v41, 16  ;;  %v1576_v52 = vshll.u32 %v1492_v41, 16  ;;  %v1285_v51 = vld [vmem:[#allocation2 + $0x68] sm:$0x1f]  ;;  %v1197_v31 = vld [vmem:[#allocation2 + $0x78] sm:$0xf] }
 0x13e   : > { %6721 = vmatprep.subr.bf16.mxu0 %v6979_v18  ;;  %v1377_v49 = vor.u32 %v1376_v40, %v1373_v39  ;;  %v1748_v54 = vsel %vm711_vm7, %v1746_v44, %v1747_v45  ;;  %v1581_v55 = vshrl.u32 %v1493_v46, 16  ;;  %v1584_v56 = vshll.u32 %v1493_v46, 16  ;;  %v1706_v36 = vld [vmem:[#allocation2 + $0x80] sm:$0xf0]  ;;  %v1707_v41 = vld [vmem:[#allocation2 + $0x88] sm:$0xf] }
 0x13f   : > { %v1380_v57 = vshrl.u32 %v1284_v47, 16  ;;  %v1575_v60 = vrot.slane %v1573_v50, 3  ;;  %v1578_v61 = vrot.slane %v1576_v52, 4  ;;  %v1383_v62 = vshll.u32 %v1284_v47, 16  ;;  %v1496_v46 = vld [vmem:[#allocation2 + $0x80] sm:$0xf8] }
 0x140   : > { %2943 = vmatmul.mubr.bf16.gmra.mrb[52].mxu0 %v1235_v5  ;;  %v1378_v59 = vsel %vm782_vm8, %v1369_v48, %v1377_v49  ;;  %v1583_v63 = vrot.slane %v1581_v55, 3  ;;  %v1586_v0 = vrot.slane %v1584_v56, 4  ;;  %v1388_v12 = vshrl.u32 %v1285_v51, 16  ;;  %v1497_v52 = vld [vmem:[#allocation2 + $0x88] sm:$0xf] }
 0x141   : > { %6722 = vmatpush3.bf16.msra.mxu0 %v6979_v18  ;;  %2950 = vmatprep.mubr.bf16.mxu0 %v1378_v59  ;;  %v1382_v2 = vrot.slane %v1380_v57, 4  ;;  %v1579_v3 = vor.u32 %v1578_v61, %v1575_v60  ;;  %v1385_v4 = vrot.slane %v1383_v62, 5  ;;  %v1391_v5 = vshll.u32 %v1285_v51, 16  ;;  %v1495_v18 = vld [vmem:[#allocation2 + $0x78] sm:$0xf] }
 0x142   : > { %6723 = vmatprep.subr.bf16.mxu0 %v6980_v30  ;;  %3056 = vmatmul.mubr.bf16.gmra.mrb[52].mxu1 %v1571_v42  ;;  %v1239_v6 = vrot.slane %v1194_v53, 4  ;;  %v1587_v8 = vor.u32 %v1586_v0, %v1583_v63  ;;  %v1390_v9 = vrot.slane %v1388_v12, 4  ;;  %v1240_v10 = vrot.slane %v1195_v58, 4  ;;  %v1288_v60 = vld [vmem:[#allocation2 + $0x80] sm:$0xf0] }
 0x143   : > { %3063 = vmatprep.mubr.bf16.mxu1 %v1748_v54  ;;  %v1749_v13 = vrot.slane %v1704_v7, 4  ;;  %v1386_v14 = vor.u32 %v1385_v4, %v1382_v2  ;;  %v1393_v15 = vrot.slane %v1391_v5, 5  ;;  %v1750_v16 = vrot.slane %v1705_v11, 4  ;;  %v1289_v2 = vld [vmem:[#allocation2 + $0x88] sm:$0x1f] }
 0x144   : > { %v1588_v19 = vsel %vm284_vm4, %v1579_v3, %v1587_v8  ;;  %v1241_v20 = vsel %vm711_vm7, %v1239_v6, %v1240_v10  ;;  %v1590_v21 = vshrl.u32 %v1494_v17, 16  ;;  %v1593_v23 = vshll.u32 %v1494_v17, 16  ;;  %v1198_v12 = vld [vmem:[#allocation2 + $0x80] sm:$0xf0]  ;;  %v1199_v7 = vld [vmem:[#allocation2 + $0x88] sm:$0xf] }
 0x145   : > { %6724 = vmatpush3.bf16.msra.mxu0 %v6980_v30  ;;  %v1394_v26 = vor.u32 %v1393_v15, %v1390_v9  ;;  %v1751_v27 = vsel %vm711_vm7, %v1749_v13, %v1750_v16  ;;  %v1598_v29 = vshrl.u32 %v1495_v18, 16  ;;  %v1601_v28 = vshll.u32 %v1495_v18, 16  ;;  %v1196_v30 = vld [vmem:[#allocation2 + $0x70] sm:$0xf0]  ;;  %v1709_v18 = vld [vmem:[#allocation2 + $0x98] sm:$0xf] }
 0x146   : > { %v1592_v32 = vrot.slane %v1590_v21, 3  ;;  %v1595_v33 = vrot.slane %v1593_v23, 4  ;;  %v1397_v34 = vshrl.u32 %v1286_v24, 16  ;;  %v1400_v35 = vshll.u32 %v1286_v24, 16  ;;  %v1708_v13 = vld [vmem:[#allocation2 + $0x90] sm:$0xf0] }
 0x147   : > { %v1395_v37 = vsel %vm782_vm8, %v1386_v14, %v1394_v26  ;;  %v1600_v38 = vrot.slane %v1598_v29, 3  ;;  %v1603_v39 = vrot.slane %v1601_v28, 4  ;;  %v1405_v40 = vshrl.u32 %v1287_v25, 16  ;;  %v1498_v24 = vld [vmem:[#allocation2 + $0x90] sm:$0xf8] }
 0x148   : > { %2951 = vmatmul.mubr.bf16.gmra.mrb[56].mxu0 %v1238_v43  ;;  %v1596_v42 = vor.u32 %v1595_v33, %v1592_v32  ;;  %v1399_v43 = vrot.slane %v1397_v34, 4  ;;  %v1402_v44 = vrot.slane %v1400_v35, 5  ;;  %v1408_v45 = vshll.u32 %v1287_v25, 16  ;;  %v1499_v28 = vld [vmem:[#allocation2 + $0x98] sm:$0xf] }
 0x149   : > { %2958 = vmatprep.mubr.bf16.mxu0 %v1395_v37  ;;  %v1604_v47 = vor.u32 %v1603_v39, %v1600_v38  ;;  %v1407_v48 = vrot.slane %v1405_v40, 4  ;;  %v1242_v49 = vrot.slane %v1196_v30, 4  ;;  %v1243_v50 = vrot.slane %v1197_v31, 4  ;;  %v1290_v38 = vld [vmem:[#allocation2 + $0x90] sm:$0xf0] }
 0x14a   : > { %3064 = vmatmul.mubr.bf16.gmra.mrb[56].mxu1 %v1588_v19  ;;  %v1403_v51 = vor.u32 %v1402_v44, %v1399_v43  ;;  %v1410_v53 = vrot.slane %v1408_v45, 5  ;;  %v1752_v54 = vrot.slane %v1706_v36, 4  ;;  %v1753_v55 = vrot.slane %v1707_v41, 4  ;;  %v1291_v39 = vld [vmem:[#allocation2 + $0x98] sm:$0x1f] }
 0x14b   : > { %3071 = vmatprep.mubr.bf16.mxu1 %v1751_v27  ;;  %v1605_v56 = vsel %vm284_vm4, %v1596_v42, %v1604_v47  ;;  %v1244_v57 = vsel %vm711_vm7, %v1242_v49, %v1243_v50  ;;  %v1607_v58 = vshrl.u32 %v1496_v46, 16  ;;  %v1610_v59 = vshll.u32 %v1496_v46, 16  ;;  %v1200_v44 = vld [vmem:[#allocation2 + $0x90] sm:$0xf0]  ;;  %v1201_v49 = vld [vmem:[#allocation2 + $0x98] sm:$0xf] }
 0x14c   : > { %v1411_v61 = vor.u32 %v1410_v53, %v1407_v48  ;;  %v1754_v62 = vsel %vm711_vm7, %v1752_v54, %v1753_v55  ;;  %v1615_v63 = vshrl.u32 %v1497_v52, 16  ;;  %v1618_v0 = vshll.u32 %v1497_v52, 16  ;;  %v1710_v54 = vld [vmem:[#allocation2 + $0xa0] sm:$0xf0] }
 0x14d   : > { %v1609_v3 = vrot.slane %v1607_v58, 3  ;;  %v1612_v4 = vrot.slane %v1610_v59, 4  ;;  %v1414_v5 = vshrl.u32 %v1288_v60, 16  ;;  %v1417_v6 = vshll.u32 %v1288_v60, 16  ;;  %v1711_v60 = vld [vmem:[#allocation2 + $0xa8] sm:$0xf] }
 0x14e   : > { %v1412_v8 = vsel %vm782_vm8, %v1403_v51, %v1411_v61  ;;  %v1617_v9 = vrot.slane %v1615_v63, 3  ;;  %v1620_v10 = vrot.slane %v1618_v0, 4  ;;  %v1422_v11 = vshrl.u32 %v1289_v2, 16  ;;  %v1500_v0 = vld [vmem:[#allocation2 + $0xa0] sm:$0xf8] }
 0x14f   : > { %v1613_v14 = vor.u32 %v1612_v4, %v1609_v3  ;;  %v1416_v15 = vrot.slane %v1414_v5, 4  ;;  %v1419_v16 = vrot.slane %v1417_v6, 5  ;;  %v1425_v17 = vshll.u32 %v1289_v2, 16  ;;  %v1501_v3 = vld [vmem:[#allocation2 + $0xa8] sm:$0xf] }
 0x150   : > { %2959 = vmatmul.mubr.bf16.gmra.mrb[60].mxu0 %v1241_v20  ;;  %v1621_v19 = vor.u32 %v1620_v10, %v1617_v9  ;;  %v1424_v20 = vrot.slane %v1422_v11, 4  ;;  %v1245_v21 = vrot.slane %v1198_v12, 4  ;;  %v1246_v23 = vrot.slane %v1199_v7, 4  ;;  %v1292_v10 = vld [vmem:[#allocation2 + $0xa0] sm:$0xf0] }
 0x151   : > { %2966 = vmatprep.mubr.bf16.mxu0 %v1412_v8  ;;  %v1420_v25 = vor.u32 %v1419_v16, %v1416_v15  ;;  %v1427_v26 = vrot.slane %v1425_v17, 5  ;;  %v1755_v27 = vrot.slane %v1708_v13, 4  ;;  %v1756_v29 = vrot.slane %v1709_v18, 4 }
 0x152   : > { %3072 = vmatmul.mubr.bf16.gmra.mrb[60].mxu1 %v1605_v56  ;;  %v1622_v30 = vsel %vm284_vm4, %v1613_v14, %v1621_v19  ;;  %v1247_v31 = vsel %vm711_vm7, %v1245_v21, %v1246_v23  ;;  %v1624_v32 = vshrl.u32 %v1498_v24, 16  ;;  %v1627_v33 = vshll.u32 %v1498_v24, 16  ;;  %v1293_v14 = vld [vmem:[#allocation2 + $0xa8] sm:$0x1f]  ;;  %v1202_v21 = vld [vmem:[#allocation2 + $0xa0] sm:$0xf0] }
 0x153   : > { %3079 = vmatprep.mubr.bf16.mxu1 %v1754_v62  ;;  %v1428_v34 = vor.u32 %v1427_v26, %v1424_v20  ;;  %v1757_v35 = vsel %vm711_vm7, %v1755_v27, %v1756_v29  ;;  %v1632_v36 = vshrl.u32 %v1499_v28, 16  ;;  %v1635_v37 = vshll.u32 %v1499_v28, 16  ;;  %v1203_v27 = vld [vmem:[#allocation2 + $0xa8] sm:$0xf] }
 0x154   : > { %v1626_v40 = vrot.slane %v1624_v32, 3  ;;  %v1629_v41 = vrot.slane %v1627_v33, 4  ;;  %v1431_v42 = vshrl.u32 %v1290_v38, 16  ;;  %v1434_v43 = vshll.u32 %v1290_v38, 16  ;;  %v1712_v33 = vld [vmem:[#allocation2 + $0xb0] sm:$0xf0] }
 0x155   : > { %v1429_v45 = vsel %vm782_vm8, %v1420_v25, %v1428_v34  ;;  %v1634_v46 = vrot.slane %v1632_v36, 3  ;;  %v1637_v47 = vrot.slane %v1635_v37, 4  ;;  %v1439_v48 = vshrl.u32 %v1291_v39, 16  ;;  %v1713_v36 = vld [vmem:[#allocation2 + $0xb8] sm:$0xf] }
 0x156   : > { %v1630_v50 = vor.u32 %v1629_v41, %v1626_v40  ;;  %v1433_v52 = vrot.slane %v1431_v42, 4  ;;  %v1436_v51 = vrot.slane %v1434_v43, 5  ;;  %v1442_v53 = vshll.u32 %v1291_v39, 16  ;;  %v1502_v38 = vld [vmem:[#allocation2 + $0xb0] sm:$0xf8] }
 0x157   : > { %v1638_v55 = vor.u32 %v1637_v47, %v1634_v46  ;;  %v1441_v56 = vrot.slane %v1439_v48, 4  ;;  %v1248_v58 = vrot.slane %v1200_v44, 4  ;;  %v1249_v59 = vrot.slane %v1201_v49, 4  ;;  %v1503_v41 = vld [vmem:[#allocation2 + $0xb8] sm:$0xf] }
 0x158   : > { %2967 = vmatmul.mubr.bf16.gmra.mrb[64].mxu0 %v1244_v57  ;;  %v1437_v61 = vor.u32 %v1436_v51, %v1433_v52  ;;  %v1444_v57 = vrot.slane %v1442_v53, 5  ;;  %v1758_v62 = vrot.slane %v1710_v54, 4  ;;  %v1759_v63 = vrot.slane %v1711_v60, 4  ;;  %v1784_v43 = vld [vmem:[#allocation2 + $0x20] sm:$0xf0] }
 0x159   : > { %2974 = vmatprep.mubr.bf16.mxu0 %v1429_v45  ;;  %v1639_v2 = vsel %vm284_vm4, %v1630_v50, %v1638_v55  ;;  %v1250_v12 = vsel %vm711_vm7, %v1248_v58, %v1249_v59  ;;  %v1641_v4 = vshrl.u32 %v1500_v0, 16  ;;  %v1644_v5 = vshll.u32 %v1500_v0, 16  ;;  %v1785_v48 = vld [vmem:[#allocation2 + $0x28] sm:$0x1f]  ;;  %v1786_v53 = vld [vmem:[#allocation2 + $0x30] sm:$0xf0] }
 0x15a   : > { %3080 = vmatmul.mubr.bf16.gmra.mrb[64].mxu1 %v1622_v30  ;;  %v1445_v6 = vor.u32 %v1444_v57, %v1441_v56  ;;  %v1760_v7 = vsel %vm711_vm7, %v1758_v62, %v1759_v63  ;;  %v1649_v8 = vshrl.u32 %v1501_v3, 16  ;;  %v1652_v9 = vshll.u32 %v1501_v3, 16  ;;  %v1787_v59 = vld [vmem:[#allocation2 + $0x38] sm:$0x1f] }
 0x15b   : > { %3087 = vmatprep.mubr.bf16.mxu1 %v1757_v35  ;;  %v1643_v11 = vrot.slane %v1641_v4, 3  ;;  %v1646_v13 = vrot.slane %v1644_v5, 4  ;;  %v1448_v15 = vshrl.u32 %v1292_v10, 16  ;;  %v1451_v16 = vshll.u32 %v1292_v10, 16  ;;  %v1788_v4 = vld [vmem:[#allocation2 + $0x40] sm:$0xf0] }
 0x15c   : > { %v1446_v17 = vsel %vm782_vm8, %v1437_v61, %v1445_v6  ;;  %v1651_v18 = vrot.slane %v1649_v8, 3  ;;  %v1654_v19 = vrot.slane %v1652_v9, 4  ;;  %v1456_v20 = vshrl.u32 %v1293_v14, 16  ;;  %v1789_v9 = vld [vmem:[#allocation2 + $0x48] sm:$0x1f] }
 0x15d   : > { %v1647_v23 = vor.u32 %v1646_v13, %v1643_v11  ;;  %v1450_v24 = vrot.slane %v1448_v15, 4  ;;  %v1453_v25 = vrot.slane %v1451_v16, 5  ;;  %v1459_v26 = vshll.u32 %v1293_v14, 16  ;;  %v1790_v15 = vld [vmem:[#allocation2 + $0x50] sm:$0xf0] }
 0x15e   : > { %v1655_v29 = vor.u32 %v1654_v19, %v1651_v18  ;;  %v1458_v28 = vrot.slane %v1456_v20, 4  ;;  %v1251_v30 = vrot.slane %v1202_v21, 4  ;;  %v1252_v32 = vrot.slane %v1203_v27, 4 }
 0x15f   : > { %v1454_v34 = vor.u32 %v1453_v25, %v1450_v24  ;;  %v1461_v35 = vrot.slane %v1459_v26, 5  ;;  %v1761_v37 = vrot.slane %v1712_v33, 4  ;;  %v1762_v40 = vrot.slane %v1713_v36, 4  ;;  %v1791_v24 = vld [vmem:[#allocation2 + $0x58] sm:$0x1f] }
 0x160   : > { %2975 = vmatmul.mubr.bf16.gmra.mrb[68].mxu0 %v1247_v31  ;;  %v1656_v39 = vsel %vm284_vm4, %v1647_v23, %v1655_v29  ;;  %v7720_v31 = vsel %vm711_vm7, %v1251_v30, %v1252_v32  ;;  %v1658_v42 = vshrl.u32 %v1502_v38, 16  ;;  %v1661_v45 = vshll.u32 %v1502_v38, 16 }
 0x161   : > { %2982 = vmatprep.mubr.bf16.mxu0 %v1446_v17  ;;  %v1462_v44 = vor.u32 %v1461_v35, %v1458_v28  ;;  %v1666_v46 = vshrl.u32 %v1503_v41, 16  ;;  %v1669_v47 = vshll.u32 %v1503_v41, 16  ;;  %v1763_v49 = vsel %vm711_vm7, %v1761_v37, %v1762_v40  ;;  %v1792_v28 = vld [vmem:[#allocation2 + $0x60] sm:$0xf0]  ;;  %v1793_v35 = vld [vmem:[#allocation2 + $0x68] sm:$0x1f] }
 0x162   : > { %3088 = vmatmul.mubr.bf16.gmra.mrb[68].mxu1 %v1639_v2  ;;  %v1660_v50 = vrot.slane %v1658_v42, 3  ;;  %v1805_v52 = vshrl.u32 %v1784_v43, 16  ;;  %v1808_v51 = vshll.u32 %v1784_v43, 16  ;;  %v1663_v55 = vrot.slane %v1661_v45, 4 }
 0x163   : > { %3095 = vmatprep.mubr.bf16.mxu1 %v1760_v7  ;;  %v1463_v54 = vsel %vm782_vm8, %v1454_v34, %v1462_v44  ;;  %v1668_v56 = vrot.slane %v1666_v46, 3  ;;  %v1671_v58 = vrot.slane %v1669_v47, 4  ;;  %v1813_v57 = vshrl.u32 %v1785_v48, 16  ;;  %v1794_v44 = vld [vmem:[#allocation2 + $0x70] sm:$0xf0] }
 0x164   : > { %v1807_v60 = vrot.slane %v1805_v52, 4  ;;  %v1810_v61 = vrot.slane %v1808_v51, 5  ;;  %v1816_v62 = vshll.u32 %v1785_v48, 16  ;;  %v1664_v63 = vor.u32 %v1663_v55, %v1660_v50 }
 0x165   : > { %v1672_v0 = vor.u32 %v1671_v58, %v1668_v56  ;;  %v1822_v2 = vshrl.u32 %v1786_v53, 16  ;;  %v1825_v3 = vshll.u32 %v1786_v53, 16  ;;  %v1815_v6 = vrot.slane %v1813_v57, 4 }
 0x166   : > { %v1811_v5 = vor.u32 %v1810_v61, %v1807_v60  ;;  %v1818_v7 = vrot.slane %v1816_v62, 5  ;;  %v1830_v8 = vshrl.u32 %v1787_v59, 16  ;;  %v1833_v14 = vshll.u32 %v1787_v59, 16  ;;  %v1797_v62 = vld [vmem:[#allocation2 + $0x88] sm:$0x1f] }
 0x167   : > { %v1673_v10 = vsel %vm284_vm4, %v1664_v63, %v1672_v0  ;;  %v1824_v11 = vrot.slane %v1822_v2, 4  ;;  %v1827_v13 = vrot.slane %v1825_v3, 5  ;;  %v1839_v17 = vshrl.u32 %v1788_v4, 16 }
 0x168   : > { %2983 = vmatmul.mubr.bf16.gmra.mrb[72].mxu0 %v1250_v12  ;;  %v1819_v16 = vor.u32 %v1818_v7, %v1815_v6  ;;  %v1832_v12 = vrot.slane %v1830_v8, 4  ;;  %v1842_v18 = vshll.u32 %v1788_v4, 16  ;;  %v1835_v20 = vrot.slane %v1833_v14, 5  ;;  %v1798_v4 = vld [vmem:[#allocation2 + $0x90] sm:$0xf0] }
 0x169   : > { %2990 = vmatprep.mubr.bf16.mxu0 %v1463_v54  ;;  %v1828_v19 = vor.u32 %v1827_v13, %v1824_v11  ;;  %v1847_v21 = vshrl.u32 %v1789_v9, 16  ;;  %v1850_v23 = vshll.u32 %v1789_v9, 16  ;;  %v1841_v26 = vrot.slane %v1839_v17, 4  ;;  %v1796_v54 = vld [vmem:[#allocation2 + $0x80] sm:$0xf0] }
 0x16a   : > { %3096 = vmatmul.mubr.bf16.gmra.mrb[72].mxu1 %v1656_v39  ;;  %v1820_v25 = vsel %vm782_vm8, %v1811_v5, %v1819_v16  ;;  %v1844_v27 = vrot.slane %v1842_v18, 5  ;;  %v1856_v29 = vshrl.u32 %v1790_v15, 16  ;;  %v1836_v30 = vor.u32 %v1835_v20, %v1832_v12  ;;  %v1799_v14 = vld [vmem:[#allocation2 + $0x98] sm:$0x1f]  ;;  %v1800_v18 = vld [vmem:[#allocation2 + $0xa0] sm:$0xf0] }
 0x16b   : > { %3103 = vmatprep.mubr.bf16.mxu1 %v1763_v49  ;;  %v1849_v32 = vrot.slane %v1847_v21, 4  ;;  %v1852_v33 = vrot.slane %v1850_v23, 5  ;;  %v1859_v34 = vshll.u32 %v1790_v15, 16  ;;  %v1864_v38 = vshrl.u32 %v1791_v24, 16  ;;  %v1795_v49 = vld [vmem:[#allocation2 + $0x78] sm:$0x1f] }
 0x16c   : > { %v1845_v36 = vor.u32 %v1844_v27, %v1841_v26  ;;  %v1858_v37 = vrot.slane %v1856_v29, 4  ;;  %v1867_v39 = vshll.u32 %v1791_v24, 16  ;;  %v1837_v40 = vsel %vm782_vm8, %v1828_v19, %v1836_v30  ;;  %v1801_v24 = vld [vmem:[#allocation2 + $0xa8] sm:$0x1f] }
 0x16d   : > { %v1853_v41 = vor.u32 %v1852_v33, %v1849_v32  ;;  %v1861_v42 = vrot.slane %v1859_v34, 5  ;;  %v1873_v43 = vshrl.u32 %v1792_v28, 16  ;;  %v1866_v45 = vrot.slane %v1864_v38, 4  ;;  %v1802_v34 = vld [vmem:[#allocation2 + $0xb0] sm:$0xf0] }
 0x16e   : > { %v1869_v46 = vrot.slane %v1867_v39, 5  ;;  %v1876_v47 = vshll.u32 %v1792_v28, 16  ;;  %v1881_v48 = vshrl.u32 %v1793_v35, 16  ;;  %v1884_v53 = vshll.u32 %v1793_v35, 16  ;;  %v1803_v39 = vld [vmem:[#allocation2 + $0xb8] sm:$0x1f] }
 0x16f   : > { %v1854_v50 = vsel %vm782_vm8, %v1845_v36, %v1853_v41  ;;  %v1862_v52 = vor.u32 %v1861_v42, %v1858_v37  ;;  %v1875_v51 = vrot.slane %v1873_v43, 4  ;;  %v1890_v58 = vshrl.u32 %v1794_v44, 16 }
 0x170   : > { %2991 = vmatmul.mubr.bf16.gmra.mrb[76].mxu0 %v7720_v31  ;;  %v1870_v31 = vor.u32 %v1869_v46, %v1866_v45  ;;  %v1878_v55 = vrot.slane %v1876_v47, 5  ;;  %v1883_v56 = vrot.slane %v1881_v48, 4  ;;  %v1886_v59 = vrot.slane %v1884_v53, 5 }
 0x171   : > { %6725 = vmatprep.mubr.bf16.mxu0 %v1820_v25  ;;  %v1893_v60 = vshll.u32 %v1794_v44, 16  ;;  %v1898_v61 = vshrl.u32 %v1795_v49, 16  ;;  %v1901_v57 = vshll.u32 %v1795_v49, 16  ;;  %v1892_v2 = vrot.slane %v1890_v58, 4 }
 0x172   : > { %3104 = vmatmul.mubr.bf16.gmra.mrb[76].mxu1 %v1673_v10  ;;  %v1871_v63 = vsel %vm782_vm8, %v1862_v52, %v1870_v31  ;;  %v1879_v0 = vor.u32 %v1878_v55, %v1875_v51  ;;  %v1907_v3 = vshrl.u32 %v1796_v54, 16  ;;  %v1887_v5 = vor.u32 %v1886_v59, %v1883_v56 }
 0x173   : > { %v1895_v6 = vrot.slane %v1893_v60, 5  ;;  %v1900_v7 = vrot.slane %v1898_v61, 4  ;;  %v1903_v8 = vrot.slane %v1901_v57, 5  ;;  %v1910_v10 = vshll.u32 %v1796_v54, 16 }
 0x174   : > { %v1909_v9 = vrot.slane %v1907_v3, 4  ;;  %v1915_v11 = vshrl.u32 %v1797_v62, 16  ;;  %v1918_v13 = vshll.u32 %v1797_v62, 16  ;;  %v1888_v15 = vsel %vm782_vm8, %v1879_v0, %v1887_v5 }
 0x175   : > { %v1896_v16 = vor.u32 %v1895_v6, %v1892_v2  ;;  %v1904_v12 = vor.u32 %v1903_v8, %v1900_v7  ;;  %v1924_v17 = vshrl.u32 %v1798_v4, 16  ;;  %v1912_v19 = vrot.slane %v1910_v10, 5 }
 0x176   : > { %v1917_v20 = vrot.slane %v1915_v11, 4  ;;  %v1920_v21 = vrot.slane %v1918_v13, 5  ;;  %v1927_v23 = vshll.u32 %v1798_v4, 16  ;;  %v1932_v27 = vshrl.u32 %v1799_v14, 16 }
 0x177   : > { %v1905_v25 = vsel %vm782_vm8, %v1896_v16, %v1904_v12  ;;  %v1926_v26 = vrot.slane %v1924_v17, 4  ;;  %v1935_v29 = vshll.u32 %v1799_v14, 16  ;;  %v1913_v28 = vor.u32 %v1912_v19, %v1909_v9 }
 0x178   : > { %6726 = vmatmul.mubr.bf16.vlgmr.msra.gmra.mrb[80].mxu0 %v1837_v40  ;;  %v1921_v30 = vor.u32 %v1920_v21, %v1917_v20  ;;  %v1929_v32 = vrot.slane %v1927_v23, 5  ;;  %v1941_v33 = vshrl.u32 %v1800_v18, 16  ;;  %v1934_v35 = vrot.slane %v1932_v27, 4 }
 0x179   : > { %6729 = vmatprep.mubr.bf16.mxu0 %v1854_v50  ;;  %v1937_v36 = vrot.slane %v1935_v29, 5  ;;  %v1944_v37 = vshll.u32 %v1800_v18, 16  ;;  %v1949_v38 = vshrl.u32 %v1801_v24, 16  ;;  %v1952_v43 = vshll.u32 %v1801_v24, 16 }
 0x17a   : > { %v1922_v40 = vsel %vm782_vm8, %v1913_v28, %v1921_v30  ;;  %v1930_v41 = vor.u32 %v1929_v32, %v1926_v26  ;;  %v1943_v42 = vrot.slane %v1941_v33, 4  ;;  %v1958_v47 = vshrl.u32 %v1802_v34, 16 }
 0x17b   : > { %v1938_v44 = vor.u32 %v1937_v36, %v1934_v35  ;;  %v1946_v45 = vrot.slane %v1944_v37, 5  ;;  %v1951_v46 = vrot.slane %v1949_v38, 4  ;;  %v1954_v48 = vrot.slane %v1952_v43, 5 }
 0x17c   : > { %v1961_v49 = vshll.u32 %v1802_v34, 16  ;;  %v1966_v50 = vshrl.u32 %v1803_v39, 16  ;;  %v1969_v52 = vshll.u32 %v1803_v39, 16  ;;  %v1960_v54 = vrot.slane %v1958_v47, 4 }
 0x17d   : > { %v1939_v51 = vsel %vm782_vm8, %v1930_v41, %v1938_v44  ;;  %v1947_v53 = vor.u32 %v1946_v45, %v1943_v42  ;;  %v1955_v31 = vor.u32 %v1954_v48, %v1951_v46 }
 0x17e   : > { %v1963_v55 = vrot.slane %v1961_v49, 5  ;;  %v1968_v56 = vrot.slane %v1966_v50, 4  ;;  %v1971_v58 = vrot.slane %v1969_v52, 5 }
 0x17f   : > { %v1956_v59 = vsel %vm782_vm8, %v1947_v53, %v1955_v31 }
 0x180   : > { %6730 = vmatmul.mubr.bf16.gmra.mrb[84].mxu0 %v1871_v63  ;;  %v1964_v60 = vor.u32 %v1963_v55, %v1960_v54  ;;  %v1972_v61 = vor.u32 %v1971_v58, %v1968_v56 }
 0x181   : > { %6733 = vmatprep.mubr.bf16.mxu0 %v1888_v15 }
 0x182   : > { %v1973_v57 = vsel %vm782_vm8, %v1964_v60, %v1972_v61 }
 0x188   : > { %6734 = vmatmul.mubr.bf16.gmra.mrb[88].mxu0 %v1905_v25 }
 0x189   : > { %6737 = vmatprep.mubr.bf16.mxu0 %v1922_v40 }
 0x190   : > { %6738 = vmatmul.mubr.bf16.gmra.mrb[92].mxu0 %v1939_v51 }
 0x191   : > { %6741 = vmatprep.mubr.bf16.mxu0 %v1956_v59 }
 0x198   : > { %6742 = vmatmul.mubr.bf16.gmra.mrb[96].mxu0 %v1973_v57 }
 0x1ab   : > { %v6131_v62 = vpop.f32.mrb[0].mxu0 }
 0x1ac   : > { %v6132_v63 = vpop.f32.mrb[1].mxu0 }
 0x1ad   : > { %v6207_v0 = vpop.f32.mrb[0].mxu1  ;;  %v6133_v2 = vadd.f32 %v6132_v63, %v6131_v62  ;;  %v6134_v3 = vpop.f32.mrb[2].mxu0 }
 0x1ae   : > { %v6208_v4 = vpop.f32.mrb[1].mxu1  ;;  %v6135_v5 = vpop.f32.mrb[3].mxu0 }
 0x1af   : > { %v6209_v6 = vadd.f32 %v6208_v4, %v6207_v0  ;;  %v6210_v7 = vpop.f32.mrb[2].mxu1  ;;  %v6136_v8 = vadd.f32 %v6135_v5, %v6134_v3 }
 0x1b0   : > { %v6211_v9 = vpop.f32.mrb[3].mxu1 }
 0x1b1   : > { %v7736_v10 = vadd.f32 %v6209_v6, %v6133_v2  ;;  %v6212_v11 = vadd.f32 %v6211_v9, %v6210_v7 }
 0x1b3   : > { %v7738_v13 = vadd.f32 %v6212_v11, %v6136_v8  ;;  %v6137_v14 = vpop.f32.mrb[4].mxu0 }
 0x1b4   : > { %v6138_v15 = vpop.f32.mrb[5].mxu0 }
 0x1b5   : > { %v6139_v16 = vadd.f32 %v6138_v15, %v6137_v14  ;;  %v6140_v12 = vpop.f32.mrb[6].mxu0  ;;  %v6213_v17 = vpop.f32.mrb[4].mxu1 }
 0x1b6   : > { %v6141_v18 = vpop.f32.mrb[7].mxu0  ;;  %v6214_v19 = vpop.f32.mrb[5].mxu1 }
 0x1b7   : > { %v6142_v20 = vadd.f32 %v6141_v18, %v6140_v12  ;;  %v6215_v21 = vadd.f32 %v6214_v19, %v6213_v17  ;;  %v6216_v23 = vpop.f32.mrb[6].mxu1 }
 0x1b8   : > { %v6217_v24 = vpop.f32.mrb[7].mxu1 }
 0x1b9   : > { %v7740_v25 = vadd.f32 %v6215_v21, %v6139_v16  ;;  %v6218_v26 = vadd.f32 %v6217_v24, %v6216_v23 }
 0x1bb   : > { %v7742_v27 = vadd.f32 %v6218_v26, %v6142_v20  ;;  %v6143_v29 = vpop.f32.mrb[8].mxu0 }
 0x1bc   : > { %v6144_v28 = vpop.f32.mrb[9].mxu0 }
 0x1bd   : > { %v6219_v30 = vpop.f32.mrb[8].mxu1  ;;  %v6145_v32 = vadd.f32 %v6144_v28, %v6143_v29  ;;  %v6146_v33 = vpop.f32.mrb[10].mxu0 }
 0x1be   : > { %v6220_v34 = vpop.f32.mrb[9].mxu1  ;;  %v6147_v35 = vpop.f32.mrb[11].mxu0 }
 0x1bf   : > { %v6221_v36 = vadd.f32 %v6220_v34, %v6219_v30  ;;  %v6222_v37 = vpop.f32.mrb[10].mxu1  ;;  %v6148_v38 = vadd.f32 %v6147_v35, %v6146_v33 }
 0x1c0   : > { %v6223_v39 = vpop.f32.mrb[11].mxu1 }
 0x1c1   : > { %v7744_v40 = vadd.f32 %v6221_v36, %v6145_v32  ;;  %v6224_v41 = vadd.f32 %v6223_v39, %v6222_v37 }
 0x1c3   : > { %v7746_v42 = vadd.f32 %v6224_v41, %v6148_v38  ;;  %v6149_v43 = vpop.f32.mrb[12].mxu0 }
 0x1c4   : > { %v6150_v44 = vpop.f32.mrb[13].mxu0 }
 0x1c5   : > { %v6151_v45 = vadd.f32 %v6150_v44, %v6149_v43  ;;  %v6152_v46 = vpop.f32.mrb[14].mxu0  ;;  %v6225_v47 = vpop.f32.mrb[12].mxu1 }
 0x1c6   : > { %v6153_v48 = vpop.f32.mrb[15].mxu0  ;;  %v6226_v49 = vpop.f32.mrb[13].mxu1 }
 0x1c7   : > { %v6154_v50 = vadd.f32 %v6153_v48, %v6152_v46  ;;  %v6227_v52 = vadd.f32 %v6226_v49, %v6225_v47  ;;  %v6228_v51 = vpop.f32.mrb[14].mxu1 }
 0x1c8   : > { %v6229_v53 = vpop.f32.mrb[15].mxu1 }
 0x1c9   : > { %v7748_v54 = vadd.f32 %v6227_v52, %v6151_v45  ;;  %v6230_v31 = vadd.f32 %v6229_v53, %v6228_v51 }
 0x1cb   : > { %v7750_v55 = vadd.f32 %v6230_v31, %v6154_v50  ;;  %v6155_v56 = vpop.f32.mrb[16].mxu0 }
 0x1cc   : > { %v6156_v58 = vpop.f32.mrb[17].mxu0 }
 0x1cd   : > { %v6231_v59 = vpop.f32.mrb[16].mxu1  ;;  %v6157_v60 = vadd.f32 %v6156_v58, %v6155_v56  ;;  %v6158_v61 = vpop.f32.mrb[18].mxu0 }
 0x1ce   : > { %v6232_v57 = vpop.f32.mrb[17].mxu1  ;;  %v6159_v62 = vpop.f32.mrb[19].mxu0 }
 0x1cf   : > { %v6233_v63 = vadd.f32 %v6232_v57, %v6231_v59  ;;  %v6234_v0 = vpop.f32.mrb[18].mxu1  ;;  %v6160_v2 = vadd.f32 %v6159_v62, %v6158_v61 }
 0x1d0   : > { %v6235_v3 = vpop.f32.mrb[19].mxu1 }
 0x1d1   : > { %v7752_v4 = vadd.f32 %v6233_v63, %v6157_v60  ;;  %v6236_v5 = vadd.f32 %v6235_v3, %v6234_v0 }
 0x1d3   : > { %v7754_v6 = vadd.f32 %v6236_v5, %v6160_v2  ;;  %v6161_v7 = vpop.f32.mrb[20].mxu0 }
 0x1d4   : > { %v6162_v8 = vpop.f32.mrb[21].mxu0 }
 0x1d5   : > { %v6163_v9 = vadd.f32 %v6162_v8, %v6161_v7  ;;  %v6164_v11 = vpop.f32.mrb[22].mxu0  ;;  %v6237_v14 = vpop.f32.mrb[20].mxu1 }
 0x1d6   : > { %v6165_v15 = vpop.f32.mrb[23].mxu0  ;;  %v6238_v16 = vpop.f32.mrb[21].mxu1 }
 0x1d7   : > { %v6166_v12 = vadd.f32 %v6165_v15, %v6164_v11  ;;  %v6239_v17 = vadd.f32 %v6238_v16, %v6237_v14  ;;  %v6240_v18 = vpop.f32.mrb[22].mxu1 }
 0x1d8   : > { %v6241_v19 = vpop.f32.mrb[23].mxu1 }
 0x1d9   : > { %v7756_v20 = vadd.f32 %v6239_v17, %v6163_v9  ;;  %v6242_v21 = vadd.f32 %v6241_v19, %v6240_v18 }
 0x1db   : > { %v7758_v23 = vadd.f32 %v6242_v21, %v6166_v12  ;;  %v6167_v24 = vpop.f32.mrb[24].mxu0 }
 0x1dc   : > { %v6168_v26 = vpop.f32.mrb[25].mxu0 }
 0x1dd   : > { %v6169_v29 = vadd.f32 %v6168_v26, %v6167_v24  ;;  %v6170_v28 = vpop.f32.mrb[26].mxu0  ;;  %v6243_v30 = vpop.f32.mrb[24].mxu1  ;;  %v3305_v24 = vld [vmem:[#allocation3] sm:$0x8]  ;;  %v3308_v26 = vld [vmem:[#allocation3 + $0x10] sm:$0x8] }
 0x1de   : > { %v6171_v32 = vpop.f32.mrb[27].mxu0  ;;  %v6244_v33 = vpop.f32.mrb[25].mxu1 }
 0x1df   : > { %v6172_v34 = vadd.f32 %v6171_v32, %v6170_v28  ;;  %v6245_v35 = vadd.f32 %v6244_v33, %v6243_v30  ;;  %v6246_v36 = vpop.f32.mrb[26].mxu1  ;;  %v3306_v30 = vsel %vm7536_vm2, 0, %v3305_v24  ;;  %v3309_v32 = vsel %vm7536_vm2, 0, %v3308_v26  ;;  %v3311_v33 = vld [vmem:[#allocation3 + $0x20] sm:$0x8] }
 0x1e0   : > { %v6247_v37 = vpop.f32.mrb[27].mxu1  ;;  %3307 = vst [vmem:[#allocation3] sm:$0x8] %v3306_v30  ;;  %3310 = vst [vmem:[#allocation3 + $0x10] sm:$0x8] %v3309_v32 }
 0x1e1   : > { %v7760_v38 = vadd.f32 %v6245_v35, %v6169_v29  ;;  %v6248_v39 = vadd.f32 %v6247_v37, %v6246_v36  ;;  %v3312_v35 = vsel %vm7536_vm2, 0, %v3311_v33  ;;  %v3314_v36 = vld [vmem:[#allocation3 + $0x30] sm:$0x8]  ;;  %v3317_v37 = vld [vmem:[#allocation3 + $0x40] sm:$0x8] }
 0x1e2   : > { %3313 = vst [vmem:[#allocation3 + $0x20] sm:$0x8] %v3312_v35  ;;  %v3347_v24 = vld [vmem:[#allocation3 + $0x48] sm:$0x10] }
 0x1e3   : > { %v7762_v41 = vadd.f32 %v6248_v39, %v6172_v34  ;;  %v6173_v43 = vpop.f32.mrb[28].mxu0  ;;  %v3353_v30 = vld [vmem:[#allocation3 + $0x68] sm:$0x10] }
 0x1e4   : > { %v6174_v44 = vpop.f32.mrb[29].mxu0  ;;  %v3354_v35 = vsel %vm7564_vm6, 0, %v3353_v30 }
 0x1e5   : > { %v6249_v45 = vpop.f32.mrb[28].mxu1  ;;  %v6175_v46 = vadd.f32 %v6174_v44, %v6173_v43  ;;  %v6176_v47 = vpop.f32.mrb[30].mxu0  ;;  %v3315_v44 = vsel %vm7536_vm2, 0, %v3314_v36  ;;  %v3356_v36 = vld [vmem:[#allocation3 + $0x78] sm:$0x10] }
 0x1e6   : > { %v6250_v48 = vpop.f32.mrb[29].mxu1  ;;  %v6177_v49 = vpop.f32.mrb[31].mxu0  ;;  %3316 = vst [vmem:[#allocation3 + $0x30] sm:$0x8] %v3315_v44  ;;  %3355 = vst [vmem:[#allocation3 + $0x68] sm:$0x10] %v3354_v35 }
 0x1e7   : > { %v6251_v50 = vadd.f32 %v6250_v48, %v6249_v45  ;;  %v6252_v52 = vpop.f32.mrb[30].mxu1  ;;  %v6178_v51 = vadd.f32 %v6177_v49, %v6176_v47  ;;  %v3318_v45 = vsel %vm7536_vm2, 0, %v3317_v37  ;;  %v3323_v47 = vld [vmem:[#allocation3 + $0x60] sm:$0x8] }
 0x1e8   : > { %v6253_v53 = vpop.f32.mrb[31].mxu1  ;;  %3319 = vst [vmem:[#allocation3 + $0x40] sm:$0x8] %v3318_v45  ;;  %v3362_v45 = vld [vmem:[#allocation3 + $0x98] sm:$0x10] }
 0x1e9   : > { %v7764_v31 = vadd.f32 %v6251_v50, %v6175_v46  ;;  %v6254_v56 = vadd.f32 %v6253_v53, %v6252_v52  ;;  %v3320_v46 = vld [vmem:[#allocation3 + $0x50] sm:$0x8]  ;;  %v3324_v50 = vsel %vm7536_vm2, 0, %v3323_v47 }
 0x1ea   : > { %v3321_v49 = vsel %vm7536_vm2, 0, %v3320_v46  ;;  %v3326_v52 = vld [vmem:[#allocation3 + $0x70] sm:$0x8]  ;;  %3325 = vst [vmem:[#allocation3 + $0x60] sm:$0x8] %v3324_v50 }
 0x1eb   : > { %v7766_v58 = vadd.f32 %v6254_v56, %v6178_v51  ;;  %v6179_v59 = vpop.f32.mrb[32].mxu0  ;;  %3322 = vst [vmem:[#allocation3 + $0x50] sm:$0x8] %v3321_v49  ;;  %v3327_v56 = vsel %vm7536_vm2, 0, %v3326_v52 }
 0x1ec   : > { %v6180_v60 = vpop.f32.mrb[33].mxu0  ;;  %3328 = vst [vmem:[#allocation3 + $0x70] sm:$0x8] %v3327_v56 }
 0x1ed   : > { %v6181_v61 = vadd.f32 %v6180_v60, %v6179_v59  ;;  %v6182_v57 = vpop.f32.mrb[34].mxu0  ;;  %v6255_v62 = vpop.f32.mrb[32].mxu1  ;;  %v3329_v59 = vld [vmem:[#allocation3 + $0x80] sm:$0x8]  ;;  %v3332_v60 = vld [vmem:[#allocation3 + $0x90] sm:$0x8] }
 0x1ee   : > { %v6183_v63 = vpop.f32.mrb[35].mxu0  ;;  %v6256_v0 = vpop.f32.mrb[33].mxu1 }
 0x1ef   : > { %v6184_v2 = vadd.f32 %v6183_v63, %v6182_v57  ;;  %v6257_v3 = vadd.f32 %v6256_v0, %v6255_v62  ;;  %v6258_v5 = vpop.f32.mrb[34].mxu1  ;;  %v3330_v62 = vsel %vm7536_vm2, 0, %v3329_v59  ;;  %v3333_v63 = vsel %vm7536_vm2, 0, %v3332_v60  ;;  %v3335_v0 = vld [vmem:[#allocation3 + $0x8] sm:$0x10] }
 0x1f0   : > { %v6259_v7 = vpop.f32.mrb[35].mxu1  ;;  %3331 = vst [vmem:[#allocation3 + $0x80] sm:$0x8] %v3330_v62  ;;  %3334 = vst [vmem:[#allocation3 + $0x90] sm:$0x8] %v3333_v63 }
 0x1f1   : > { %v7768_v8 = vadd.f32 %v6257_v3, %v6181_v61  ;;  %v6260_v9 = vadd.f32 %v6259_v7, %v6258_v5  ;;  %v3336_v5 = vsel %vm7564_vm6, 0, %v3335_v0  ;;  %v3338_v7 = vld [vmem:[#allocation3 + $0x18] sm:$0x10] }
 0x1f2   : > { %3337 = vst [vmem:[#allocation3 + $0x8] sm:$0x10] %v3336_v5 }
 0x1f3   : > { %v7770_v11 = vadd.f32 %v6260_v9, %v6184_v2  ;;  %v6185_v14 = vpop.f32.mrb[36].mxu0 }
 0x1f4   : > { %v6186_v15 = vpop.f32.mrb[37].mxu0 }
 0x1f5   : > { %v6187_v16 = vadd.f32 %v6186_v15, %v6185_v14  ;;  %v6188_v12 = vpop.f32.mrb[38].mxu0  ;;  %v6261_v17 = vpop.f32.mrb[36].mxu1 }
 0x1f6   : > { %v6189_v18 = vpop.f32.mrb[39].mxu0  ;;  %v6262_v19 = vpop.f32.mrb[37].mxu1 }
 0x1f7   : > { %v6190_v21 = vadd.f32 %v6189_v18, %v6188_v12  ;;  %v6263_v29 = vadd.f32 %v6262_v19, %v6261_v17  ;;  %v6264_v28 = vpop.f32.mrb[38].mxu1  ;;  %v3341_v12 = vld [vmem:[#allocation3 + $0x28] sm:$0x10] }
 0x1f8   : > { %v6265_v34 = vpop.f32.mrb[39].mxu1  ;;  %v3342_v19 = vsel %vm7564_vm6, 0, %v3341_v12 }
 0x1f9   : > { %v7778_v39 = vadd.f32 %v6263_v29, %v6187_v16  ;;  %v6266_v43 = vadd.f32 %v6265_v34, %v6264_v28  ;;  %v3339_v16 = vsel %vm7564_vm6, 0, %v3338_v7  ;;  %3343 = vst [vmem:[#allocation3 + $0x28] sm:$0x10] %v3342_v19  ;;  %v3348_v29 = vsel %vm7564_vm6, 0, %v3347_v24  ;;  %v3350_v28 = vld [vmem:[#allocation3 + $0x58] sm:$0x10] }
 0x1fa   : > { %3340 = vst [vmem:[#allocation3 + $0x18] sm:$0x10] %v3339_v16  ;;  %3349 = vst [vmem:[#allocation3 + $0x48] sm:$0x10] %v3348_v29  ;;  %v3351_v34 = vsel %vm7564_vm6, 0, %v3350_v28 }
 0x1fb   : > { %v6283_v48 = vpop.f32.mrb[40].mxu0  ;;  %v7788_v51 = vadd.f32 %v6266_v43, %v6190_v21  ;;  %v3345_v21 = vsel %vm7564_vm6, 0, %v3344_v1  ;;  %3352 = vst [vmem:[#allocation3 + $0x58] sm:$0x10] %v3351_v34  ;;  %v3357_v43 = vsel %vm7564_vm6, 0, %v3356_v36 }
 0x1fc   : > { %v6284_v53 = vpop.f32.mrb[41].mxu0  ;;  %3346 = vst [vmem:[#allocation3 + $0x38] sm:$0x10] %v3345_v21  ;;  %3358 = vst [vmem:[#allocation3 + $0x78] sm:$0x10] %v3357_v43 }
 0x1fd   : > { %v6285_v61 = vadd.f32 %v6284_v53, %v6283_v48  ;;  %v6286_v57 = vpop.f32.mrb[42].mxu0  ;;  %v6359_v2 = vpop.f32.mrb[40].mxu1  ;;  %v3363_v48 = vsel %vm7564_vm6, 0, %v3362_v45 }
 0x1fe   : > { %v6287_v3 = vpop.f32.mrb[43].mxu0  ;;  %v6360_v15 = vpop.f32.mrb[41].mxu1  ;;  %3364 = vst [vmem:[#allocation3 + $0x98] sm:$0x10] %v3363_v48 }
 0x1ff   : > { %v2921_v9 = vadd.f32 %v6285_v61, %v7736_v10  ;;  %v6288_v14 = vadd.f32 %v6287_v3, %v6286_v57  ;;  %v6361_v17 = vadd.f32 %v6360_v15, %v6359_v2  ;;  %v6362_v18 = vpop.f32.mrb[42].mxu1 }
 0x200   : > { %v6363_v26 = vpop.f32.mrb[43].mxu1 }
 0x201   : > { %v2924_v10 = vadd.f32 %v6288_v14, %v7738_v13  ;;  %v6364_v32 = vadd.f32 %v6363_v26, %v6362_v18  ;;  %v7808_v33 = vadd.f32 %v6361_v17, %v2921_v9  ;;  %v3359_v13 = vld [vmem:[#allocation3 + $0x88] sm:$0x10] }
 0x202   : > { %v3360_v44 = vsel %vm7564_vm6, 0, %v3359_v13 }
 0x203   : > { %v6289_v37 = vpop.f32.mrb[44].mxu0  ;;  %v7818_v47 = vadd.f32 %v6364_v32, %v2924_v10  ;;  %3361 = vst [vmem:[#allocation3 + $0x88] sm:$0x10] %v3360_v44 }
 0x204   : > { %v6290_v46 = vpop.f32.mrb[45].mxu0 }
 0x205   : > { %v6291_v49 = vadd.f32 %v6290_v46, %v6289_v37  ;;  %v6292_v50 = vpop.f32.mrb[46].mxu0  ;;  %v6365_v52 = vpop.f32.mrb[44].mxu1 }
 0x206   : > { %v6293_v53 = vpop.f32.mrb[47].mxu0  ;;  %v6366_v60 = vpop.f32.mrb[45].mxu1 }
 0x207   : > { %v2929_v56 = vadd.f32 %v6291_v49, %v7740_v25  ;;  %v6294_v59 = vadd.f32 %v6293_v53, %v6292_v50  ;;  %v6367_v61 = vadd.f32 %v6366_v60, %v6365_v52  ;;  %v6368_v57 = vpop.f32.mrb[46].mxu1 }
 0x208   : > { %v6369_v63 = vpop.f32.mrb[47].mxu1 }
 0x209   : > { %v2932_v62 = vadd.f32 %v6294_v59, %v7742_v27  ;;  %v6370_v0 = vadd.f32 %v6369_v63, %v6368_v57  ;;  %v7824_v2 = vadd.f32 %v6367_v61, %v2929_v56 }
 0x20b   : > { %v6295_v3 = vpop.f32.mrb[48].mxu0  ;;  %v7826_v5 = vadd.f32 %v6370_v0, %v2932_v62 }
 0x20c   : > { %v6296_v22 = vpop.f32.mrb[49].mxu0 }
 0x20d   : > { %v6297_v7 = vadd.f32 %v6296_v22, %v6295_v3  ;;  %v6298_v9 = vpop.f32.mrb[50].mxu0  ;;  %v6371_v14 = vpop.f32.mrb[48].mxu1 }
 0x20e   : > { %v6299_v15 = vpop.f32.mrb[51].mxu0  ;;  %v6372_v12 = vpop.f32.mrb[49].mxu1 }
 0x20f   : > { %v2937_v25 = vadd.f32 %v6297_v7, %v7744_v40  ;;  %v6300_v16 = vadd.f32 %v6299_v15, %v6298_v9  ;;  %v6373_v1 = vadd.f32 %v6372_v12, %v6371_v14  ;;  %v6374_v17 = vpop.f32.mrb[50].mxu1 }
 0x210   : > { %v6375_v18 = vpop.f32.mrb[51].mxu1 }
 0x211   : > { %v2940_v27 = vadd.f32 %v6300_v16, %v7746_v42  ;;  %v6376_v19 = vadd.f32 %v6375_v18, %v6374_v17  ;;  %v7830_v21 = vadd.f32 %v6373_v1, %v2937_v25 }
 0x213   : > { %v6301_v24 = vpop.f32.mrb[52].mxu0  ;;  %v7832_v26 = vadd.f32 %v6376_v19, %v2940_v27 }
 0x214   : > { %v6302_v10 = vpop.f32.mrb[53].mxu0 }
 0x215   : > { %v6303_v29 = vadd.f32 %v6302_v10, %v6301_v24  ;;  %v6304_v28 = vpop.f32.mrb[54].mxu0  ;;  %v6377_v30 = vpop.f32.mrb[52].mxu1 }
 0x216   : > { %v6305_v32 = vpop.f32.mrb[55].mxu0  ;;  %v6378_v35 = vpop.f32.mrb[53].mxu1 }
 0x217   : > { %v2945_v40 = vadd.f32 %v6303_v29, %v7748_v54  ;;  %v6306_v34 = vadd.f32 %v6305_v32, %v6304_v28  ;;  %v6379_v36 = vadd.f32 %v6378_v35, %v6377_v30  ;;  %v6380_v13 = vpop.f32.mrb[54].mxu1 }
 0x218   : > { %v6381_v37 = vpop.f32.mrb[55].mxu1 }
 0x219   : > { %v2948_v42 = vadd.f32 %v6306_v34, %v7750_v55  ;;  %v6382_v43 = vadd.f32 %v6381_v37, %v6380_v13  ;;  %v7836_v44 = vadd.f32 %v6379_v36, %v2945_v40 }
 0x21b   : > { %v6307_v45 = vpop.f32.mrb[56].mxu0  ;;  %v7838_v48 = vadd.f32 %v6382_v43, %v2948_v42 }
 0x21c   : > { %v6308_v46 = vpop.f32.mrb[57].mxu0 }
 0x21d   : > { %v6309_v49 = vadd.f32 %v6308_v46, %v6307_v45  ;;  %v6310_v50 = vpop.f32.mrb[58].mxu0  ;;  %v6383_v52 = vpop.f32.mrb[56].mxu1 }
 0x21e   : > { %v6311_v53 = vpop.f32.mrb[59].mxu0  ;;  %v6384_v59 = vpop.f32.mrb[57].mxu1 }
 0x21f   : > { %v2953_v54 = vadd.f32 %v6309_v49, %v7752_v4  ;;  %v6312_v56 = vadd.f32 %v6311_v53, %v6310_v50  ;;  %v6385_v60 = vadd.f32 %v6384_v59, %v6383_v52  ;;  %v6386_v61 = vpop.f32.mrb[58].mxu1 }
 0x220   : > { %v6387_v57 = vpop.f32.mrb[59].mxu1 }
 0x221   : > { %v2956_v55 = vadd.f32 %v6312_v56, %v7754_v6  ;;  %v6388_v62 = vadd.f32 %v6387_v57, %v6386_v61  ;;  %v7842_v63 = vadd.f32 %v6385_v60, %v2953_v54 }
 0x223   : > { %v6313_v0 = vpop.f32.mrb[60].mxu0  ;;  %v7844_v22 = vadd.f32 %v6388_v62, %v2956_v55 }
 0x224   : > { %v6314_v3 = vpop.f32.mrb[61].mxu0 }
 0x225   : > { %v6315_v7 = vadd.f32 %v6314_v3, %v6313_v0  ;;  %v6316_v9 = vpop.f32.mrb[62].mxu0  ;;  %v6389_v14 = vpop.f32.mrb[60].mxu1 }
 0x226   : > { %v6317_v15 = vpop.f32.mrb[63].mxu0  ;;  %v6390_v16 = vpop.f32.mrb[61].mxu1 }
 0x227   : > { %v2961_v4 = vadd.f32 %v6315_v7, %v7756_v20  ;;  %v6318_v25 = vadd.f32 %v6317_v15, %v6316_v9  ;;  %v6391_v12 = vadd.f32 %v6390_v16, %v6389_v14  ;;  %v6392_v1 = vpop.f32.mrb[62].mxu1 }
 0x228   : > { %v6393_v17 = vpop.f32.mrb[63].mxu1 }
 0x229   : > { %v2964_v6 = vadd.f32 %v6318_v25, %v7758_v23  ;;  %v6394_v27 = vadd.f32 %v6393_v17, %v6392_v1  ;;  %v7848_v18 = vadd.f32 %v6391_v12, %v2961_v4 }
 0x22b   : > { %v6319_v19 = vpop.f32.mrb[64].mxu0  ;;  %v7850_v10 = vadd.f32 %v6394_v27, %v2964_v6 }
 0x22c   : > { %v6320_v24 = vpop.f32.mrb[65].mxu0 }
 0x22d   : > { %v6321_v29 = vadd.f32 %v6320_v24, %v6319_v19  ;;  %v6322_v28 = vpop.f32.mrb[66].mxu0  ;;  %v6395_v30 = vpop.f32.mrb[64].mxu1 }
 0x22e   : > { %v6323_v32 = vpop.f32.mrb[67].mxu0  ;;  %v6396_v34 = vpop.f32.mrb[65].mxu1 }
 0x22f   : > { %v2969_v20 = vadd.f32 %v6321_v29, %v7760_v38  ;;  %v6324_v40 = vadd.f32 %v6323_v32, %v6322_v28  ;;  %v6397_v35 = vadd.f32 %v6396_v34, %v6395_v30  ;;  %v6398_v36 = vpop.f32.mrb[66].mxu1 }
 0x230   : > { %v6399_v13 = vpop.f32.mrb[67].mxu1 }
 0x231   : > { %v2972_v23 = vadd.f32 %v6324_v40, %v7762_v41  ;;  %v6400_v42 = vadd.f32 %v6399_v13, %v6398_v36  ;;  %v7854_v37 = vadd.f32 %v6397_v35, %v2969_v20 }
 0x233   : > { %v6325_v43 = vpop.f32.mrb[68].mxu0  ;;  %v7856_v46 = vadd.f32 %v6400_v42, %v2972_v23 }
 0x234   : > { %v6326_v45 = vpop.f32.mrb[69].mxu0 }
 0x235   : > { %v6327_v49 = vadd.f32 %v6326_v45, %v6325_v43  ;;  %v6328_v50 = vpop.f32.mrb[70].mxu0  ;;  %v6401_v52 = vpop.f32.mrb[68].mxu1 }
 0x236   : > { %v6329_v53 = vpop.f32.mrb[71].mxu0  ;;  %v6402_v56 = vpop.f32.mrb[69].mxu1 }
 0x237   : > { %v2977_v38 = vadd.f32 %v6327_v49, %v7764_v31  ;;  %v6330_v54 = vadd.f32 %v6329_v53, %v6328_v50  ;;  %v6403_v59 = vadd.f32 %v6402_v56, %v6401_v52  ;;  %v6404_v60 = vpop.f32.mrb[70].mxu1 }
 0x238   : > { %v6405_v61 = vpop.f32.mrb[71].mxu1 }
 0x239   : > { %v2980_v41 = vadd.f32 %v6330_v54, %v7766_v58  ;;  %v6406_v55 = vadd.f32 %v6405_v61, %v6404_v60  ;;  %v7860_v57 = vadd.f32 %v6403_v59, %v2977_v38 }
 0x23b   : > { %v6331_v62 = vpop.f32.mrb[72].mxu0  ;;  %v7862_v3 = vadd.f32 %v6406_v55, %v2980_v41 }
 0x23c   : > { %v6332_v0 = vpop.f32.mrb[73].mxu0 }
 0x23d   : > { %v6333_v7 = vadd.f32 %v6332_v0, %v6331_v62  ;;  %v6334_v9 = vpop.f32.mrb[74].mxu0  ;;  %v6407_v14 = vpop.f32.mrb[72].mxu1 }
 0x23e   : > { %v6335_v15 = vpop.f32.mrb[75].mxu0  ;;  %v6408_v25 = vpop.f32.mrb[73].mxu1 }
 0x23f   : > { %v2985_v31 = vadd.f32 %v6333_v7, %v7768_v8  ;;  %v6336_v4 = vadd.f32 %v6335_v15, %v6334_v9  ;;  %v6409_v16 = vadd.f32 %v6408_v25, %v6407_v14  ;;  %v6410_v12 = vpop.f32.mrb[74].mxu1 }
 0x240   : > { %v6411_v1 = vpop.f32.mrb[75].mxu1 }
 0x241   : > { %v2988_v58 = vadd.f32 %v6336_v4, %v7770_v11  ;;  %v6412_v6 = vadd.f32 %v6411_v1, %v6410_v12  ;;  %v7866_v17 = vadd.f32 %v6409_v16, %v2985_v31 }
 0x243   : > { %v6337_v27 = vpop.f32.mrb[76].mxu0  ;;  %v7868_v24 = vadd.f32 %v6412_v6, %v2988_v58 }
 0x244   : > { %v6338_v19 = vpop.f32.mrb[77].mxu0 }
 0x245   : > { %v6339_v29 = vadd.f32 %v6338_v19, %v6337_v27  ;;  %v6340_v28 = vpop.f32.mrb[78].mxu0  ;;  %v6413_v30 = vpop.f32.mrb[76].mxu1 }
 0x246   : > { %v6341_v32 = vpop.f32.mrb[79].mxu0  ;;  %v6414_v40 = vpop.f32.mrb[77].mxu1 }
 0x247   : > { %v2993_v8 = vadd.f32 %v6339_v29, %v7778_v39  ;;  %v6342_v20 = vadd.f32 %v6341_v32, %v6340_v28  ;;  %v6415_v34 = vadd.f32 %v6414_v40, %v6413_v30  ;;  %v6416_v35 = vpop.f32.mrb[78].mxu1 }
 0x248   : > { %v6417_v36 = vpop.f32.mrb[79].mxu1 }
 0x249   : > { %v2996_v11 = vadd.f32 %v6342_v20, %v7788_v51  ;;  %v6418_v23 = vadd.f32 %v6417_v36, %v6416_v35  ;;  %v7872_v13 = vadd.f32 %v6415_v34, %v2993_v8 }
 0x24b   : > { %v6727_v42 = vpop.f32.mrb[80].mxu0  ;;  %v7875_v49 = vadd.f32 %v6418_v23, %v2996_v11 }
 0x24c   : > { %v3155_v43 = vadd.f32 %v6727_v42, %v7824_v2  ;;  %v3146_v45 = vpop.f32.mrb[81].mxu0 }
 0x24d   : > { %v3147_v50 = vadd.f32 %v3146_v45, %v7808_v33  ;;  %v6728_v52 = vpop.f32.mrb[82].mxu0 }
 0x24e   : > { %v3158_v39 = vadd.f32 %v6728_v52, %v7826_v5  ;;  %v3149_v53 = vpop.f32.mrb[83].mxu0  ;;  %v3227_v54 = vmax.f32 %v3155_v43, 0.0 }
 0x24f   : > { %v3150_v38 = vadd.f32 %v3149_v53, %v7818_v47  ;;  %v3225_v56 = vmax.f32 %v3147_v50, 0.0 }
 0x250   : > { %v3228_v51 = vmax.f32 %v3158_v39, 0.0 }
 0x251   : > { %v3226_v59 = vmax.f32 %v3150_v38, 0.0 }
 0x252   : > { %v3246_v60 = vpack.c.bf16 %v3228_v51, %v3227_v54 }
 0x253   : > { %v3245_v41 = vpack.c.bf16 %v3226_v59, %v3225_v56  ;;  %v6731_v61 = vpop.f32.mrb[84].mxu0 }
 0x254   : > { %v3266_v55 = vrot.slane %v3246_v60, 4  ;;  %v3171_v2 = vadd.f32 %v6731_v61, %v7836_v44  ;;  %v3162_v62 = vpop.f32.mrb[85].mxu0 }
 0x255   : > { %v3265_v0 = vrot.slane %v3245_v41, 4  ;;  %v3163_v33 = vadd.f32 %v3162_v62, %v7830_v21  ;;  %v6732_v7 = vpop.f32.mrb[86].mxu0 }
 0x256   : > { %3287 = vst [vmem:[#allocation3 + $0x18] ss:$-4 sps:$4 sm:$0xff] %v3266_v55   ;;  %v3174_v5 = vadd.f32 %v6732_v7, %v7838_v48  ;;  %v3165_v9 = vpop.f32.mrb[87].mxu0  ;;  %v3231_v14 = vmax.f32 %v3171_v2, 0.0 }
 0x257   : > { %3285 = vst [vmem:[#allocation3 + $0x8] ss:$-4 sps:$4 sm:$0xff] %v3265_v0   ;;  %v3166_v47 = vadd.f32 %v3165_v9, %v7832_v26  ;;  %v3229_v31 = vmax.f32 %v3163_v33, 0.0 }
 0x258   : > { %v3232_v15 = vmax.f32 %v3174_v5, 0.0 }
 0x259   : > { %v3230_v4 = vmax.f32 %v3166_v47, 0.0 }
 0x25a   : > { %v3248_v25 = vpack.c.bf16 %v3232_v15, %v3231_v14 }
 0x25b   : > { %v3247_v16 = vpack.c.bf16 %v3230_v4, %v3229_v31  ;;  %v6735_v12 = vpop.f32.mrb[88].mxu0 }
 0x25c   : > { %v3268_v44 = vrot.slane %v3248_v25, 4  ;;  %v3187_v58 = vadd.f32 %v6735_v12, %v7848_v18  ;;  %v3178_v1 = vpop.f32.mrb[89].mxu0 }
 0x25d   : > { %v3267_v21 = vrot.slane %v3247_v16, 4  ;;  %v3179_v6 = vadd.f32 %v3178_v1, %v7842_v63  ;;  %v6736_v27 = vpop.f32.mrb[90].mxu0 }
 0x25e   : > { %3291 = vst [vmem:[#allocation3 + $0x38] ss:$-4 sps:$4 sm:$0xff] %v3268_v44   ;;  %v3190_v48 = vadd.f32 %v6736_v27, %v7850_v10  ;;  %v3181_v19 = vpop.f32.mrb[91].mxu0  ;;  %v3235_v29 = vmax.f32 %v3187_v58, 0.0 }
 0x25f   : > { %3289 = vst [vmem:[#allocation3 + $0x28] ss:$-4 sps:$4 sm:$0xff] %v3267_v21   ;;  %v3182_v26 = vadd.f32 %v3181_v19, %v7844_v22  ;;  %v3233_v30 = vmax.f32 %v3179_v6, 0.0 }
 0x260   : > { %v3236_v28 = vmax.f32 %v3190_v48, 0.0 }
 0x261   : > { %v3234_v32 = vmax.f32 %v3182_v26, 0.0 }
 0x262   : > { %v3250_v8 = vpack.c.bf16 %v3236_v28, %v3235_v29 }
 0x263   : > { %v3249_v20 = vpack.c.bf16 %v3234_v32, %v3233_v30  ;;  %v6739_v40 = vpop.f32.mrb[92].mxu0 }
 0x264   : > { %v3270_v18 = vrot.slane %v3250_v8, 4  ;;  %v3203_v34 = vadd.f32 %v6739_v40, %v7860_v57  ;;  %v3194_v35 = vpop.f32.mrb[93].mxu0 }
 0x265   : > { %v3269_v63 = vrot.slane %v3249_v20, 4  ;;  %v3195_v11 = vadd.f32 %v3194_v35, %v7854_v37  ;;  %v6740_v36 = vpop.f32.mrb[94].mxu0 }
 0x266   : > { %3295 = vst [vmem:[#allocation3 + $0x58] ss:$-4 sps:$4 sm:$0xff] %v3270_v18   ;;  %v3206_v10 = vadd.f32 %v6740_v36, %v7862_v3  ;;  %v3197_v23 = vpop.f32.mrb[95].mxu0  ;;  %v3239_v42 = vmax.f32 %v3203_v34, 0.0 }
 0x267   : > { %3293 = vst [vmem:[#allocation3 + $0x48] ss:$-4 sps:$4 sm:$0xff] %v3269_v63   ;;  %v3198_v22 = vadd.f32 %v3197_v23, %v7856_v46  ;;  %v3237_v45 = vmax.f32 %v3195_v11, 0.0 }
 0x268   : > { %v3240_v43 = vmax.f32 %v3206_v10, 0.0 }
 0x269   : > { %v3238_v50 = vmax.f32 %v3198_v22, 0.0 }
 0x26a   : > { %v3252_v52 = vpack.c.bf16 %v3240_v43, %v3239_v42 }
 0x26b   : > { %v3251_v39 = vpack.c.bf16 %v3238_v50, %v3237_v45  ;;  %v6743_v53 = vpop.f32.mrb[96].mxu0 }
 0x26c   : > { %v3272_v57 = vrot.slane %v3252_v52, 4  ;;  %v3219_v38 = vadd.f32 %v6743_v53, %v7872_v13  ;;  %v3210_v54 = vpop.f32.mrb[97].mxu0 }
 0x26d   : > { %v3271_v37 = vrot.slane %v3251_v39, 4  ;;  %v3211_v51 = vadd.f32 %v3210_v54, %v7866_v17  ;;  %v6744_v56 = vpop.f32.mrb[98].mxu0  ;;  %v7275_v17 = vmov (!%p6030_p3), 0  }
 0x26e   : > { %3299 = vst [vmem:[#allocation3 + $0x78] ss:$-4 sps:$4 sm:$0xff] %v3272_v57   ;;  %v3222_v3 = vadd.f32 %v6744_v56, %v7875_v49  ;;  %v3213_v59 = vpop.f32.mrb[99].mxu0  ;;  %v3243_v60 = vmax.f32 %v3219_v38, 0.0  ;;  %3369 = vst [vmem:[#allocation3] sm:$0xff] (!%p6030_p3), %v7275_v17 }
 0x26f   : > { %3297 = vst [vmem:[#allocation3 + $0x68] ss:$-4 sps:$4 sm:$0xff] %v3271_v37   ;;  %v3214_v46 = vadd.f32 %v3213_v59, %v7868_v24  ;;  %v3241_v61 = vmax.f32 %v3211_v51, 0.0  ;;  %3370 = vst [vmem:[#allocation3 + $0x8] sm:$0xff] (!%p6030_p3), %v7275_v17 }
 0x270   : > { %v3244_v41 = vmax.f32 %v3222_v3, 0.0 }
 0x271   : > { %v3242_v55 = vmax.f32 %v3214_v46, 0.0  ;;  %3368 = sbr.rel (%p6030_p3) target bundleno = 632 (0x278), region = 56 }
 0x272   : > { %v3254_v2 = vpack.c.bf16 %v3244_v41, %v3243_v60 }
 0x273   : > { %v3253_v62 = vpack.c.bf16 %v3242_v55, %v3241_v61 }
 0x274   : > { %v3274_v0 = vrot.slane %v3254_v2, 4 }
 0x275   : > { %v3273_v13 = vrot.slane %v3253_v62, 4 }
 0x276   : > { %3303 = vst [vmem:[#allocation3 + $0x98] ss:$-4 sps:$4 sm:$0xff] %v3274_v0  }
 0x277   : > { %3301 = vst [vmem:[#allocation3 + $0x88] ss:$-4 sps:$4 sm:$0xff] %v3273_v13  }
 0x278 PF: > { %p6031_p13 = scmp.ne.s32.totalorder %s7249_s18, 1 }
 0x279   : > { %v7276_v24 = vmov (!%p6031_p13), 0  }
 0x27a   : > { %3374 = sbr.rel (%p6031_p13) target bundleno = 641 (0x281), region = 60  ;;  %3376 = vst [vmem:[#allocation3 + $0x90] sm:$0xff] (!%p6031_p13), %v7276_v24  ;;  %3377 = vst [vmem:[#allocation3 + $0x98] sm:$0xff] (!%p6031_p13), %v7276_v24 }
 0x281 PF: > { %v6981_v49 = vld [vmem:[#allocation10 + $0x40] sm:$0xff]   ;;  %v6985_v9 = vld [vmem:[#allocation10 + $0x48] sm:$0xff]   ;;  %v6989_v31 = vld [vmem:[#allocation10 + $0x50] sm:$0xff]   ;;  %s6114_s7 = sshll.u32 %s7249_s18, 4  ;;  %s6107_s5 = sshll.u32 %s7253_s19, 5 }
 0x282   : > { %v6982_v33 = vld [vmem:[#allocation10 + $0xc0] sm:$0xff]   ;;  %6437 = vmatprep.subr.bf16.mxu1 %v6981_v49  ;;  %v6986_v47 = vld [vmem:[#allocation10 + $0xc8] sm:$0xff]   ;;  %v6990_v4 = vld [vmem:[#allocation10 + $0xd0] sm:$0xff]   ;;  %s5815_s6 = sadd.s32 %s6114_s7, %s6107_s5  ;;  %s5818_s19 = sshll.u32 %s7623_s23, 4  ;;  %s8120_s19 = int_to_ptr.vmem [resolvable:$true] %s5818_s19 }
 0x283   : > { %v6983_v7 = vld [vmem:[#allocation10] sm:$0xff]   ;;  %6501 = vmatprep.subr.bf16.mxu0 %v6982_v33  ;;  %v6987_v14 = vld [vmem:[#allocation10 + $0x8] sm:$0xff]   ;;  %v6991_v25 = vld [vmem:[#allocation10 + $0x10] sm:$0xff]   ;;  %s6108_s18 = sshll.u32 %s5815_s6, 7  ;;  %s8130_s10 = scalar_lea.sflag [#allocation7], %s229_s20 }
 0x284   : > { %v6984_v5 = vld [vmem:[#allocation10 + $0x80] sm:$0xff]   ;;  %6438 = vmatpush3.bf16.msra.mxu1 %v6983_v7  ;;  %v6988_v15 = vld [vmem:[#allocation10 + $0x88] sm:$0xff]   ;;  %v6992_v16 = vld [vmem:[#allocation10 + $0x90] sm:$0xff]   ;;  %s8118_s15 = scalar_lea.hbm %s8194_s3, %s6108_s18  ;;  %s7139_s24 = scalar_lea.vmem %s8120_s19, 2048 }
 0x285   : > { %6502 = vmatpush3.bf16.msra.mxu0 %v6984_v5  ;;  %6439 = vmatprep.subr.bf16.mxu1 %v6985_v9  ;;  %v6993_v12 = vld [vmem:[#allocation10 + $0x58] sm:$0xff]   ;;  %v6997_v21 = vld [vmem:[#allocation10 + $0x60] sm:$0xff]   ;;  %v7001_v19 = vld [vmem:[#allocation10 + $0x68] sm:$0xff]   ;;  %p7140_p7 = scmp.ne.s32.totalorder %s8120_s19, %s7139_s24  ;;  %p8228_p9 = scmp.ne.s32.totalorder %s8210_s28, 0 }
 0x286   : > { %6503 = vmatprep.subr.bf16.mxu0 %v6986_v47  ;;  %v6994_v44 = vld [vmem:[#allocation10 + $0xd8] sm:$0xff]   ;;  %v6998_v6 = vld [vmem:[#allocation10 + $0xe0] sm:$0xff]   ;;  %v7002_v26 = vld [vmem:[#allocation10 + $0xe8] sm:$0xff]   ;;  %s7277_s30 = smov [#allocation11]  }
 0x287   : > { %v6995_v58 = vld [vmem:[#allocation10 + $0x18] sm:$0xff]   ;;  %v6999_v27 = vld [vmem:[#allocation10 + $0x20] sm:$0xff]   ;;  %v7003_v29 = vld [vmem:[#allocation10 + $0x28] sm:$0xff]   ;;  %p7141_p11 = pnand %p7140_p7, %p8228_p9  ;;  %s7143_s12 = sshll.u32 %s7277_s30, 4  ;;  %s7144_s12 = int_to_ptr.vmem [resolvable:$false] %s7143_s12 }
 0x288   : > { %6440 = vmatpush3.bf16.msra.mxu1 %v6987_v14  ;;  %v6996_v1 = vld [vmem:[#allocation10 + $0x98] sm:$0xff]   ;;  %v7000_v48 = vld [vmem:[#allocation10 + $0xa0] sm:$0xff]   ;;  %v7004_v28 = vld [vmem:[#allocation10 + $0xa8] sm:$0xff]   ;;  %s7145_s25 = scalar_lea.vmem %s7144_s12, 4096  ;;  %p7146_p8 = scmp.lt.s32.totalorder %s8120_s19, %s7144_s12 }
 0x289   : > { %6504 = vmatpush3.bf16.msra.mxu0 %v6988_v15  ;;  %6441 = vmatprep.subr.bf16.mxu1 %v6989_v31  ;;  %v7005_v30 = vld [vmem:[#allocation10 + $0x70] sm:$0xff]   ;;  %v7009_v40 = vld [vmem:[#allocation10 + $0x78] sm:$0xff]   ;;  %v3546_v63 = vld [vmem:[#allocation3] sm:$0xf0]  ;;  %p7142_p5 = pneg %p7141_p11  ;;  %p7147_p12 = scmp.lt.s32.totalorder %s7145_s25, %s7139_s24 }
 0x28a   : > { %6505 = vmatprep.subr.bf16.mxu0 %v6990_v4  ;;  %v7006_v32 = vld [vmem:[#allocation10 + $0xf0] sm:$0xff]   ;;  %v7010_v18 = vld [vmem:[#allocation10 + $0xf8] sm:$0xff]   ;;  %v3547_v11 = vld [vmem:[#allocation3 + $0x8] sm:$0xf]  ;;  %v3578_v10 = vrot.slane %v3546_v63, 4 }
 0x28b   : > { %v7007_v8 = vld [vmem:[#allocation10 + $0x30] sm:$0xff]   ;;  %v7011_v34 = vld [vmem:[#allocation10 + $0x38] sm:$0xff]   ;;  %v3579_v23 = vrot.slane %v3547_v11, 4  ;;  %v3378_v52 = vld [vmem:[#allocation3] sm:$0xf8]  ;;  %p7148_p2 = por %p7147_p12, %p7146_p8 }
 0x28c   : > { %6442 = vmatpush3.bf16.msra.mxu1 %v6991_v25  ;;  %v7008_v20 = vld [vmem:[#allocation10 + $0xb0] sm:$0xff]   ;;  %v7012_v35 = vld [vmem:[#allocation10 + $0xb8] sm:$0xff]   ;;  %v3379_v39 = vld [vmem:[#allocation3 + $0x8] sm:$0xf]  ;;  %v3395_v54 = vshrl.u32 %v3378_v52, 16  ;;  %v3398_v59 = vshll.u32 %v3378_v52, 16 }
 0x28d   : > { %6506 = vmatpush3.bf16.msra.mxu0 %v6992_v16  ;;  %6443 = vmatprep.subr.bf16.mxu1 %v6993_v12  ;;  %v3787_v36 = vld [vmem:[#allocation3 + $0x10] sm:$0xf8]  ;;  %v3788_v22 = vld [vmem:[#allocation3 + $0x18] sm:$0xf]  ;;  %v3580_v53 = vsel %vm711_vm7, %v3578_v10, %v3579_v23  ;;  %v3618_v37 = vld [vmem:[#allocation3] sm:$0xf0]  ;;  %p7149_p6 = pnand %p7148_p2, %p7142_p5 }
 0x28e   : > { %6507 = vmatprep.subr.bf16.mxu0 %v6994_v44  ;;  %v3804_v42 = vshrl.u32 %v3787_v36, 16  ;;  %v3807_v43 = vshll.u32 %v3787_v36, 16  ;;  %v3812_v45 = vshrl.u32 %v3788_v22, 16  ;;  %v3815_v50 = vshll.u32 %v3788_v22, 16  ;;  %v7013_v51 = vld [vmem:[#allocation10 + $0x140] sm:$0xff]   ;;  %5284 = vmatprep.mubr.bf16.mxu1 %v3580_v53  ;;  %v7017_v10 = vld [vmem:[#allocation10 + $0x150] sm:$0xff]  }
 0x28f   : > { %v3403_v46 = vshrl.u32 %v3379_v39, 16  ;;  %v3619_v60 = vld [vmem:[#allocation3 + $0x8] sm:$0x1f]  ;;  %v3397_v61 = vrot.slane %v3395_v54, 3  ;;  %v3406_v55 = vshll.u32 %v3379_v39, 16  ;;  %v3635_v2 = vshrl.u32 %v3618_v37, 16 }
 0x290   : > { %6444 = vmatpush3.bf16.msra.mxu1 %v6995_v58  ;;  %v3806_v57 = vrot.slane %v3804_v42, 3  ;;  %v3809_v38 = vrot.slane %v3807_v43, 4  ;;  %v3814_v56 = vrot.slane %v3812_v45, 3  ;;  %v3817_v3 = vrot.slane %v3815_v50, 4  ;;  %v3548_v14 = vld [vmem:[#allocation3 + $0x10] sm:$0xf0] }
 0x291   : > { %6508 = vmatpush3.bf16.msra.mxu0 %v6996_v1  ;;  %6445 = vmatprep.subr.bf16.mxu1 %v6997_v21  ;;  %v3400_v0 = vrot.slane %v3398_v59, 4  ;;  %v3405_v13 = vrot.slane %v3403_v46, 3  ;;  %v3638_v17 = vshll.u32 %v3618_v37, 16  ;;  %v3408_v24 = vrot.slane %v3406_v55, 4  ;;  %v7014_v25 = vld [vmem:[#allocation10 + $0x100] sm:$0xff]   ;;  %v7018_v53 = vld [vmem:[#allocation10 + $0x110] sm:$0xff]  }
 0x292   : > { %6509 = vmatprep.subr.bf16.mxu0 %v6998_v6  ;;  %v3810_v41 = vor.u32 %v3809_v38, %v3806_v57  ;;  %v3818_v62 = vor.u32 %v3817_v3, %v3814_v56  ;;  %v3637_v49 = vrot.slane %v3635_v2, 4  ;;  %v3643_v33 = vshrl.u32 %v3619_v60, 16  ;;  %v3549_v16 = vld [vmem:[#allocation3 + $0x18] sm:$0xf]  ;;  %v3789_v1 = vld [vmem:[#allocation3 + $0x20] sm:$0xf8] }
 0x293   : > { %v3646_v7 = vshll.u32 %v3619_v60, 16  ;;  %v3401_v9 = vor.u32 %v3400_v0, %v3397_v61  ;;  %v3640_v47 = vrot.slane %v3638_v17, 5  ;;  %v3409_v15 = vor.u32 %v3408_v24, %v3405_v13  ;;  %v3790_v21 = vld [vmem:[#allocation3 + $0x28] sm:$0xf]  ;;  %v3621_v36 = vld [vmem:[#allocation3 + $0x18] sm:$0x1f] }
 0x294   : > { %6446 = vmatpush3.bf16.msra.mxu1 %v6999_v27  ;;  %v3819_v5 = vsel %vm284_vm4, %v3810_v41, %v3818_v62  ;;  %v3645_v31 = vrot.slane %v3643_v33, 4  ;;  %v3581_v12 = vrot.slane %v3548_v14, 4  ;;  %v3582_v58 = vrot.slane %v3549_v16, 4  ;;  %v7015_v6 = vld [vmem:[#allocation10 + $0x148] sm:$0xff]   ;;  %v7021_v57 = vld [vmem:[#allocation10 + $0x1c0] sm:$0xff]   ;;  %v7019_v41 = vld [vmem:[#allocation10 + $0x158] sm:$0xff]  }
 0x295   : > { %6510 = vmatpush3.bf16.msra.mxu0 %v7000_v48  ;;  %6447 = vmatprep.subr.bf16.mxu1 %v7001_v19  ;;  %v3648_v4 = vrot.slane %v3646_v7, 5  ;;  %v3641_v44 = vor.u32 %v3640_v47, %v3637_v49  ;;  %v3410_v27 = vsel %vm284_vm4, %v3401_v9, %v3409_v15  ;;  %v3821_v19 = vshrl.u32 %v3789_v1, 16  ;;  %v7022_v56 = vld [vmem:[#allocation10 + $0x180] sm:$0xff]   ;;  %v3551_v0 = vld [vmem:[#allocation3 + $0x28] sm:$0xf]  ;;  %v7020_v7 = vld [vmem:[#allocation10 + $0x118] sm:$0xff]  }
 0x296   : > { %6511 = vmatprep.subr.bf16.mxu0 %v7002_v26  ;;  %5381 = vmatprep.mubr.bf16.mxu0 %v3819_v5  ;;  %v3824_v26 = vshll.u32 %v3789_v1, 16  ;;  %v3663_v60 = vshll.u32 %v3621_v36, 16  ;;  %v3550_v62 = vld [vmem:[#allocation3 + $0x20] sm:$0xf0]  ;;  %v3585_v49 = vrot.slane %v3551_v0, 4  ;;  %v7025_v1 = vld [vmem:[#allocation10 + $0x1c8] sm:$0xff]  }
 0x297   : > { %v3649_v48 = vor.u32 %v3648_v4, %v3645_v31  ;;  %v3584_v24 = vrot.slane %v3550_v62, 4  ;;  %v3791_v33 = vld [vmem:[#allocation3 + $0x30] sm:$0xf8]  ;;  %v3792_v9 = vld [vmem:[#allocation3 + $0x38] sm:$0xf]  ;;  %v7023_v31 = vld [vmem:[#allocation10 + $0x160] sm:$0xff]  }
 0x298   : > { %6448 = vmatpush3.bf16.msra.mxu1 %v7003_v29  ;;  %v3380_v29 = vld [vmem:[#allocation3 + $0x10] sm:$0xf8]  ;;  %v3826_v63 = vrot.slane %v3824_v26, 4  ;;  %v3665_v17 = vrot.slane %v3663_v60, 5  ;;  %v3838_v47 = vshrl.u32 %v3791_v33, 16  ;;  %v3841_v14 = vshll.u32 %v3791_v33, 16 }
 0x299   : > { %6512 = vmatpush3.bf16.msra.mxu0 %v7004_v28  ;;  %6449 = vmatprep.subr.bf16.mxu1 %v7005_v30  ;;  %v3381_v28 = vld [vmem:[#allocation3 + $0x18] sm:$0xf]  ;;  %v3583_v30 = vsel %vm711_vm7, %v3581_v12, %v3582_v58  ;;  %v3415_v11 = vshll.u32 %v3380_v29, 16  ;;  %v3382_v15 = vld [vmem:[#allocation3 + $0x20] sm:$0xf8]  ;;  %v3586_v16 = vsel %vm711_vm7, %v3584_v24, %v3585_v49  ;;  %v3846_v12 = vshrl.u32 %v3792_v9, 16 }
 0x29a   : > { %6513 = vmatprep.subr.bf16.mxu0 %v7006_v32  ;;  %v3829_v32 = vshrl.u32 %v3790_v21, 16  ;;  %v3420_v43 = vshrl.u32 %v3381_v28, 16  ;;  %v3423_v52 = vshll.u32 %v3381_v28, 16  ;;  %v3622_v58 = vld [vmem:[#allocation3 + $0x20] sm:$0xf0]  ;;  %v3432_v28 = vshll.u32 %v3382_v15, 16 }
 0x29b   : > { %v3417_v50 = vrot.slane %v3415_v11, 4  ;;  %v3669_v11 = vshrl.u32 %v3622_v58, 16  ;;  %v3624_v24 = vld [vmem:[#allocation3 + $0x30] sm:$0xf0] }
 0x29c   : > { %6450 = vmatpush3.bf16.msra.mxu1 %v7007_v8  ;;  %v3832_v8 = vshll.u32 %v3790_v21, 16  ;;  %v3831_v23 = vrot.slane %v3829_v32, 3  ;;  %v3422_v54 = vrot.slane %v3420_v43, 3  ;;  %v3425_v59 = vrot.slane %v3423_v52, 4  ;;  %v7026_v32 = vld [vmem:[#allocation10 + $0x188] sm:$0xff]  }
 0x29d   : > { %6514 = vmatpush3.bf16.msra.mxu0 %v7008_v20  ;;  %6451 = vmatprep.subr.bf16.mxu1 %v7009_v40  ;;  %v3412_v20 = vshrl.u32 %v3380_v29, 16  ;;  %v3620_v40 = vld [vmem:[#allocation3 + $0x10] sm:$0xf0]  ;;  %v3840_v21 = vrot.slane %v3838_v47, 3  ;;  %v3848_v29 = vrot.slane %v3846_v12, 3  ;;  %v7027_v43 = vld [vmem:[#allocation10 + $0x168] sm:$0xff]  }
 0x29e   : > { %6515 = vmatprep.subr.bf16.mxu0 %v7010_v18  ;;  %v7016_v18 = vld [vmem:[#allocation10 + $0x108] sm:$0xff]   ;;  %v3834_v22 = vrot.slane %v3832_v8, 4  ;;  %v3652_v39 = vshrl.u32 %v3620_v40, 16  ;;  %v3655_v37 = vshll.u32 %v3620_v40, 16  ;;  %v3426_v13 = vor.u32 %v3425_v59, %v3422_v54  ;;  %v7030_v47 = vld [vmem:[#allocation10 + $0x190] sm:$0xff]  }
 0x29f   : > { %v3414_v42 = vrot.slane %v3412_v20, 3 }
 0x2a0   : > { %6452 = vmatpush3.bf16.msra.mxu1 %v7011_v34  ;;  %v3650_v34 = vsel %vm782_vm8, %v3641_v44, %v3649_v48  ;;  %v3835_v38 = vor.u32 %v3834_v22, %v3831_v23  ;;  %v3654_v46 = vrot.slane %v3652_v39, 4  ;;  %v3657_v55 = vrot.slane %v3655_v37, 5  ;;  %v3383_v44 = vld [vmem:[#allocation3 + $0x28] sm:$0xf]  ;;  %v3552_v39 = vld [vmem:[#allocation3 + $0x30] sm:$0xf0] }
 0x2a1   : > { %6516 = vmatpush3.bf16.msra.mxu0 %v7012_v35  ;;  %6565 = vmatprep.subr.bf16.mxu1 %v7013_v51  ;;  %v3823_v35 = vrot.slane %v3821_v19, 3  ;;  %v3660_v51 = vshrl.u32 %v3621_v36, 16  ;;  %v3418_v3 = vor.u32 %v3417_v50, %v3414_v42  ;;  %v3429_v48 = vshrl.u32 %v3382_v15, 16  ;;  %v3623_v19 = vld [vmem:[#allocation3 + $0x28] sm:$0x1f] }
 0x2a2   : > { %6629 = vmatprep.subr.bf16.mxu0 %v7021_v57  ;;  %v3658_v5 = vor.u32 %v3657_v55, %v3654_v46  ;;  %v3672_v36 = vshll.u32 %v3622_v58, 16  ;;  %v3677_v22 = vshrl.u32 %v3623_v19, 16  ;;  %v3680_v42 = vshll.u32 %v3623_v19, 16  ;;  %v7028_v57 = vld [vmem:[#allocation10 + $0x128] sm:$0xff]   ;;  %v7029_v55 = vld [vmem:[#allocation10 + $0x1d0] sm:$0xff]  }
 0x2a3   : > { %5285 = vmatmul.mubr.bf16.vlgmr.msra.gmra.mrb[80].mxu1 %v3410_v27  ;;  %v3827_v45 = vor.u32 %v3826_v63, %v3823_v35  ;;  %v3662_v2 = vrot.slane %v3660_v51, 4  ;;  %v3427_v4 = vsel %vm284_vm4, %v3418_v3, %v3426_v13  ;;  %v3849_v27 = vshll.u32 %v3792_v9, 16  ;;  %v3794_v3 = vld [vmem:[#allocation3 + $0x48] sm:$0xf]  ;;  %v3625_v9 = vld [vmem:[#allocation3 + $0x38] sm:$0x1f] }
 0x2a4   : > { %6566 = vmatpush3.bf16.msra.mxu1 %v7014_v25  ;;  %5292 = vmatprep.mubr.bf16.mxu1 %v3583_v30  ;;  %v3437_v30 = vshrl.u32 %v3383_v44, 16  ;;  %v3431_v40 = vrot.slane %v3429_v48, 3  ;;  %v3434_v35 = vrot.slane %v3432_v28, 4  ;;  %v3671_v50 = vrot.slane %v3669_v11, 4  ;;  %v7032_v48 = vld [vmem:[#allocation10 + $0x198] sm:$0xff]   ;;  %v7035_v11 = vld [vmem:[#allocation10 + $0x1e0] sm:$0xff]  }
 0x2a5   : > { %5382 = vmatmul.mubr.bf16.vlgmr.msra.gmra.mrb[100].mxu0 %v3650_v34  ;;  %6567 = vmatprep.subr.bf16.mxu1 %v7015_v6  ;;  %v3836_v61 = vsel %vm284_vm4, %v3827_v45, %v3835_v38  ;;  %v3666_v25 = vor.u32 %v3665_v17, %v3662_v2  ;;  %v3843_v6 = vrot.slane %v3841_v14, 4  ;;  %v3851_v20 = vrot.slane %v3849_v27, 4  ;;  %v7024_v34 = vld [vmem:[#allocation10 + $0x120] sm:$0xff]   ;;  %v3385_v17 = vld [vmem:[#allocation3 + $0x38] sm:$0xf] }
 0x2a6   : > { %6630 = vmatpush3.bf16.msra.mxu0 %v7022_v56  ;;  %5389 = vmatprep.mubr.bf16.mxu0 %v3836_v61  ;;  %v3439_v63 = vrot.slane %v3437_v30, 3  ;;  %v3435_v45 = vor.u32 %v3434_v35, %v3431_v40  ;;  %v3674_v52 = vrot.slane %v3672_v36, 5  ;;  %v3679_v37 = vrot.slane %v3677_v22, 4  ;;  %v3793_v56 = vld [vmem:[#allocation3 + $0x40] sm:$0xf8]  ;;  %v7033_v30 = vld [vmem:[#allocation10 + $0x170] sm:$0xff]  }
 0x2a7   : > { %v3667_v26 = vsel %vm782_vm8, %v3658_v5, %v3666_v25  ;;  %6631 = vmatprep.subr.bf16.mxu0 %v7025_v1  ;;  %v3844_v8 = vor.u32 %v3843_v6, %v3840_v21  ;;  %v3682_v51 = vrot.slane %v3680_v42, 5  ;;  %v3587_v46 = vrot.slane %v3552_v39, 4  ;;  %v3384_v61 = vld [vmem:[#allocation3 + $0x30] sm:$0xf8]  ;;  %v7031_v25 = vld [vmem:[#allocation10 + $0x1d8] sm:$0xff]   ;;  %v7036_v22 = vld [vmem:[#allocation10 + $0x1a0] sm:$0xff]  }
 0x2a8   : > { %6568 = vmatpush3.bf16.msra.mxu1 %v7016_v18  ;;  %v3440_v18 = vshll.u32 %v3383_v44, 16  ;;  %v3675_v59 = vor.u32 %v3674_v52, %v3671_v50  ;;  %v3858_v0 = vshll.u32 %v3793_v56, 16  ;;  %v3863_v13 = vshrl.u32 %v3794_v3, 16  ;;  %v3795_v50 = vld [vmem:[#allocation3 + $0x50] sm:$0xf8]  ;;  %v7037_v52 = vld [vmem:[#allocation10 + $0x1e8] sm:$0xff]  }
 0x2a9   : > { %6569 = vmatprep.subr.bf16.mxu1 %v7017_v10  ;;  %v3852_v10 = vor.u32 %v3851_v20, %v3848_v29  ;;  %v3683_v62 = vor.u32 %v3682_v51, %v3679_v37  ;;  %v3446_v5 = vshrl.u32 %v3384_v61, 16  ;;  %v3454_v44 = vshrl.u32 %v3385_v17, 16  ;;  %v7038_v37 = vld [vmem:[#allocation10 + $0x1a8] sm:$0xff]  }
 0x2aa   : > { %6632 = vmatpush3.bf16.msra.mxu0 %v7026_v32  ;;  %v3442_v23 = vrot.slane %v3440_v18, 4  ;;  %v3860_v15 = vrot.slane %v3858_v0, 4  ;;  %v3457_v58 = vshll.u32 %v3385_v17, 16  ;;  %v3686_v6 = vshrl.u32 %v3624_v24, 16  ;;  %v7034_v18 = vld [vmem:[#allocation10 + $0x130] sm:$0xff]  }
 0x2ab   : > { %5293 = vmatmul.mubr.bf16.gmra.mrb[84].mxu1 %v3427_v4  ;;  %v3853_v38 = vsel %vm284_vm4, %v3844_v8, %v3852_v10  ;;  %6633 = vmatprep.subr.bf16.mxu0 %v7029_v55  ;;  %v3684_v14 = vsel %vm782_vm8, %v3675_v59, %v3683_v62  ;;  %v3449_v4 = vshll.u32 %v3384_v61, 16  ;;  %v3448_v12 = vrot.slane %v3446_v5, 3  ;;  %v3387_v59 = vld [vmem:[#allocation3 + $0x48] sm:$0xf]  ;;  %v3626_v55 = vld [vmem:[#allocation3 + $0x40] sm:$0xf0] }
 0x2ac   : > { %6570 = vmatpush3.bf16.msra.mxu1 %v7018_v53  ;;  %5300 = vmatprep.mubr.bf16.mxu1 %v3586_v16  ;;  %v3553_v53 = vld [vmem:[#allocation3 + $0x38] sm:$0xf]  ;;  %v3443_v54 = vor.u32 %v3442_v23, %v3439_v63  ;;  %v3689_v27 = vshll.u32 %v3624_v24, 16  ;;  %v3459_v29 = vrot.slane %v3457_v58, 4  ;;  %v3694_v28 = vshrl.u32 %v3625_v9, 16 }
 0x2ad   : > { %6571 = vmatprep.subr.bf16.mxu1 %v7019_v41  ;;  %5390 = vmatmul.mubr.bf16.gmra.mrb[104].mxu0 %v3667_v26  ;;  %v3588_v60 = vrot.slane %v3553_v53, 4  ;;  %v3855_v41 = vshrl.u32 %v3793_v56, 16  ;;  %v3451_v21 = vrot.slane %v3449_v4, 4  ;;  %v3456_v26 = vrot.slane %v3454_v44, 3  ;;  %v3554_v23 = vld [vmem:[#allocation3 + $0x40] sm:$0xf0] }
 0x2ae   : > { %5397 = vmatprep.mubr.bf16.mxu0 %v3853_v38  ;;  %v3444_v2 = vsel %vm284_vm4, %v3435_v45, %v3443_v54  ;;  %6634 = vmatpush3.bf16.msra.mxu0 %v7030_v47  ;;  %v3688_v8 = vrot.slane %v3686_v6, 4  ;;  %v3691_v20 = vrot.slane %v3689_v27, 5  ;;  %v3697_v40 = vshll.u32 %v3625_v9, 16  ;;  %v7039_v5 = vld [vmem:[#allocation10 + $0x178] sm:$0xff]  }
 0x2af   : > { %v3589_v49 = vsel %vm711_vm7, %v3587_v46, %v3588_v60  ;;  %v3857_v33 = vrot.slane %v3855_v41, 3  ;;  %6635 = vmatprep.subr.bf16.mxu0 %v7031_v25  ;;  %v3452_v32 = vor.u32 %v3451_v21, %v3448_v12  ;;  %v3460_v35 = vor.u32 %v3459_v29, %v3456_v26  ;;  %v3556_v29 = vld [vmem:[#allocation3 + $0x50] sm:$0xf0] }
 0x2b0   : > { %6572 = vmatpush3.bf16.msra.mxu1 %v7020_v7  ;;  %v3866_v7 = vshll.u32 %v3794_v3, 16  ;;  %v3696_v63 = vrot.slane %v3694_v28, 4  ;;  %v3692_v36 = vor.u32 %v3691_v20, %v3688_v8  ;;  %v3699_v10 = vrot.slane %v3697_v40, 5  ;;  %v3386_v3 = vld [vmem:[#allocation3 + $0x40] sm:$0xf8] }
 0x2b1   : > { %6573 = vmatprep.subr.bf16.mxu1 %v7023_v31  ;;  %v3865_v31 = vrot.slane %v3863_v13, 3  ;;  %v3861_v1 = vor.u32 %v3860_v15, %v3857_v33  ;;  %v3461_v42 = vsel %vm284_vm4, %v3452_v32, %v3460_v35  ;;  %v3590_v45 = vrot.slane %v3554_v23, 4  ;;  %v3557_v28 = vld [vmem:[#allocation3 + $0x58] sm:$0xf]  ;;  %v3797_v40 = vld [vmem:[#allocation3 + $0x60] sm:$0xf8] }
 0x2b2   : > { %v3868_v16 = vrot.slane %v3866_v7, 4  ;;  %6636 = vmatpush3.bf16.msra.mxu0 %v7032_v48  ;;  %v3700_v39 = vor.u32 %v3699_v10, %v3696_v63  ;;  %v3872_v38 = vshrl.u32 %v3795_v50, 16  ;;  %v3875_v54 = vshll.u32 %v3795_v50, 16  ;;  %v7041_v48 = vld [vmem:[#allocation10 + $0x1f0] sm:$0xff]   ;;  %v7043_v10 = vld [vmem:[#allocation10 + $0x1f8] sm:$0xff]  }
 0x2b3   : > { %5301 = vmatmul.mubr.bf16.gmra.mrb[88].mxu1 %v3444_v2  ;;  %6637 = vmatprep.subr.bf16.mxu0 %v7035_v11  ;;  %v3627_v2 = vld [vmem:[#allocation3 + $0x48] sm:$0x1f]  ;;  %v3463_v13 = vshrl.u32 %v3386_v3, 16  ;;  %v3466_v17 = vshll.u32 %v3386_v3, 16  ;;  %v3474_v33 = vshll.u32 %v3387_v59, 16  ;;  %v3703_v7 = vshrl.u32 %v3626_v55, 16 }
 0x2b4   : > { %6574 = vmatpush3.bf16.msra.mxu1 %v7024_v34  ;;  %5308 = vmatprep.mubr.bf16.mxu1 %v3589_v49  ;;  %v3869_v19 = vor.u32 %v3868_v16, %v3865_v31  ;;  %v3701_v46 = vsel %vm782_vm8, %v3692_v36, %v3700_v39  ;;  %v3874_v41 = vrot.slane %v3872_v38, 3  ;;  %v3877_v61 = vrot.slane %v3875_v54, 4  ;;  %v7040_v31 = vld [vmem:[#allocation10 + $0x138] sm:$0xff]   ;;  %v3388_v36 = vld [vmem:[#allocation3 + $0x50] sm:$0xf8]  ;;  %v7919_v54 = vld [vmem:[#allocation10 + $0x200] sm:$0xff]  }
 0x2b5   : > { %6575 = vmatprep.subr.bf16.mxu1 %v7027_v43  ;;  %5398 = vmatmul.mubr.bf16.gmra.mrb[108].mxu0 %v3684_v14  ;;  %v3555_v43 = vld [vmem:[#allocation3 + $0x48] sm:$0xf]  ;;  %v3471_v49 = vshrl.u32 %v3387_v59, 16  ;;  %v3465_v47 = vrot.slane %v3463_v13, 3  ;;  %v3468_v14 = vrot.slane %v3466_v17, 4  ;;  %v3706_v15 = vshll.u32 %v3626_v55, 16 }
 0x2b6   : > { %v3870_v34 = vsel %vm284_vm4, %v3861_v1, %v3869_v19  ;;  %v3591_v53 = vrot.slane %v3555_v43, 4  ;;  %6638 = vmatpush3.bf16.msra.mxu0 %v7036_v22  ;;  %v3878_v24 = vor.u32 %v3877_v61, %v3874_v41  ;;  %v3476_v25 = vrot.slane %v3474_v33, 4  ;;  %v7044_v50 = vld [vmem:[#allocation10 + $0x1b8] sm:$0xff]   ;;  %v3628_v38 = vld [vmem:[#allocation3 + $0x50] sm:$0xf0] }
 0x2b7   : > { %5405 = vmatprep.mubr.bf16.mxu0 %v3870_v34  ;;  %6639 = vmatprep.subr.bf16.mxu0 %v7037_v52  ;;  %v3473_v4 = vrot.slane %v3471_v49, 3  ;;  %v3705_v16 = vrot.slane %v3703_v7, 4  ;;  %v3711_v12 = vshrl.u32 %v3627_v2, 16  ;;  %v3469_v58 = vor.u32 %v3468_v14, %v3465_v47  ;;  %v3629_v59 = vld [vmem:[#allocation3 + $0x58] sm:$0x1f] }
 0x2b8   : > { %6576 = vmatpush3.bf16.msra.mxu1 %v7028_v57  ;;  %v3796_v57 = vld [vmem:[#allocation3 + $0x58] sm:$0xf]  ;;  %v3592_v60 = vsel %vm711_vm7, %v3590_v45, %v3591_v53  ;;  %v3708_v1 = vrot.slane %v3706_v15, 5  ;;  %v3714_v21 = vshll.u32 %v3627_v2, 16  ;;  %v3593_v8 = vrot.slane %v3556_v29, 4 }
 0x2b9   : > { %6577 = vmatprep.subr.bf16.mxu1 %v7033_v30  ;;  %v3880_v51 = vshrl.u32 %v3796_v57, 16  ;;  %v3883_v56 = vshll.u32 %v3796_v57, 16  ;;  %v3477_v6 = vor.u32 %v3476_v25, %v3473_v4  ;;  %v3713_v27 = vrot.slane %v3711_v12, 4  ;;  %v7042_v30 = vld [vmem:[#allocation10 + $0x1b0] sm:$0xff]   ;;  %v3558_v14 = vld [vmem:[#allocation3 + $0x60] sm:$0xf0] }
 0x2ba   : > { %6640 = vmatpush3.bf16.msra.mxu0 %v7038_v37  ;;  %v3709_v19 = vor.u32 %v3708_v1, %v3705_v16  ;;  %v3716_v26 = vrot.slane %v3714_v21, 5  ;;  %v3594_v20 = vrot.slane %v3557_v28, 4  ;;  %v3889_v35 = vshrl.u32 %v3797_v40, 16  ;;  %v3559_v4 = vld [vmem:[#allocation3 + $0x68] sm:$0xf] }
 0x2bb   : > { %5309 = vmatmul.mubr.bf16.gmra.mrb[92].mxu1 %v3461_v42  ;;  %v3882_v62 = vrot.slane %v3880_v51, 3  ;;  %v3885_v0 = vrot.slane %v3883_v56, 4  ;;  %v3478_v32 = vsel %vm284_vm4, %v3469_v58, %v3477_v6  ;;  %6641 = vmatprep.subr.bf16.mxu0 %v7041_v48  ;;  %v3892_v63 = vshll.u32 %v3797_v40, 16  ;;  %v3389_v42 = vld [vmem:[#allocation3 + $0x58] sm:$0xf] }
 0x2bc   : > { %6578 = vmatpush3.bf16.msra.mxu1 %v7034_v18  ;;  %5316 = vmatprep.mubr.bf16.mxu1 %v3592_v60  ;;  %v3798_v18 = vld [vmem:[#allocation3 + $0x68] sm:$0xf]  ;;  %v3717_v34 = vor.u32 %v3716_v26, %v3713_v27  ;;  %v3595_v23 = vsel %vm711_vm7, %v3593_v8, %v3594_v20  ;;  %v3480_v43 = vshrl.u32 %v3388_v36, 16  ;;  %v3483_v45 = vshll.u32 %v3388_v36, 16  ;;  %v3799_v16 = vld [vmem:[#allocation3 + $0x70] sm:$0xf8] }
 0x2bd   : > { %5406 = vmatmul.mubr.bf16.gmra.mrb[112].mxu0 %v3701_v46  ;;  %v3886_v9 = vor.u32 %v3885_v0, %v3882_v62  ;;  %6579 = vmatprep.subr.bf16.mxu1 %v7039_v5  ;;  %v3897_v11 = vshrl.u32 %v3798_v18, 16  ;;  %v3900_v22 = vshll.u32 %v3798_v18, 16  ;;  %v3891_v39 = vrot.slane %v3889_v35, 3  ;;  %v3390_v29 = vld [vmem:[#allocation3 + $0x60] sm:$0xf8] }
 0x2be   : > { %6642 = vmatpush3.bf16.msra.mxu0 %v7042_v30  ;;  %v3718_v52 = vsel %vm782_vm8, %v3709_v19, %v3717_v34  ;;  %v3894_v53 = vrot.slane %v3892_v63, 4  ;;  %v3482_v51 = vrot.slane %v3480_v43, 3  ;;  %v3485_v56 = vrot.slane %v3483_v45, 4  ;;  %v3391_v28 = vld [vmem:[#allocation3 + $0x68] sm:$0xf] }
 0x2bf   : > { %v3887_v44 = vsel %vm284_vm4, %v3878_v24, %v3886_v9  ;;  %v3899_v57 = vrot.slane %v3897_v11, 3  ;;  %6643 = vmatprep.subr.bf16.mxu0 %v7043_v10  ;;  %v3902_v37 = vrot.slane %v3900_v22, 4  ;;  %v3488_v3 = vshrl.u32 %v3389_v42, 16  ;;  %v3630_v40 = vld [vmem:[#allocation3 + $0x60] sm:$0xf0] }
 0x2c0   : > { %6580 = vmatpush3.bf16.msra.mxu1 %v7040_v31  ;;  %5413 = vmatprep.mubr.bf16.mxu0 %v3887_v44  ;;  %v3895_v46 = vor.u32 %v3894_v53, %v3891_v39  ;;  %v3491_v60 = vshll.u32 %v3389_v42, 16  ;;  %v3720_v41 = vshrl.u32 %v3628_v38, 16  ;;  %v3723_v61 = vshll.u32 %v3628_v38, 16  ;;  %v3800_v44 = vld [vmem:[#allocation3 + $0x78] sm:$0xf] }
 0x2c1   : > { %6745 = vmatprep.subr.bf16.mxu1 %v7919_v54  ;;  %v3903_v55 = vor.u32 %v3902_v37, %v3899_v57  ;;  %v3486_v2 = vor.u32 %v3485_v56, %v3482_v51  ;;  %v3490_v62 = vrot.slane %v3488_v3, 3  ;;  %v3728_v0 = vshrl.u32 %v3629_v59, 16  ;;  %v3631_v63 = vld [vmem:[#allocation3 + $0x68] sm:$0x1f] }
 0x2c2   : > { %6644 = vmatpush3.bf16.msra.mxu0 %v7044_v50  ;;  %v3493_v13 = vrot.slane %v3491_v60, 4  ;;  %v3722_v17 = vrot.slane %v3720_v41, 4  ;;  %v3725_v24 = vrot.slane %v3723_v61, 5  ;;  %v3731_v49 = vshll.u32 %v3629_v59, 16  ;;  %v3560_v59 = vld [vmem:[#allocation3 + $0x70] sm:$0xf0] }
 0x2c3   : > { %5317 = vmatmul.mubr.bf16.gmra.mrb[96].mxu1 %v3478_v32  ;;  %v3904_v33 = vsel %vm284_vm4, %v3895_v46, %v3903_v55  ;;  %v3730_v7 = vrot.slane %v3728_v0, 4  ;;  %v3596_v25 = vrot.slane %v3558_v14, 4  ;;  %v3597_v12 = vrot.slane %v3559_v4, 4  ;;  %v3561_v60 = vld [vmem:[#allocation3 + $0x78] sm:$0xf] }
 0x2c4   : > { %5324 = vmatprep.mubr.bf16.mxu1 %v3595_v23  ;;  %v3494_v5 = vor.u32 %v3493_v13, %v3490_v62  ;;  %v3726_v9 = vor.u32 %v3725_v24, %v3722_v17  ;;  %v3733_v47 = vrot.slane %v3731_v49, 5  ;;  %v3906_v58 = vshrl.u32 %v3799_v16, 16  ;;  %v3801_v61 = vld [vmem:[#allocation3 + $0x80] sm:$0xf8]  ;;  %v3632_v4 = vld [vmem:[#allocation3 + $0x70] sm:$0xf0] }
 0x2c5   : > { %5414 = vmatmul.mubr.bf16.gmra.mrb[116].mxu0 %v3718_v52  ;;  %v3909_v1 = vshll.u32 %v3799_v16, 16  ;;  %v3914_v6 = vshrl.u32 %v3800_v44, 16  ;;  %v3917_v27 = vshll.u32 %v3800_v44, 16  ;;  %v3598_v48 = vsel %vm711_vm7, %v3596_v25, %v3597_v12  ;;  %v3633_v44 = vld [vmem:[#allocation3 + $0x78] sm:$0x1f] }
 0x2c6   : > { %5421 = vmatprep.mubr.bf16.mxu0 %v3904_v33  ;;  %v3495_v15 = vsel %vm284_vm4, %v3486_v2, %v3494_v5  ;;  %v3734_v31 = vor.u32 %v3733_v47, %v3730_v7  ;;  %v3908_v19 = vrot.slane %v3906_v58, 3  ;;  %v3497_v8 = vshrl.u32 %v3390_v29, 16  ;;  %v3802_v2 = vld [vmem:[#allocation3 + $0x88] sm:$0xf]  ;;  %v3392_v5 = vld [vmem:[#allocation3 + $0x70] sm:$0xf8] }
 0x2c7   : > { %v3911_v26 = vrot.slane %v3909_v1, 4  ;;  %v3916_v30 = vrot.slane %v3914_v6, 3  ;;  %v3919_v32 = vrot.slane %v3917_v27, 4  ;;  %v3500_v20 = vshll.u32 %v3390_v29, 16 }
 0x2c8   : > { %v3735_v21 = vsel %vm782_vm8, %v3726_v9, %v3734_v31  ;;  %v3505_v34 = vshrl.u32 %v3391_v28, 16  ;;  %v3508_v35 = vshll.u32 %v3391_v28, 16  ;;  %v3737_v11 = vshrl.u32 %v3630_v40, 16  ;;  %v3393_v9 = vld [vmem:[#allocation3 + $0x78] sm:$0xf] }
 0x2c9   : > { %v3912_v18 = vor.u32 %v3911_v26, %v3908_v19  ;;  %v3920_v36 = vor.u32 %v3919_v32, %v3916_v30  ;;  %v3499_v10 = vrot.slane %v3497_v8, 3  ;;  %v3502_v23 = vrot.slane %v3500_v20, 4 }
 0x2ca   : > { %v3740_v22 = vshll.u32 %v3630_v40, 16  ;;  %v3507_v42 = vrot.slane %v3505_v34, 3  ;;  %v3510_v43 = vrot.slane %v3508_v35, 4  ;;  %v3739_v45 = vrot.slane %v3737_v11, 4 }
 0x2cb   : > { %5325 = vmatmul.mubr.bf16.gmra.mrb[100].mxu1 %v3495_v15  ;;  %v3745_v50 = vshrl.u32 %v3631_v63, 16  ;;  %v3921_v52 = vsel %vm284_vm4, %v3912_v18, %v3920_v36  ;;  %v3503_v39 = vor.u32 %v3502_v23, %v3499_v10  ;;  %v3748_v57 = vshll.u32 %v3631_v63, 16  ;;  %v4027_v63 = vld [vmem:[#allocation3 + $0x10] sm:$0xf0]  ;;  %v4028_v36 = vld [vmem:[#allocation3 + $0x18] sm:$0x1f] }
 0x2cc   : > { %5332 = vmatprep.mubr.bf16.mxu1 %v3598_v48  ;;  %v3742_v53 = vrot.slane %v3740_v22, 5  ;;  %v3511_v38 = vor.u32 %v3510_v43, %v3507_v42  ;;  %v3599_v41 = vrot.slane %v3560_v59, 4  ;;  %v3600_v55 = vrot.slane %v3561_v60, 4  ;;  %v3955_v43 = vld [vmem:[#allocation3 + $0x10] sm:$0xf0] }
 0x2cd   : > { %5422 = vmatmul.mubr.bf16.gmra.mrb[120].mxu0 %v3735_v21  ;;  %v3747_v37 = vrot.slane %v3745_v50, 4  ;;  %v3750_v56 = vrot.slane %v3748_v57, 5  ;;  %v3923_v62 = vshrl.u32 %v3801_v61, 16  ;;  %v3926_v0 = vshll.u32 %v3801_v61, 16  ;;  %v4196_v61 = vld [vmem:[#allocation3 + $0x20] sm:$0xf8] }
 0x2ce   : > { %5429 = vmatprep.mubr.bf16.mxu0 %v3921_v52  ;;  %v3743_v51 = vor.u32 %v3742_v53, %v3739_v45  ;;  %v3512_v3 = vsel %vm284_vm4, %v3503_v39, %v3511_v38  ;;  %v3931_v17 = vshrl.u32 %v3802_v2, 16  ;;  %v3934_v24 = vshll.u32 %v3802_v2, 16  ;;  %v3956_v39 = vld [vmem:[#allocation3 + $0x18] sm:$0xf]  ;;  %v7046_v2 = vld [vmem:[#allocation10 + $0x208] sm:$0xff]  }
 0x2cf   : > { %v3751_v46 = vor.u32 %v3750_v56, %v3747_v37  ;;  %v3601_v49 = vsel %vm711_vm7, %v3599_v41, %v3600_v55  ;;  %v3925_v33 = vrot.slane %v3923_v62, 3  ;;  %v3928_v7 = vrot.slane %v3926_v0, 4  ;;  %v4364_v56 = vld [vmem:[#allocation3 + $0x20] sm:$0xf0]  ;;  %v4197_v55 = vld [vmem:[#allocation3 + $0x28] sm:$0xf] }
 0x2d0   : > { %v3933_v47 = vrot.slane %v3931_v17, 3  ;;  %v3936_v14 = vrot.slane %v3934_v24, 4  ;;  %v3514_v15 = vshrl.u32 %v3392_v5, 16  ;;  %v3517_v31 = vshll.u32 %v3392_v5, 16  ;;  %v4029_v24 = vld [vmem:[#allocation3 + $0x20] sm:$0xf0] }
 0x2d1   : > { %v3752_v13 = vsel %vm782_vm8, %v3743_v51, %v3751_v46  ;;  %v3929_v25 = vor.u32 %v3928_v7, %v3925_v33  ;;  %v3522_v16 = vshrl.u32 %v3393_v9, 16  ;;  %v3525_v12 = vshll.u32 %v3393_v9, 16  ;;  %v4030_v7 = vld [vmem:[#allocation3 + $0x28] sm:$0x1f] }
 0x2d2   : > { %v3754_v58 = vshrl.u32 %v3632_v4, 16  ;;  %v3937_v1 = vor.u32 %v3936_v14, %v3933_v47  ;;  %v3516_v21 = vrot.slane %v3514_v15, 3  ;;  %v3519_v6 = vrot.slane %v3517_v31, 4  ;;  %v3957_v47 = vld [vmem:[#allocation3 + $0x20] sm:$0xf0] }
 0x2d3   : > { %5333 = vmatmul.mubr.bf16.gmra.mrb[104].mxu1 %v3512_v3  ;;  %v3757_v27 = vshll.u32 %v3632_v4, 16  ;;  %v3524_v48 = vrot.slane %v3522_v16, 3  ;;  %v3527_v19 = vrot.slane %v3525_v12, 4  ;;  %v3762_v29 = vshrl.u32 %v3633_v44, 16  ;;  %v4365_v3 = vld [vmem:[#allocation3 + $0x28] sm:$0xf] }
 0x2d4   : > { %5340 = vmatprep.mubr.bf16.mxu1 %v3601_v49  ;;  %v3756_v26 = vrot.slane %v3754_v58, 4  ;;  %v3938_v28 = vsel %vm284_vm4, %v3929_v25, %v3937_v1  ;;  %v3520_v30 = vor.u32 %v3519_v6, %v3516_v21  ;;  %v3765_v8 = vshll.u32 %v3633_v44, 16  ;;  %v3958_v25 = vld [vmem:[#allocation3 + $0x28] sm:$0xf] }
 0x2d5   : > { %5430 = vmatmul.mubr.bf16.gmra.mrb[124].mxu0 %v3752_v13  ;;  %v3759_v32 = vrot.slane %v3757_v27, 5  ;;  %v3528_v20 = vor.u32 %v3527_v19, %v3524_v48  ;;  %v3764_v40 = vrot.slane %v3762_v29, 4  ;;  %v4044_v10 = vshrl.u32 %v4027_v63, 16  ;;  %v4366_v48 = vld [vmem:[#allocation3 + $0x30] sm:$0xf0] }
 0x2d6   : > { %5437 = vmatprep.mubr.bf16.mxu0 %v3938_v28  ;;  %v3767_v34 = vrot.slane %v3765_v8, 5  ;;  %v4047_v23 = vshll.u32 %v4027_v63, 16  ;;  %v4052_v22 = vshrl.u32 %v4028_v36, 16  ;;  %v4055_v42 = vshll.u32 %v4028_v36, 16  ;;  %v4367_v28 = vld [vmem:[#allocation3 + $0x38] sm:$0xf] }
 0x2d7   : > { %v3760_v18 = vor.u32 %v3759_v32, %v3756_v26  ;;  %v3529_v35 = vsel %vm284_vm4, %v3520_v30, %v3528_v20  ;;  %v4046_v50 = vrot.slane %v4044_v10, 4  ;;  %v3987_v53 = vrot.slane %v3955_v43, 4  ;;  %v7047_v32 = vld [vmem:[#allocation10 + $0x210] sm:$0xff]  }
 0x2d8   : > { %v3768_v11 = vor.u32 %v3767_v34, %v3764_v40  ;;  %v4049_v52 = vrot.slane %v4047_v23, 5  ;;  %v4054_v57 = vrot.slane %v4052_v22, 4  ;;  %v4057_v38 = vrot.slane %v4055_v42, 5  ;;  %v4199_v34 = vld [vmem:[#allocation3 + $0x38] sm:$0xf] }
 0x2d9   : > { %v3988_v37 = vrot.slane %v3956_v39, 4  ;;  %v4396_v60 = vrot.slane %v4364_v56, 4  ;;  %v4397_v41 = vrot.slane %v4365_v3, 4  ;;  %v4213_v62 = vshrl.u32 %v4196_v61, 16  ;;  %v4031_v36 = vld [vmem:[#allocation3 + $0x30] sm:$0xf0] }
 0x2da   : > { %v3769_v45 = vsel %vm782_vm8, %v3760_v18, %v3768_v11  ;;  %v4050_v51 = vor.u32 %v4049_v52, %v4046_v50  ;;  %v4058_v59 = vor.u32 %v4057_v38, %v4054_v57  ;;  %v4216_v0 = vshll.u32 %v4196_v61, 16  ;;  %v4198_v18 = vld [vmem:[#allocation3 + $0x30] sm:$0xf8]  ;;  %v4032_v22 = vld [vmem:[#allocation3 + $0x38] sm:$0x1f] }
 0x2db   : > { %5341 = vmatmul.mubr.bf16.gmra.mrb[108].mxu1 %v3529_v35  ;;  %v3989_v46 = vsel %vm711_vm7, %v3987_v53, %v3988_v37  ;;  %v4221_v13 = vshrl.u32 %v4197_v55, 16  ;;  %v4224_v17 = vshll.u32 %v4197_v55, 16  ;;  %v4398_v33 = vsel %vm711_vm7, %v4396_v60, %v4397_v41  ;;  %v3959_v53 = vld [vmem:[#allocation3 + $0x30] sm:$0xf0]  ;;  %v7048_v57 = vld [vmem:[#allocation10 + $0x218] sm:$0xff]  }
 0x2dc   : > { %v4059_v49 = vsel %vm782_vm8, %v4050_v51, %v4058_v59  ;;  %v4061_v5 = vshrl.u32 %v4029_v24, 16  ;;  %v4064_v9 = vshll.u32 %v4029_v24, 16  ;;  %v4215_v14 = vrot.slane %v4213_v62, 3  ;;  %v3960_v3 = vld [vmem:[#allocation3 + $0x38] sm:$0xf]  ;;  %v7049_v62 = vld [vmem:[#allocation10 + $0x220] sm:$0xff]  }
 0x2dd   : > { %5438 = vmatmul.mubr.bf16.gmra.mrb[128].mxu0 %v3769_v45  ;;  %5478 = vmatprep.mubr.bf16.mxu1 %v4059_v49  ;;  %v4218_v15 = vrot.slane %v4216_v0, 4  ;;  %v4223_v31 = vrot.slane %v4221_v13, 3  ;;  %v4226_v4 = vrot.slane %v4224_v17, 4  ;;  %v4069_v44 = vshrl.u32 %v4030_v7, 16  ;;  %v4369_v24 = vld [vmem:[#allocation3 + $0x48] sm:$0xf] }
 0x2de   : > { %5575 = vmatprep.mubr.bf16.mxu0 %v4398_v33  ;;  %v4063_v16 = vrot.slane %v4061_v5, 4  ;;  %v4066_v12 = vrot.slane %v4064_v9, 5  ;;  %v4072_v58 = vshll.u32 %v4030_v7, 16  ;;  %v3990_v6 = vrot.slane %v3957_v47, 4  ;;  %v4200_v33 = vld [vmem:[#allocation3 + $0x40] sm:$0xf8] }
 0x2df   : > { %v4219_v1 = vor.u32 %v4218_v15, %v4215_v14  ;;  %v4227_v21 = vor.u32 %v4226_v4, %v4223_v31  ;;  %v3991_v27 = vrot.slane %v3958_v25, 4  ;;  %v4071_v26 = vrot.slane %v4069_v44, 4  ;;  %v4201_v9 = vld [vmem:[#allocation3 + $0x48] sm:$0xf]  ;;  %v4033_v25 = vld [vmem:[#allocation3 + $0x40] sm:$0xf0] }
 0x2e0   : > { %v4067_v19 = vor.u32 %v4066_v12, %v4063_v16  ;;  %v4074_v29 = vrot.slane %v4072_v58, 5  ;;  %v4399_v30 = vrot.slane %v4366_v48, 4  ;;  %v4400_v40 = vrot.slane %v4367_v28, 4  ;;  %v4034_v16 = vld [vmem:[#allocation3 + $0x48] sm:$0x1f] }
 0x2e1   : > { %v4228_v8 = vsel %vm284_vm4, %v4219_v1, %v4227_v21  ;;  %v3992_v20 = vsel %vm711_vm7, %v3990_v6, %v3991_v27  ;;  %v4230_v35 = vshrl.u32 %v4198_v18, 16  ;;  %v4233_v63 = vshll.u32 %v4198_v18, 16  ;;  %v3961_v21 = vld [vmem:[#allocation3 + $0x40] sm:$0xf0] }
 0x2e2   : > { %v4238_v11 = vshrl.u32 %v4199_v34, 16  ;;  %v4401_v10 = vsel %vm711_vm7, %v4399_v30, %v4400_v40  ;;  %v4241_v23 = vshll.u32 %v4199_v34, 16  ;;  %v4078_v42 = vshrl.u32 %v4031_v36, 16 }
 0x2e3   : > { %5479 = vmatmul.mubr.bf16.vlgmr.msra.gmra.mrb[112].mxu1 %v3989_v46  ;;  %v4081_v43 = vshll.u32 %v4031_v36, 16  ;;  %v4232_v50 = vrot.slane %v4230_v35, 3  ;;  %v4235_v52 = vrot.slane %v4233_v63, 4  ;;  %v4086_v56 = vshrl.u32 %v4032_v22, 16  ;;  %v4370_v63 = vld [vmem:[#allocation3 + $0x50] sm:$0xf0] }
 0x2e4   : > { %6746 = vmatpush3.bf16.msra.mxu1 %v7919_v54  ;;  %v4075_v54 = vor.u32 %v4074_v29, %v4071_v26  ;;  %v4240_v39 = vrot.slane %v4238_v11, 3  ;;  %v4243_v38 = vrot.slane %v4241_v23, 4  ;;  %v4080_v37 = vrot.slane %v4078_v42, 4  ;;  %v3962_v26 = vld [vmem:[#allocation3 + $0x48] sm:$0xf] }
 0x2e5   : > { %6747 = vmatprep.subr.bf16.mxu1 %v7046_v2  ;;  %5576 = vmatmul.mubr.bf16.vlgmr.msra.gmra.mrb[132].mxu0 %v4228_v8  ;;  %v4083_v51 = vrot.slane %v4081_v43, 5  ;;  %v4236_v59 = vor.u32 %v4235_v52, %v4232_v50  ;;  %v4089_v46 = vshll.u32 %v4032_v22, 16  ;;  %v3993_v60 = vrot.slane %v3959_v53, 4  ;;  %v7050_v29 = vld [vmem:[#allocation10 + $0x228] sm:$0xff]   ;;  %v4371_v11 = vld [vmem:[#allocation3 + $0x58] sm:$0xf] }
 0x2e6   : > { %v4076_v45 = vsel %vm782_vm8, %v4067_v19, %v4075_v54  ;;  %5583 = vmatprep.mubr.bf16.mxu0 %v4401_v10  ;;  %v3994_v41 = vrot.slane %v3960_v3, 4  ;;  %v4244_v61 = vor.u32 %v4243_v38, %v4240_v39  ;;  %v4088_v55 = vrot.slane %v4086_v56, 4  ;;  %v4202_v42 = vld [vmem:[#allocation3 + $0x50] sm:$0xf8]  ;;  %v4203_v43 = vld [vmem:[#allocation3 + $0x58] sm:$0xf] }
 0x2e7   : > { %5486 = vmatprep.mubr.bf16.mxu1 %v4076_v45  ;;  %v4084_v0 = vor.u32 %v4083_v51, %v4080_v37  ;;  %v4091_v13 = vrot.slane %v4089_v46, 5  ;;  %v4403_v5 = vrot.slane %v4369_v24, 4  ;;  %v4247_v47 = vshrl.u32 %v4200_v33, 16  ;;  %v4035_v53 = vld [vmem:[#allocation3 + $0x50] sm:$0xf0] }
 0x2e8   : > { %6748 = vmatpush3.bf16.msra.mxu1 %v7046_v2  ;;  %v4368_v2 = vld [vmem:[#allocation3 + $0x40] sm:$0xf0]  ;;  %v3995_v17 = vsel %vm711_vm7, %v3993_v60, %v3994_v41  ;;  %v4245_v7 = vsel %vm284_vm4, %v4236_v59, %v4244_v61  ;;  %v4250_v14 = vshll.u32 %v4200_v33, 16  ;;  %v4255_v31 = vshrl.u32 %v4201_v9, 16  ;;  %v4036_v51 = vld [vmem:[#allocation3 + $0x58] sm:$0x1f] }
 0x2e9   : > { %6749 = vmatprep.subr.bf16.mxu1 %v7047_v32  ;;  %v4402_v49 = vrot.slane %v4368_v2, 4  ;;  %v4092_v15 = vor.u32 %v4091_v13, %v4088_v55  ;;  %v4258_v4 = vshll.u32 %v4201_v9, 16  ;;  %v4249_v44 = vrot.slane %v4247_v47, 3  ;;  %v7052_v59 = vld [vmem:[#allocation10 + $0x238] sm:$0xff]   ;;  %v3963_v55 = vld [vmem:[#allocation3 + $0x50] sm:$0xf0] }
 0x2ea   : > { %v4252_v58 = vrot.slane %v4250_v14, 4  ;;  %v4095_v1 = vshrl.u32 %v4033_v25, 16  ;;  %v4257_v27 = vrot.slane %v4255_v31, 3  ;;  %v4098_v19 = vshll.u32 %v4033_v25, 16  ;;  %v3964_v2 = vld [vmem:[#allocation3 + $0x58] sm:$0xf] }
 0x2eb   : > { %5487 = vmatmul.mubr.bf16.gmra.mrb[116].mxu1 %v3992_v20  ;;  %v4404_v12 = vsel %vm711_vm7, %v4402_v49, %v4403_v5  ;;  %v4093_v6 = vsel %vm782_vm8, %v4084_v0, %v4092_v15  ;;  %v4260_v48 = vrot.slane %v4258_v4, 4  ;;  %v4106_v8 = vshll.u32 %v4034_v16, 16  ;;  %v4372_v14 = vld [vmem:[#allocation3 + $0x60] sm:$0xf0]  ;;  %v4373_v15 = vld [vmem:[#allocation3 + $0x68] sm:$0xf] }
 0x2ec   : > { %6750 = vmatpush3.bf16.msra.mxu1 %v7047_v32  ;;  %5494 = vmatprep.mubr.bf16.mxu1 %v4093_v6  ;;  %v4253_v28 = vor.u32 %v4252_v58, %v4249_v44  ;;  %v4097_v30 = vrot.slane %v4095_v1, 4  ;;  %v4103_v32 = vshrl.u32 %v4034_v16, 16  ;;  %v4100_v40 = vrot.slane %v4098_v19, 5  ;;  %v4205_v1 = vld [vmem:[#allocation3 + $0x68] sm:$0xf] }
 0x2ed   : > { %6751 = vmatprep.subr.bf16.mxu1 %v7048_v57  ;;  %5584 = vmatmul.mubr.bf16.gmra.mrb[136].mxu0 %v4245_v7  ;;  %v4261_v20 = vor.u32 %v4260_v48, %v4257_v27  ;;  %v3996_v18 = vrot.slane %v3961_v21, 4  ;;  %v3997_v34 = vrot.slane %v3962_v26, 4  ;;  %v4108_v35 = vrot.slane %v4106_v8, 5  ;;  %v4037_v27 = vld [vmem:[#allocation3 + $0x60] sm:$0xf0] }
 0x2ee   : > { %5591 = vmatprep.mubr.bf16.mxu0 %v4404_v12  ;;  %v4105_v54 = vrot.slane %v4103_v32, 4  ;;  %v4101_v10 = vor.u32 %v4100_v40, %v4097_v30  ;;  %v4405_v22 = vrot.slane %v4370_v63, 4  ;;  %v4406_v50 = vrot.slane %v4371_v11, 4  ;;  %v4204_v12 = vld [vmem:[#allocation3 + $0x60] sm:$0xf8] }
 0x2ef   : > { %v4262_v36 = vsel %vm284_vm4, %v4253_v28, %v4261_v20  ;;  %v3998_v23 = vsel %vm711_vm7, %v3996_v18, %v3997_v34  ;;  %v4264_v52 = vshrl.u32 %v4202_v42, 16  ;;  %v4267_v39 = vshll.u32 %v4202_v42, 16  ;;  %v4038_v28 = vld [vmem:[#allocation3 + $0x68] sm:$0x1f]  ;;  %v3965_v30 = vld [vmem:[#allocation3 + $0x60] sm:$0xf0] }
 0x2f0   : > { %6752 = vmatpush3.bf16.msra.mxu1 %v7048_v57  ;;  %v4109_v45 = vor.u32 %v4108_v35, %v4105_v54  ;;  %v7051_v57 = vld [vmem:[#allocation10 + $0x230] sm:$0xff]   ;;  %v4272_v38 = vshrl.u32 %v4203_v43, 16  ;;  %v4275_v37 = vshll.u32 %v4203_v43, 16  ;;  %v4112_v56 = vshrl.u32 %v4035_v53, 16  ;;  %v3966_v18 = vld [vmem:[#allocation3 + $0x68] sm:$0xf] }
 0x2f1   : > { %6753 = vmatprep.subr.bf16.mxu1 %v7049_v62  ;;  %v4115_v3 = vshll.u32 %v4035_v53, 16  ;;  %v4407_v60 = vsel %vm711_vm7, %v4405_v22, %v4406_v50  ;;  %v4266_v41 = vrot.slane %v4264_v52, 3  ;;  %v4269_v61 = vrot.slane %v4267_v39, 4  ;;  %v4374_v50 = vld [vmem:[#allocation3 + $0x70] sm:$0xf0] }
 0x2f2   : > { %v4110_v46 = vsel %vm782_vm8, %v4101_v10, %v4109_v45  ;;  %v4277_v0 = vrot.slane %v4275_v37, 4  ;;  %v4114_v13 = vrot.slane %v4112_v56, 4  ;;  %v4120_v49 = vshrl.u32 %v4036_v51, 16  ;;  %v4375_v53 = vld [vmem:[#allocation3 + $0x78] sm:$0xf] }
 0x2f3   : > { %5495 = vmatmul.mubr.bf16.gmra.mrb[120].mxu1 %v3995_v17  ;;  %v4117_v17 = vrot.slane %v4115_v3, 5  ;;  %v4270_v24 = vor.u32 %v4269_v61, %v4266_v41  ;;  %v4123_v33 = vshll.u32 %v4036_v51, 16  ;;  %v3999_v7 = vrot.slane %v3963_v55, 4  ;;  %v4207_v3 = vld [vmem:[#allocation3 + $0x78] sm:$0xf] }
 0x2f4   : > { %6754 = vmatpush3.bf16.msra.mxu1 %v7049_v62  ;;  %5502 = vmatprep.mubr.bf16.mxu1 %v4110_v46  ;;  %v4274_v62 = vrot.slane %v4272_v38, 3  ;;  %v4000_v47 = vrot.slane %v3964_v2, 4  ;;  %v4122_v31 = vrot.slane %v4120_v49, 4  ;;  %v4408_v25 = vrot.slane %v4372_v14, 4  ;;  %v4206_v38 = vld [vmem:[#allocation3 + $0x70] sm:$0xf8] }
 0x2f5   : > { %6755 = vmatprep.subr.bf16.mxu1 %v7050_v29  ;;  %5592 = vmatmul.mubr.bf16.gmra.mrb[140].mxu0 %v4262_v36  ;;  %v4118_v9 = vor.u32 %v4117_v17, %v4114_v13  ;;  %v4125_v4 = vrot.slane %v4123_v33, 5  ;;  %v4409_v16 = vrot.slane %v4373_v15, 4  ;;  %v4281_v21 = vshrl.u32 %v4204_v12, 16  ;;  %v4039_v46 = vld [vmem:[#allocation3 + $0x70] sm:$0xf0] }
 0x2f6   : > { %5599 = vmatprep.mubr.bf16.mxu0 %v4407_v60  ;;  %v4278_v5 = vor.u32 %v4277_v0, %v4274_v62  ;;  %v4001_v58 = vsel %vm711_vm7, %v3999_v7, %v4000_v47  ;;  %v4284_v6 = vshll.u32 %v4204_v12, 16  ;;  %v4289_v26 = vshrl.u32 %v4205_v1, 16  ;;  %v4040_v2 = vld [vmem:[#allocation3 + $0x78] sm:$0x1f] }
 0x2f7   : > { %v4126_v48 = vor.u32 %v4125_v4, %v4122_v31  ;;  %v4410_v19 = vsel %vm711_vm7, %v4408_v25, %v4409_v16  ;;  %v4283_v32 = vrot.slane %v4281_v21, 3  ;;  %v4129_v20 = vshrl.u32 %v4037_v27, 16 }
 0x2f8   : > { %6756 = vmatpush3.bf16.msra.mxu1 %v7050_v29  ;;  %v4279_v44 = vsel %vm284_vm4, %v4270_v24, %v4278_v5  ;;  %v4292_v29 = vshll.u32 %v4205_v1, 16  ;;  %v4286_v8 = vrot.slane %v4284_v6, 4  ;;  %v4132_v40 = vshll.u32 %v4037_v27, 16  ;;  %v3967_v24 = vld [vmem:[#allocation3 + $0x70] sm:$0xf0] }
 0x2f9   : > { %6757 = vmatprep.subr.bf16.mxu1 %v7051_v57  ;;  %v4127_v34 = vsel %vm782_vm8, %v4118_v9, %v4126_v48  ;;  %v4291_v54 = vrot.slane %v4289_v26, 3  ;;  %v4137_v63 = vshrl.u32 %v4038_v28, 16  ;;  %v4131_v36 = vrot.slane %v4129_v20, 4  ;;  %v3968_v9 = vld [vmem:[#allocation3 + $0x78] sm:$0xf] }
 0x2fa   : > { %v4294_v35 = vrot.slane %v4292_v29, 4  ;;  %v4287_v11 = vor.u32 %v4286_v8, %v4283_v32  ;;  %v4134_v10 = vrot.slane %v4132_v40, 5  ;;  %v4002_v43 = vrot.slane %v3965_v30, 4  ;;  %v4377_v6 = vld [vmem:[#allocation3 + $0x88] sm:$0xf] }
 0x2fb   : > { %5503 = vmatmul.mubr.bf16.gmra.mrb[124].mxu1 %v3998_v23  ;;  %v4140_v23 = vshll.u32 %v4038_v28, 16  ;;  %v4139_v42 = vrot.slane %v4137_v63, 4  ;;  %v4003_v45 = vrot.slane %v3966_v18, 4  ;;  %v4412_v56 = vrot.slane %v4375_v53, 4  ;;  %v4208_v29 = vld [vmem:[#allocation3 + $0x80] sm:$0xf8] }
 0x2fc   : > { %6758 = vmatpush3.bf16.msra.mxu1 %v7051_v57  ;;  %5510 = vmatprep.mubr.bf16.mxu1 %v4127_v34  ;;  %v4295_v22 = vor.u32 %v4294_v35, %v4291_v54  ;;  %v4135_v52 = vor.u32 %v4134_v10, %v4131_v36  ;;  %v4411_v57 = vrot.slane %v4374_v50, 4  ;;  %v4301_v41 = vshll.u32 %v4206_v38, 16  ;;  %v4209_v28 = vld [vmem:[#allocation3 + $0x88] sm:$0xf]  ;;  %v4041_v40 = vld [vmem:[#allocation3 + $0x80] sm:$0xf0] }
 0x2fd   : > { %6759 = vmatprep.subr.bf16.mxu1 %v7052_v59  ;;  %5600 = vmatmul.mubr.bf16.gmra.mrb[144].mxu0 %v4279_v44  ;;  %v4142_v39 = vrot.slane %v4140_v23, 5  ;;  %v4004_v51 = vsel %vm711_vm7, %v4002_v43, %v4003_v45  ;;  %v4306_v61 = vshrl.u32 %v4207_v3, 16  ;;  %v4309_v55 = vshll.u32 %v4207_v3, 16  ;;  %v4376_v44 = vld [vmem:[#allocation3 + $0x80] sm:$0xf0] }
 0x2fe   : > { %5607 = vmatprep.mubr.bf16.mxu0 %v4410_v19  ;;  %v4296_v37 = vsel %vm284_vm4, %v4287_v11, %v4295_v22  ;;  %v4413_v62 = vsel %vm711_vm7, %v4411_v57, %v4412_v56  ;;  %v4146_v13 = vshrl.u32 %v4039_v46, 16  ;;  %v4149_v17 = vshll.u32 %v4039_v46, 16  ;;  %v4042_v54 = vld [vmem:[#allocation3 + $0x88] sm:$0x1f]  ;;  %v3969_v22 = vld [vmem:[#allocation3 + $0x80] sm:$0xf0] }
 0x2ff   : > { %v4143_v60 = vor.u32 %v4142_v39, %v4139_v42  ;;  %v4303_v33 = vrot.slane %v4301_v41, 4  ;;  %v4308_v7 = vrot.slane %v4306_v61, 3  ;;  %v4311_v5 = vrot.slane %v4309_v55, 4  ;;  %v4378_v56 = vld [vmem:[#allocation3 + $0x90] sm:$0xf0] }
 0x300   : > { %6760 = vmatpush3.bf16.msra.mxu1 %v7052_v59  ;;  %v4298_v59 = vshrl.u32 %v4206_v38, 16  ;;  %v4148_v47 = vrot.slane %v4146_v13, 4  ;;  %v4151_v14 = vrot.slane %v4149_v17, 5  ;;  %v4154_v15 = vshrl.u32 %v4040_v2, 16  ;;  %v4210_v61 = vld [vmem:[#allocation3 + $0x90] sm:$0xf8] }
 0x301   : > { %v4144_v49 = vsel %vm782_vm8, %v4135_v52, %v4143_v60  ;;  %v4157_v31 = vshll.u32 %v4040_v2, 16  ;;  %v4312_v25 = vor.u32 %v4311_v5, %v4308_v7  ;;  %v4005_v16 = vrot.slane %v3967_v24, 4  ;;  %v3970_v52 = vld [vmem:[#allocation3 + $0x88] sm:$0xf]  ;;  %v4379_v60 = vld [vmem:[#allocation3 + $0x98] sm:$0xf] }
 0x302   : > { %v4300_v0 = vrot.slane %v4298_v59, 3  ;;  %v4006_v12 = vrot.slane %v3968_v9, 4  ;;  %v4156_v1 = vrot.slane %v4154_v15, 4  ;;  %v4414_v27 = vrot.slane %v4376_v44, 4  ;;  %v4437_v7 = vld [vmem:[#allocation3 + $0x28] sm:$0x1f] }
 0x303   : > { %5511 = vmatmul.mubr.bf16.gmra.mrb[128].mxu1 %v4001_v58  ;;  %v4152_v58 = vor.u32 %v4151_v14, %v4148_v47  ;;  %v4159_v21 = vrot.slane %v4157_v31, 5  ;;  %v4415_v26 = vrot.slane %v4377_v6, 4  ;;  %v4315_v32 = vshrl.u32 %v4208_v29, 16  ;;  %v4438_v15 = vld [vmem:[#allocation3 + $0x30] sm:$0xf0] }
 0x304   : > { %5518 = vmatprep.mubr.bf16.mxu1 %v4144_v49  ;;  %v4304_v4 = vor.u32 %v4303_v33, %v4300_v0  ;;  %v4007_v19 = vsel %vm711_vm7, %v4005_v16, %v4006_v12  ;;  %v4318_v8 = vshll.u32 %v4208_v29, 16  ;;  %v4323_v20 = vshrl.u32 %v4209_v28, 16  ;;  %v4436_v33 = vld [vmem:[#allocation3 + $0x20] sm:$0xf0]  ;;  %v4439_v12 = vld [vmem:[#allocation3 + $0x38] sm:$0x1f] }
 0x305   : > { %5608 = vmatmul.mubr.bf16.gmra.mrb[148].mxu0 %v4296_v37  ;;  %v4160_v30 = vor.u32 %v4159_v21, %v4156_v1  ;;  %v4416_v18 = vsel %vm711_vm7, %v4414_v27, %v4415_v26  ;;  %v4326_v34 = vshll.u32 %v4209_v28, 16  ;;  %v4163_v35 = vshrl.u32 %v4041_v40, 16  ;;  %v4440_v26 = vld [vmem:[#allocation3 + $0x40] sm:$0xf0] }
 0x306   : > { %5615 = vmatprep.mubr.bf16.mxu0 %v4413_v62  ;;  %v4313_v48 = vsel %vm284_vm4, %v4304_v4, %v4312_v25  ;;  %v4166_v63 = vshll.u32 %v4041_v40, 16  ;;  %v4317_v36 = vrot.slane %v4315_v32, 3  ;;  %v4320_v10 = vrot.slane %v4318_v8, 4  ;;  %v4211_v62 = vld [vmem:[#allocation3 + $0x98] sm:$0xf] }
 0x307   : > { %v4161_v11 = vsel %vm782_vm8, %v4152_v58, %v4160_v30  ;;  %v4325_v23 = vrot.slane %v4323_v20, 3  ;;  %v4328_v42 = vrot.slane %v4326_v34, 4  ;;  %v4165_v43 = vrot.slane %v4163_v35, 4  ;;  %v4441_v8 = vld [vmem:[#allocation3 + $0x48] sm:$0x1f] }
 0x308   : > { %v4168_v45 = vrot.slane %v4166_v63, 5  ;;  %v4171_v50 = vshrl.u32 %v4042_v54, 16  ;;  %v4321_v39 = vor.u32 %v4320_v10, %v4317_v36  ;;  %v4174_v53 = vshll.u32 %v4042_v54, 16  ;;  %v4442_v54 = vld [vmem:[#allocation3 + $0x50] sm:$0xf0] }
 0x309   : > { %v4008_v57 = vrot.slane %v3969_v22, 4  ;;  %v4009_v38 = vrot.slane %v3970_v52, 4  ;;  %v4329_v37 = vor.u32 %v4328_v42, %v4325_v23  ;;  %v4417_v41 = vrot.slane %v4378_v56, 4  ;;  %v4445_v56 = vld [vmem:[#allocation3 + $0x68] sm:$0x1f] }
 0x30a   : > { %v4169_v3 = vor.u32 %v4168_v45, %v4165_v43  ;;  %v4176_v59 = vrot.slane %v4174_v53, 5  ;;  %v4418_v2 = vrot.slane %v4379_v60, 4  ;;  %v4332_v0 = vshrl.u32 %v4210_v61, 16  ;;  %v4443_v43 = vld [vmem:[#allocation3 + $0x58] sm:$0x1f] }
 0x30b   : > { %5519 = vmatmul.mubr.bf16.gmra.mrb[132].mxu1 %v4004_v51  ;;  %v4173_v51 = vrot.slane %v4171_v50, 4  ;;  %v4010_v46 = vsel %vm711_vm7, %v4008_v57, %v4009_v38  ;;  %v4330_v55 = vsel %vm284_vm4, %v4321_v39, %v4329_v37  ;;  %v4335_v13 = vshll.u32 %v4210_v61, 16  ;;  %v4444_v53 = vld [vmem:[#allocation3 + $0x60] sm:$0xf0] }
 0x30c   : > { %5526 = vmatprep.mubr.bf16.mxu1 %v4161_v11  ;;  %v4340_v24 = vshrl.u32 %v4211_v62, 16  ;;  %v4343_v49 = vshll.u32 %v4211_v62, 16  ;;  %v4419_v5 = vsel %vm711_vm7, %v4417_v41, %v4418_v2  ;;  %v4334_v9 = vrot.slane %v4332_v0, 3  ;;  %v4446_v62 = vld [vmem:[#allocation3 + $0x70] sm:$0xf0] }
 0x30d   : > { %5616 = vmatmul.mubr.bf16.gmra.mrb[152].mxu0 %v4313_v48  ;;  %v4177_v17 = vor.u32 %v4176_v59, %v4173_v51  ;;  %v4337_v47 = vrot.slane %v4335_v13, 4  ;;  %v4453_v14 = vshrl.u32 %v4436_v33, 16  ;;  %v4456_v16 = vshll.u32 %v4436_v33, 16 }
 0x30e   : > { %5623 = vmatprep.mubr.bf16.mxu0 %v4416_v18  ;;  %v4342_v4 = vrot.slane %v4340_v24, 3  ;;  %v4345_v25 = vrot.slane %v4343_v49, 4  ;;  %v4461_v1 = vshrl.u32 %v4437_v7, 16  ;;  %v4464_v21 = vshll.u32 %v4437_v7, 16  ;;  %v4447_v49 = vld [vmem:[#allocation3 + $0x78] sm:$0x1f] }
 0x30f   : > { %v4178_v31 = vsel %vm782_vm8, %v4169_v3, %v4177_v17  ;;  %v4338_v44 = vor.u32 %v4337_v47, %v4334_v9  ;;  %v4455_v58 = vrot.slane %v4453_v14, 4  ;;  %v4458_v27 = vrot.slane %v4456_v16, 5  ;;  %v4448_v47 = vld [vmem:[#allocation3 + $0x80] sm:$0xf0] }
 0x310   : > { %v4346_v6 = vor.u32 %v4345_v25, %v4342_v4  ;;  %v4470_v48 = vshrl.u32 %v4438_v15, 16  ;;  %v4463_v29 = vrot.slane %v4461_v1, 4  ;;  %v4466_v28 = vrot.slane %v4464_v21, 5 }
 0x311   : > { %v4478_v30 = vshrl.u32 %v4439_v12, 16  ;;  %v4481_v32 = vshll.u32 %v4439_v12, 16  ;;  %v4459_v40 = vor.u32 %v4458_v27, %v4455_v58  ;;  %v4487_v36 = vshrl.u32 %v4440_v26, 16  ;;  %v4449_v58 = vld [vmem:[#allocation3 + $0x88] sm:$0x1f] }
 0x312   : > { %v4347_v20 = vsel %vm284_vm4, %v4338_v44, %v4346_v6  ;;  %v4472_v18 = vrot.slane %v4470_v48, 4  ;;  %v4467_v35 = vor.u32 %v4466_v28, %v4463_v29  ;;  %v4490_v23 = vshll.u32 %v4440_v26, 16  ;;  %v4450_v48 = vld [vmem:[#allocation3 + $0x90] sm:$0xf0] }
 0x313   : > { %5527 = vmatmul.mubr.bf16.gmra.mrb[136].mxu1 %v4007_v19  ;;  %v4473_v19 = vshll.u32 %v4438_v15, 16  ;;  %v4480_v63 = vrot.slane %v4478_v30, 4  ;;  %v4483_v11 = vrot.slane %v4481_v32, 5  ;;  %v4495_v22 = vshrl.u32 %v4441_v8, 16 }
 0x314   : > { %5534 = vmatprep.mubr.bf16.mxu1 %v4178_v31  ;;  %v4498_v42 = vshll.u32 %v4441_v8, 16  ;;  %v4468_v45 = vsel %vm782_vm8, %v4459_v40, %v4467_v35  ;;  %v4489_v52 = vrot.slane %v4487_v36, 4  ;;  %v4504_v39 = vshrl.u32 %v4442_v54, 16  ;;  %v4451_v40 = vld [vmem:[#allocation3 + $0x98] sm:$0x1f] }
 0x315   : > { %5624 = vmatmul.mubr.bf16.gmra.mrb[156].mxu0 %v4330_v55  ;;  %v4475_v34 = vrot.slane %v4473_v19, 5  ;;  %v4484_v50 = vor.u32 %v4483_v11, %v4480_v63  ;;  %v4492_v57 = vrot.slane %v4490_v23, 5  ;;  %v4497_v38 = vrot.slane %v4495_v22, 4 }
 0x316   : > { %5631 = vmatprep.mubr.bf16.mxu0 %v4419_v5  ;;  %v4500_v37 = vrot.slane %v4498_v42, 5  ;;  %v4507_v51 = vshll.u32 %v4442_v54, 16  ;;  %v4506_v59 = vrot.slane %v4504_v39, 4  ;;  %v4515_v60 = vshll.u32 %v4443_v43, 16 }
 0x317   : > { %v4476_v10 = vor.u32 %v4475_v34, %v4472_v18  ;;  %v4493_v41 = vor.u32 %v4492_v57, %v4489_v52  ;;  %v4521_v2 = vshrl.u32 %v4444_v53, 16  ;;  %v4524_v17 = vshll.u32 %v4444_v53, 16 }
 0x318   : > { %v4501_v61 = vor.u32 %v4500_v37, %v4497_v38  ;;  %v4509_v55 = vrot.slane %v4507_v51, 5  ;;  %v4517_v13 = vrot.slane %v4515_v60, 5  ;;  %v4529_v24 = vshrl.u32 %v4445_v56, 16 }
 0x319   : > { %v4485_v3 = vsel %vm782_vm8, %v4476_v10, %v4484_v50  ;;  %v4523_v5 = vrot.slane %v4521_v2, 4  ;;  %v4532_v9 = vshll.u32 %v4445_v56, 16  ;;  %v4526_v15 = vrot.slane %v4524_v17, 5 }
 0x31a   : > { %v4502_v33 = vsel %vm782_vm8, %v4493_v41, %v4501_v61  ;;  %v4510_v7 = vor.u32 %v4509_v55, %v4506_v59  ;;  %v4531_v31 = vrot.slane %v4529_v24, 4  ;;  %v4538_v4 = vshrl.u32 %v4446_v62, 16 }
 0x31b   : > { %5535 = vmatmul.mubr.bf16.gmra.mrb[140].mxu1 %v4010_v46  ;;  %v4512_v46 = vshrl.u32 %v4443_v43, 16  ;;  %v4534_v25 = vrot.slane %v4532_v9, 5  ;;  %v4541_v16 = vshll.u32 %v4446_v62, 16  ;;  %v4546_v12 = vshrl.u32 %v4447_v49, 16 }
 0x31c   : > { %6761 = vmatprep.mubr.bf16.mxu1 %v4468_v45  ;;  %v4549_v44 = vshll.u32 %v4447_v49, 16  ;;  %v4527_v21 = vor.u32 %v4526_v15, %v4523_v5  ;;  %v4540_v6 = vrot.slane %v4538_v4, 4  ;;  %v4555_v27 = vshrl.u32 %v4448_v47, 16 }
 0x31d   : > { %5632 = vmatmul.mubr.bf16.gmra.mrb[160].mxu0 %v4347_v20  ;;  %v4514_v0 = vrot.slane %v4512_v46, 4  ;;  %v4535_v19 = vor.u32 %v4534_v25, %v4531_v31  ;;  %v4543_v26 = vrot.slane %v4541_v16, 5  ;;  %v4548_v29 = vrot.slane %v4546_v12, 4 }
 0x31e   : > { %v4551_v28 = vrot.slane %v4549_v44, 5  ;;  %v4557_v30 = vrot.slane %v4555_v27, 4  ;;  %v4558_v32 = vshll.u32 %v4448_v47, 16  ;;  %v4563_v8 = vshrl.u32 %v4449_v58, 16 }
 0x31f   : > { %v4518_v14 = vor.u32 %v4517_v13, %v4514_v0  ;;  %v4566_v20 = vshll.u32 %v4449_v58, 16  ;;  %v4536_v18 = vsel %vm782_vm8, %v4527_v21, %v4535_v19  ;;  %v4544_v34 = vor.u32 %v4543_v26, %v4540_v6 }
 0x320   : > { %v4552_v54 = vor.u32 %v4551_v28, %v4548_v29  ;;  %v4572_v35 = vshrl.u32 %v4450_v48, 16  ;;  %v4560_v63 = vrot.slane %v4558_v32, 5  ;;  %v4565_v11 = vrot.slane %v4563_v8, 4 }
 0x321   : > { %v4519_v1 = vsel %vm782_vm8, %v4510_v7, %v4518_v14  ;;  %v4568_v36 = vrot.slane %v4566_v20, 5  ;;  %v4575_v10 = vshll.u32 %v4450_v48, 16  ;;  %v4580_v42 = vshrl.u32 %v4451_v40, 16 }
 0x322   : > { %v4553_v23 = vsel %vm782_vm8, %v4544_v34, %v4552_v54  ;;  %v4574_v22 = vrot.slane %v4572_v35, 4  ;;  %v4583_v43 = vshll.u32 %v4451_v40, 16  ;;  %v4561_v45 = vor.u32 %v4560_v63, %v4557_v30 }
 0x323   : > { %6762 = vmatmul.mubr.bf16.vlgmr.msra.gmra.mrb[144].mxu1 %v4485_v3  ;;  %v4569_v50 = vor.u32 %v4568_v36, %v4565_v11  ;;  %v4577_v52 = vrot.slane %v4575_v10, 5  ;;  %v4582_v39 = vrot.slane %v4580_v42, 4 }
 0x324   : > { %6765 = vmatprep.mubr.bf16.mxu1 %v4502_v33  ;;  %v4585_v53 = vrot.slane %v4583_v43, 5 }
 0x325   : > { %v4570_v57 = vsel %vm782_vm8, %v4561_v45, %v4569_v50  ;;  %v4578_v38 = vor.u32 %v4577_v52, %v4574_v22 }
 0x326   : > { %v4586_v37 = vor.u32 %v4585_v53, %v4582_v39 }
 0x328   : > { %v4587_v51 = vsel %vm782_vm8, %v4578_v38, %v4586_v37 }
 0x32b   : > { %6766 = vmatmul.mubr.bf16.gmra.mrb[148].mxu1 %v4519_v1 }
 0x32c   : > { %6769 = vmatprep.mubr.bf16.mxu1 %v4536_v18 }
 0x333   : > { %6770 = vmatmul.mubr.bf16.gmra.mrb[152].mxu1 %v4553_v23 }
 0x334   : > { %6773 = vmatprep.mubr.bf16.mxu1 %v4570_v57 }
 0x33b   : > { %6774 = vmatmul.mubr.bf16.gmra.mrb[156].mxu1 %v4587_v51 }
 0x376   : > { %v6453_v56 = vpop.f32.mrb[80].mxu1 }
 0x377   : > { %v6454_v3 = vpop.f32.mrb[81].mxu1 }
 0x378   : > { %v6517_v59 = vpop.f32.mrb[100].mxu0  ;;  %v6455_v46 = vadd.f32 %v6454_v3, %v6453_v56  ;;  %v6456_v60 = vpop.f32.mrb[82].mxu1 }
 0x379   : > { %v6518_v41 = vpop.f32.mrb[101].mxu0  ;;  %v6457_v61 = vpop.f32.mrb[83].mxu1 }
 0x37a   : > { %v6519_v55 = vadd.f32 %v6518_v41, %v6517_v59  ;;  %v6520_v2 = vpop.f32.mrb[102].mxu0  ;;  %v6458_v62 = vadd.f32 %v6457_v61, %v6456_v60 }
 0x37b   : > { %v6521_v0 = vpop.f32.mrb[103].mxu0 }
 0x37c   : > { %v7974_v13 = vadd.f32 %v6519_v55, %v6455_v46  ;;  %v6522_v17 = vadd.f32 %v6521_v0, %v6520_v2 }
 0x37e   : > { %v7976_v24 = vadd.f32 %v6522_v17, %v6458_v62  ;;  %v6459_v49 = vpop.f32.mrb[84].mxu1 }
 0x37f   : > { %v6460_v33 = vpop.f32.mrb[85].mxu1 }
 0x380   : > { %v6523_v7 = vpop.f32.mrb[104].mxu0  ;;  %v6461_v5 = vadd.f32 %v6460_v33, %v6459_v49  ;;  %v6462_v9 = vpop.f32.mrb[86].mxu1 }
 0x381   : > { %v6524_v47 = vpop.f32.mrb[105].mxu0  ;;  %v6463_v14 = vpop.f32.mrb[87].mxu1 }
 0x382   : > { %v6525_v15 = vadd.f32 %v6524_v47, %v6523_v7  ;;  %v6526_v31 = vpop.f32.mrb[106].mxu0  ;;  %v6464_v4 = vadd.f32 %v6463_v14, %v6462_v9 }
 0x383   : > { %v6527_v25 = vpop.f32.mrb[107].mxu0 }
 0x384   : > { %v7978_v16 = vadd.f32 %v6525_v15, %v6461_v5  ;;  %v6528_v12 = vadd.f32 %v6527_v25, %v6526_v31 }
 0x386   : > { %v7980_v44 = vadd.f32 %v6528_v12, %v6464_v4  ;;  %v6465_v58 = vpop.f32.mrb[88].mxu1 }
 0x387   : > { %v6466_v1 = vpop.f32.mrb[89].mxu1 }
 0x388   : > { %v6529_v21 = vpop.f32.mrb[108].mxu0  ;;  %v6467_v6 = vadd.f32 %v6466_v1, %v6465_v58  ;;  %v6468_v27 = vpop.f32.mrb[90].mxu1 }
 0x389   : > { %v6530_v48 = vpop.f32.mrb[109].mxu0  ;;  %v6469_v19 = vpop.f32.mrb[91].mxu1 }
 0x38a   : > { %v6531_v26 = vadd.f32 %v6530_v48, %v6529_v21  ;;  %v6532_v29 = vpop.f32.mrb[110].mxu0  ;;  %v6470_v28 = vadd.f32 %v6469_v19, %v6468_v27 }
 0x38b   : > { %v6533_v30 = vpop.f32.mrb[111].mxu0 }
 0x38c   : > { %v7982_v32 = vadd.f32 %v6531_v26, %v6467_v6  ;;  %v6534_v8 = vadd.f32 %v6533_v30, %v6532_v29 }
 0x38e   : > { %v7984_v20 = vadd.f32 %v6534_v8, %v6470_v28  ;;  %v6471_v40 = vpop.f32.mrb[92].mxu1 }
 0x38f   : > { %v6472_v18 = vpop.f32.mrb[93].mxu1 }
 0x390   : > { %v6473_v34 = vadd.f32 %v6472_v18, %v6471_v40  ;;  %v6474_v54 = vpop.f32.mrb[94].mxu1  ;;  %v6535_v35 = vpop.f32.mrb[112].mxu0 }
 0x391   : > { %v6475_v63 = vpop.f32.mrb[95].mxu1  ;;  %v6536_v11 = vpop.f32.mrb[113].mxu0 }
 0x392   : > { %v6476_v36 = vadd.f32 %v6475_v63, %v6474_v54  ;;  %v6537_v10 = vadd.f32 %v6536_v11, %v6535_v35  ;;  %v6538_v23 = vpop.f32.mrb[114].mxu0 }
 0x393   : > { %v6539_v22 = vpop.f32.mrb[115].mxu0 }
 0x394   : > { %v7986_v42 = vadd.f32 %v6537_v10, %v6473_v34  ;;  %v6540_v43 = vadd.f32 %v6539_v22, %v6538_v23 }
 0x396   : > { %v7988_v45 = vadd.f32 %v6540_v43, %v6476_v36  ;;  %v6477_v50 = vpop.f32.mrb[96].mxu1 }
 0x397   : > { %v6478_v52 = vpop.f32.mrb[97].mxu1 }
 0x398   : > { %v6479_v39 = vadd.f32 %v6478_v52, %v6477_v50  ;;  %v6480_v53 = vpop.f32.mrb[98].mxu1  ;;  %v6541_v57 = vpop.f32.mrb[116].mxu0 }
 0x399   : > { %v6481_v38 = vpop.f32.mrb[99].mxu1  ;;  %v6542_v37 = vpop.f32.mrb[117].mxu0 }
 0x39a   : > { %v6482_v51 = vadd.f32 %v6481_v38, %v6480_v53  ;;  %v6543_v56 = vadd.f32 %v6542_v37, %v6541_v57  ;;  %v6544_v3 = vpop.f32.mrb[118].mxu0 }
 0x39b   : > { %v6545_v59 = vpop.f32.mrb[119].mxu0 }
 0x39c   : > { %v7990_v46 = vadd.f32 %v6543_v56, %v6479_v39  ;;  %v6546_v60 = vadd.f32 %v6545_v59, %v6544_v3 }
 0x39e   : > { %v7992_v41 = vadd.f32 %v6546_v60, %v6482_v51  ;;  %v6483_v61 = vpop.f32.mrb[100].mxu1 }
 0x39f   : > { %v6484_v55 = vpop.f32.mrb[101].mxu1 }
 0x3a0   : > { %v6547_v2 = vpop.f32.mrb[120].mxu0  ;;  %v6485_v62 = vadd.f32 %v6484_v55, %v6483_v61  ;;  %v6486_v0 = vpop.f32.mrb[102].mxu1 }
 0x3a1   : > { %v6548_v17 = vpop.f32.mrb[121].mxu0  ;;  %v6487_v49 = vpop.f32.mrb[103].mxu1 }
 0x3a2   : > { %v6549_v33 = vadd.f32 %v6548_v17, %v6547_v2  ;;  %v6550_v7 = vpop.f32.mrb[122].mxu0  ;;  %v6488_v5 = vadd.f32 %v6487_v49, %v6486_v0 }
 0x3a3   : > { %v6551_v9 = vpop.f32.mrb[123].mxu0 }
 0x3a4   : > { %v7994_v47 = vadd.f32 %v6549_v33, %v6485_v62  ;;  %v6552_v14 = vadd.f32 %v6551_v9, %v6550_v7 }
 0x3a6   : > { %v7996_v15 = vadd.f32 %v6552_v14, %v6488_v5  ;;  %v6489_v31 = vpop.f32.mrb[104].mxu1 }
 0x3a7   : > { %v6490_v4 = vpop.f32.mrb[105].mxu1 }
 0x3a8   : > { %v6491_v25 = vadd.f32 %v6490_v4, %v6489_v31  ;;  %v6492_v12 = vpop.f32.mrb[106].mxu1  ;;  %v6553_v58 = vpop.f32.mrb[124].mxu0 }
 0x3a9   : > { %v6493_v1 = vpop.f32.mrb[107].mxu1  ;;  %v6554_v21 = vpop.f32.mrb[125].mxu0 }
 0x3aa   : > { %v6494_v6 = vadd.f32 %v6493_v1, %v6492_v12  ;;  %v6555_v27 = vadd.f32 %v6554_v21, %v6553_v58  ;;  %v6556_v48 = vpop.f32.mrb[126].mxu0 }
 0x3ab   : > { %v6557_v19 = vpop.f32.mrb[127].mxu0 }
 0x3ac   : > { %v7998_v26 = vadd.f32 %v6555_v27, %v6491_v25  ;;  %v6558_v29 = vadd.f32 %v6557_v19, %v6556_v48 }
 0x3ae   : > { %v8000_v28 = vadd.f32 %v6558_v29, %v6494_v6  ;;  %v6495_v30 = vpop.f32.mrb[108].mxu1 }
 0x3af   : > { %v6496_v8 = vpop.f32.mrb[109].mxu1 }
 0x3b0   : > { %v6497_v40 = vadd.f32 %v6496_v8, %v6495_v30  ;;  %v6498_v18 = vpop.f32.mrb[110].mxu1  ;;  %v6559_v34 = vpop.f32.mrb[128].mxu0 }
 0x3b1   : > { %v6499_v54 = vpop.f32.mrb[111].mxu1  ;;  %v6560_v35 = vpop.f32.mrb[129].mxu0 }
 0x3b2   : > { %v6500_v63 = vadd.f32 %v6499_v54, %v6498_v18  ;;  %v6561_v11 = vadd.f32 %v6560_v35, %v6559_v34  ;;  %v6562_v36 = vpop.f32.mrb[130].mxu0 }
 0x3b3   : > { %v6563_v10 = vpop.f32.mrb[131].mxu0 }
 0x3b4   : > { %v8002_v23 = vadd.f32 %v6561_v11, %v6497_v40  ;;  %v6564_v22 = vadd.f32 %v6563_v10, %v6562_v36 }
 0x3b6   : > { %v8004_v43 = vadd.f32 %v6564_v22, %v6500_v63  ;;  %v6581_v50 = vpop.f32.mrb[112].mxu1 }
 0x3b7   : > { %v6582_v52 = vpop.f32.mrb[113].mxu1 }
 0x3b8   : > { %v6583_v39 = vadd.f32 %v6582_v52, %v6581_v50  ;;  %v6584_v53 = vpop.f32.mrb[114].mxu1  ;;  %v6645_v37 = vpop.f32.mrb[132].mxu0 }
 0x3b9   : > { %v6585_v57 = vpop.f32.mrb[115].mxu1  ;;  %v6646_v56 = vpop.f32.mrb[133].mxu0 }
 0x3ba   : > { %v5481_v38 = vadd.f32 %v6583_v39, %v7974_v13  ;;  %v6586_v51 = vadd.f32 %v6585_v57, %v6584_v53  ;;  %v6647_v59 = vadd.f32 %v6646_v56, %v6645_v37  ;;  %v6648_v60 = vpop.f32.mrb[134].mxu0 }
 0x3bb   : > { %v6649_v61 = vpop.f32.mrb[135].mxu0 }
 0x3bc   : > { %v5484_v3 = vadd.f32 %v6586_v51, %v7976_v24  ;;  %v6650_v55 = vadd.f32 %v6649_v61, %v6648_v60  ;;  %v8008_v62 = vadd.f32 %v6647_v59, %v5481_v38 }
 0x3be   : > { %v6587_v2 = vpop.f32.mrb[116].mxu1  ;;  %v8010_v33 = vadd.f32 %v6650_v55, %v5484_v3 }
 0x3bf   : > { %v6588_v0 = vpop.f32.mrb[117].mxu1 }
 0x3c0   : > { %v6589_v17 = vadd.f32 %v6588_v0, %v6587_v2  ;;  %v6590_v49 = vpop.f32.mrb[118].mxu1  ;;  %v6651_v5 = vpop.f32.mrb[136].mxu0 }
 0x3c1   : > { %v6591_v7 = vpop.f32.mrb[119].mxu1  ;;  %v6652_v14 = vpop.f32.mrb[137].mxu0 }
 0x3c2   : > { %v5489_v13 = vadd.f32 %v6589_v17, %v7978_v16  ;;  %v6592_v9 = vadd.f32 %v6591_v7, %v6590_v49  ;;  %v6653_v31 = vadd.f32 %v6652_v14, %v6651_v5  ;;  %v6654_v4 = vpop.f32.mrb[138].mxu0 }
 0x3c3   : > { %v6655_v25 = vpop.f32.mrb[139].mxu0 }
 0x3c4   : > { %v5492_v24 = vadd.f32 %v6592_v9, %v7980_v44  ;;  %v6656_v12 = vadd.f32 %v6655_v25, %v6654_v4  ;;  %v8014_v1 = vadd.f32 %v6653_v31, %v5489_v13 }
 0x3c6   : > { %v6593_v58 = vpop.f32.mrb[120].mxu1  ;;  %v8016_v48 = vadd.f32 %v6656_v12, %v5492_v24 }
 0x3c7   : > { %v6594_v21 = vpop.f32.mrb[121].mxu1 }
 0x3c8   : > { %v6595_v6 = vadd.f32 %v6594_v21, %v6593_v58  ;;  %v6596_v27 = vpop.f32.mrb[122].mxu1  ;;  %v6657_v29 = vpop.f32.mrb[140].mxu0 }
 0x3c9   : > { %v6597_v19 = vpop.f32.mrb[123].mxu1  ;;  %v6658_v8 = vpop.f32.mrb[141].mxu0 }
 0x3ca   : > { %v5497_v16 = vadd.f32 %v6595_v6, %v7982_v32  ;;  %v6598_v30 = vadd.f32 %v6597_v19, %v6596_v27  ;;  %v6659_v40 = vadd.f32 %v6658_v8, %v6657_v29  ;;  %v6660_v18 = vpop.f32.mrb[142].mxu0 }
 0x3cb   : > { %v6661_v34 = vpop.f32.mrb[143].mxu0 }
 0x3cc   : > { %v5500_v44 = vadd.f32 %v6598_v30, %v7984_v20  ;;  %v6662_v54 = vadd.f32 %v6661_v34, %v6660_v18  ;;  %v8020_v63 = vadd.f32 %v6659_v40, %v5497_v16 }
 0x3ce   : > { %v6599_v35 = vpop.f32.mrb[124].mxu1  ;;  %v8022_v22 = vadd.f32 %v6662_v54, %v5500_v44 }
 0x3cf   : > { %v6600_v11 = vpop.f32.mrb[125].mxu1 }
 0x3d0   : > { %v6601_v36 = vadd.f32 %v6600_v11, %v6599_v35  ;;  %v6602_v10 = vpop.f32.mrb[126].mxu1  ;;  %v6663_v52 = vpop.f32.mrb[144].mxu0 }
 0x3d1   : > { %v6603_v50 = vpop.f32.mrb[127].mxu1  ;;  %v6664_v53 = vpop.f32.mrb[145].mxu0 }
 0x3d2   : > { %v5505_v32 = vadd.f32 %v6601_v36, %v7986_v42  ;;  %v6604_v39 = vadd.f32 %v6603_v50, %v6602_v10  ;;  %v6665_v57 = vadd.f32 %v6664_v53, %v6663_v52  ;;  %v6666_v38 = vpop.f32.mrb[146].mxu0 }
 0x3d3   : > { %v6667_v37 = vpop.f32.mrb[147].mxu0 }
 0x3d4   : > { %v5508_v20 = vadd.f32 %v6604_v39, %v7988_v45  ;;  %v6668_v51 = vadd.f32 %v6667_v37, %v6666_v38  ;;  %v8026_v3 = vadd.f32 %v6665_v57, %v5505_v32 }
 0x3d6   : > { %v6605_v56 = vpop.f32.mrb[128].mxu1  ;;  %v8028_v55 = vadd.f32 %v6668_v51, %v5508_v20 }
 0x3d7   : > { %v6606_v59 = vpop.f32.mrb[129].mxu1 }
 0x3d8   : > { %v6607_v60 = vadd.f32 %v6606_v59, %v6605_v56  ;;  %v6608_v61 = vpop.f32.mrb[130].mxu1  ;;  %v6669_v0 = vpop.f32.mrb[148].mxu0 }
 0x3d9   : > { %v6609_v2 = vpop.f32.mrb[131].mxu1  ;;  %v6670_v49 = vpop.f32.mrb[149].mxu0 }
 0x3da   : > { %v5513_v42 = vadd.f32 %v6607_v60, %v7990_v46  ;;  %v6610_v17 = vadd.f32 %v6609_v2, %v6608_v61  ;;  %v6671_v7 = vadd.f32 %v6670_v49, %v6669_v0  ;;  %v6672_v13 = vpop.f32.mrb[150].mxu0 }
 0x3db   : > { %v6673_v5 = vpop.f32.mrb[151].mxu0 }
 0x3dc   : > { %v5516_v45 = vadd.f32 %v6610_v17, %v7992_v41  ;;  %v6674_v9 = vadd.f32 %v6673_v5, %v6672_v13  ;;  %v8032_v24 = vadd.f32 %v6671_v7, %v5513_v42 }
 0x3de   : > { %v6611_v14 = vpop.f32.mrb[132].mxu1  ;;  %v8034_v12 = vadd.f32 %v6674_v9, %v5516_v45  ;;  %v5739_v45 = vld [vmem:[%s7542_s27 + $0x10] sm:$0xff] }
 0x3df   : > { %v6612_v31 = vpop.f32.mrb[133].mxu1 }
 0x3e0   : > { %v6613_v4 = vadd.f32 %v6612_v31, %v6611_v14  ;;  %v6614_v25 = vpop.f32.mrb[134].mxu1  ;;  %v6675_v21 = vpop.f32.mrb[152].mxu0  ;;  %v5740_v31 = vld [vmem:[%s7542_s27 + $0x18] sm:$0xff] }
 0x3e1   : > { %v6615_v58 = vpop.f32.mrb[135].mxu1  ;;  %v6676_v27 = vpop.f32.mrb[153].mxu0 }
 0x3e2   : > { %v5521_v46 = vadd.f32 %v6613_v4, %v7994_v47  ;;  %v6616_v6 = vadd.f32 %v6615_v58, %v6614_v25  ;;  %v6677_v19 = vadd.f32 %v6676_v27, %v6675_v21  ;;  %v6678_v16 = vpop.f32.mrb[154].mxu0 }
 0x3e3   : > { %v6679_v29 = vpop.f32.mrb[155].mxu0 }
 0x3e4   : > { %v5524_v41 = vadd.f32 %v6616_v6, %v7996_v15  ;;  %v6680_v30 = vadd.f32 %v6679_v29, %v6678_v16  ;;  %v8038_v44 = vadd.f32 %v6677_v19, %v5521_v46  ;;  %v5738_v46 = vld [vmem:[%s7542_s27 + $0x8] sm:$0xff]  ;;  %v5743_v29 = vld [vmem:[%s7542_s27 + $0x30] sm:$0xff] }
 0x3e6   : > { %v6617_v8 = vpop.f32.mrb[136].mxu1  ;;  %v8040_v54 = vadd.f32 %v6680_v30, %v5524_v41 }
 0x3e7   : > { %v6618_v40 = vpop.f32.mrb[137].mxu1 }
 0x3e8   : > { %v6619_v18 = vadd.f32 %v6618_v40, %v6617_v8  ;;  %v6620_v34 = vpop.f32.mrb[138].mxu1  ;;  %v6681_v11 = vpop.f32.mrb[156].mxu0 }
 0x3e9   : > { %v6621_v35 = vpop.f32.mrb[139].mxu1  ;;  %v6682_v10 = vpop.f32.mrb[157].mxu0 }
 0x3ea   : > { %v5529_v47 = vadd.f32 %v6619_v18, %v7998_v26  ;;  %v6622_v36 = vadd.f32 %v6621_v35, %v6620_v34  ;;  %v6683_v50 = vadd.f32 %v6682_v10, %v6681_v11  ;;  %v6684_v32 = vpop.f32.mrb[158].mxu0  ;;  %v5744_v34 = vld [vmem:[%s7542_s27 + $0x38] sm:$0xff] }
 0x3eb   : > { %v6685_v52 = vpop.f32.mrb[159].mxu0 }
 0x3ec   : > { %v5532_v15 = vadd.f32 %v6622_v36, %v8000_v28  ;;  %v6686_v39 = vadd.f32 %v6685_v52, %v6684_v32  ;;  %v8044_v20 = vadd.f32 %v6683_v50, %v5529_v47  ;;  %v5742_v36 = vld [vmem:[%s7542_s27 + $0x28] sm:$0xff] }
 0x3ee   : > { %v6623_v53 = vpop.f32.mrb[140].mxu1  ;;  %v8046_v51 = vadd.f32 %v6686_v39, %v5532_v15 }
 0x3ef   : > { %v6624_v57 = vpop.f32.mrb[141].mxu1 }
 0x3f0   : > { %v6625_v38 = vadd.f32 %v6624_v57, %v6623_v53  ;;  %v6626_v37 = vpop.f32.mrb[142].mxu1  ;;  %v6687_v59 = vpop.f32.mrb[160].mxu0  ;;  %v5747_v53 = vld [vmem:[%s7542_s27 + $0x50] sm:$0xff] }
 0x3f1   : > { %v6627_v26 = vpop.f32.mrb[143].mxu1  ;;  %v6688_v60 = vpop.f32.mrb[161].mxu0 }
 0x3f2   : > { %v5537_v56 = vadd.f32 %v6625_v38, %v8002_v23  ;;  %v6628_v28 = vadd.f32 %v6627_v26, %v6626_v37  ;;  %v6689_v2 = vadd.f32 %v6688_v60, %v6687_v59  ;;  %v6690_v42 = vpop.f32.mrb[162].mxu0  ;;  %v5737_v23 = vld [vmem:[%s7542_s27] sm:$0xff] }
 0x3f3   : > { %v6691_v0 = vpop.f32.mrb[163].mxu0 }
 0x3f4   : > { %v5540_v61 = vadd.f32 %v6628_v28, %v8004_v43  ;;  %v6692_v17 = vadd.f32 %v6691_v0, %v6690_v42  ;;  %v8051_v7 = vadd.f32 %v6689_v2, %v5537_v56  ;;  %v5748_v56 = vld [vmem:[%s7542_s27 + $0x58] sm:$0xff] }
 0x3f6   : > { %v6763_v49 = vpop.f32.mrb[144].mxu1  ;;  %v8057_v43 = vadd.f32 %v6692_v17, %v5540_v61  ;;  %v5746_v61 = vld [vmem:[%s7542_s27 + $0x48] sm:$0xff] }
 0x3f7   : > { %v5683_v13 = vadd.f32 %v6763_v49, %v8014_v1  ;;  %v5674_v5 = vpop.f32.mrb[145].mxu1 }
 0x3f8   : > { %v5675_v9 = vadd.f32 %v5674_v5, %v8008_v62  ;;  %v6764_v14 = vpop.f32.mrb[146].mxu1 }
 0x3f9   : > { %v5755_v4 = vadd.f32 %v5739_v45, %v5683_v13  ;;  %v5686_v25 = vadd.f32 %v6764_v14, %v8016_v48  ;;  %v5677_v58 = vpop.f32.mrb[147].mxu1  ;;  %v5751_v13 = vld [vmem:[%s7542_s27 + $0x70] sm:$0xff] }
 0x3fa   : > { %v5753_v21 = vadd.f32 %v5737_v23, %v5675_v9  ;;  %v5678_v1 = vadd.f32 %v5677_v58, %v8010_v33  ;;  %v5741_v33 = vld [vmem:[%s7542_s27 + $0x20] sm:$0xff] }
 0x3fb   : > { %v5771_v6 = vmax.f32 %v5755_v4, 0.0  ;;  %v5756_v27 = vadd.f32 %v5740_v31, %v5686_v25  ;;  %v5749_v23 = vld [vmem:[%s7542_s27 + $0x60] sm:$0xff]  ;;  %v5752_v31 = vld [vmem:[%s7542_s27 + $0x78] sm:$0xff] }
 0x3fc   : > { %v5769_v62 = vmax.f32 %v5753_v21, 0.0  ;;  %v5754_v41 = vadd.f32 %v5738_v46, %v5678_v1  ;;  %v5750_v46 = vld [vmem:[%s7542_s27 + $0x68] sm:$0xff] }
 0x3fd   : > { %5787 = vst.msk [vmem:[%s7623_s23 + $0x10] sm:$0xff] %vm348_vm5, %v5771_v6  ;;  %v5772_v19 = vmax.f32 %v5756_v27, 0.0 }
 0x3fe   : > { %5785 = vst.msk [vmem:[%s7623_s23] sm:$0xff] %vm348_vm5, %v5769_v62  ;;  %v5770_v16 = vmax.f32 %v5754_v41, 0.0  ;;  %v6767_v48 = vpop.f32.mrb[148].mxu1 }
 0x3ff   : > { %5788 = vst.msk [vmem:[%s7623_s23 + $0x18] sm:$0xff] %vm348_vm5, %v5772_v19  ;;  %v5699_v30 = vadd.f32 %v6767_v48, %v8026_v3  ;;  %v5690_v8 = vpop.f32.mrb[149].mxu1 }
 0x400   : > { %5786 = vst.msk [vmem:[%s7623_s23 + $0x8] sm:$0xff] %vm348_vm5, %v5770_v16  ;;  %v5691_v40 = vadd.f32 %v5690_v8, %v8020_v63  ;;  %v6768_v18 = vpop.f32.mrb[150].mxu1 }
 0x401   : > { %v5759_v35 = vadd.f32 %v5743_v29, %v5699_v30  ;;  %v5702_v47 = vadd.f32 %v6768_v18, %v8028_v55  ;;  %v5693_v11 = vpop.f32.mrb[151].mxu1 }
 0x402   : > { %v5757_v10 = vadd.f32 %v5741_v33, %v5691_v40  ;;  %v5694_v3 = vadd.f32 %v5693_v11, %v8022_v22  ;;  %v5745_v22 = vld [vmem:[%s7542_s27 + $0x40] sm:$0xff] }
 0x403   : > { %v5775_v15 = vmax.f32 %v5759_v35, 0.0  ;;  %v5760_v50 = vadd.f32 %v5744_v34, %v5702_v47 }
 0x404   : > { %v5773_v32 = vmax.f32 %v5757_v10, 0.0  ;;  %v5758_v52 = vadd.f32 %v5742_v36, %v5694_v3 }
 0x405   : > { %5791 = vst.msk [vmem:[%s7623_s23 + $0x30] sm:$0xff] %vm348_vm5, %v5775_v15  ;;  %v5776_v63 = vmax.f32 %v5760_v50, 0.0 }
 0x406   : > { %5789 = vst.msk [vmem:[%s7623_s23 + $0x20] sm:$0xff] %vm348_vm5, %v5773_v32  ;;  %v5774_v39 = vmax.f32 %v5758_v52, 0.0  ;;  %v6771_v55 = vpop.f32.mrb[152].mxu1 }
 0x407   : > { %5792 = vst.msk [vmem:[%s7623_s23 + $0x38] sm:$0xff] %vm348_vm5, %v5776_v63  ;;  %v5715_v57 = vadd.f32 %v6771_v55, %v8038_v44  ;;  %v5706_v38 = vpop.f32.mrb[153].mxu1 }
 0x408   : > { %5790 = vst.msk [vmem:[%s7623_s23 + $0x28] sm:$0xff] %vm348_vm5, %v5774_v39  ;;  %v5707_v37 = vadd.f32 %v5706_v38, %v8032_v24  ;;  %v6772_v26 = vpop.f32.mrb[154].mxu1 }
 0x409   : > { %v5763_v59 = vadd.f32 %v5747_v53, %v5715_v57  ;;  %v5718_v28 = vadd.f32 %v6772_v26, %v8040_v54  ;;  %v5709_v60 = vpop.f32.mrb[155].mxu1 }
 0x40a   : > { %v5761_v44 = vadd.f32 %v5745_v22, %v5707_v37  ;;  %v5710_v2 = vadd.f32 %v5709_v60, %v8034_v12 }
 0x40b   : > { %v5779_v42 = vmax.f32 %v5763_v59, 0.0  ;;  %v5764_v0 = vadd.f32 %v5748_v56, %v5718_v28 }
 0x40c   : > { %v5777_v17 = vmax.f32 %v5761_v44, 0.0  ;;  %v5762_v49 = vadd.f32 %v5746_v61, %v5710_v2 }
 0x40d   : > { %5795 = vst.msk [vmem:[%s7623_s23 + $0x50] sm:$0xff] %vm348_vm5, %v5779_v42  ;;  %v5780_v24 = vmax.f32 %v5764_v0, 0.0 }
 0x40e   : > { %5793 = vst.msk [vmem:[%s7623_s23 + $0x40] sm:$0xff] %vm348_vm5, %v5777_v17  ;;  %v5778_v54 = vmax.f32 %v5762_v49, 0.0  ;;  %v6775_v45 = vpop.f32.mrb[156].mxu1 }
 0x40f   : > { %5796 = vst.msk [vmem:[%s7623_s23 + $0x58] sm:$0xff] %vm348_vm5, %v5780_v24  ;;  %v5731_v12 = vadd.f32 %v6775_v45, %v8051_v7  ;;  %v5722_v5 = vpop.f32.mrb[157].mxu1 }
 0x410   : > { %5794 = vst.msk [vmem:[%s7623_s23 + $0x48] sm:$0xff] %vm348_vm5, %v5778_v54  ;;  %v5723_v9 = vadd.f32 %v5722_v5, %v8044_v20  ;;  %v6776_v14 = vpop.f32.mrb[158].mxu1 }
 0x411   : > { %v5767_v4 = vadd.f32 %v5751_v13, %v5731_v12  ;;  %v5734_v25 = vadd.f32 %v6776_v14, %v8057_v43  ;;  %v5725_v58 = vpop.f32.mrb[159].mxu1 }
 0x412   : > { %v5765_v21 = vadd.f32 %v5749_v23, %v5723_v9  ;;  %v5726_v7 = vadd.f32 %v5725_v58, %v8046_v51 }
 0x413   : > { %v5783_v1 = vmax.f32 %v5767_v4, 0.0  ;;  %v5768_v6 = vadd.f32 %v5752_v31, %v5734_v25 }
 0x414   : > { %v5781_v20 = vmax.f32 %v5765_v21, 0.0  ;;  %v5766_v27 = vadd.f32 %v5750_v46, %v5726_v7 }
 0x415   : > { %5799 = vst.msk [vmem:[%s7623_s23 + $0x70] sm:$0xff] %vm348_vm5, %v5783_v1  ;;  %v5784_v62 = vmax.f32 %v5768_v6, 0.0 }
 0x416   : > { %5797 = vst.msk [vmem:[%s7623_s23 + $0x60] sm:$0xff] %vm348_vm5, %v5781_v20  ;;  %v5782_v51 = vmax.f32 %v5766_v27, 0.0 }
 0x417   : > { %5800 = vst.msk [vmem:[%s7623_s23 + $0x78] sm:$0xff] %vm348_vm5, %v5784_v62 }
 0x418   : > { %5798 = vst.msk [vmem:[%s7623_s23 + $0x68] sm:$0xff] %vm348_vm5, %v5782_v51 }
 0x419   : > { %7152 = shalt.err (!%p7149_p6)
}
 0x41a   : > { %s7153_s20 = scalar_lea.hbm %s8118_s15, 2048  ;;  %s7157_s9 = scalar_lea.hbm %s8194_s3, 8192 }
 0x41b   : > { %p7154_p10 = scmp.ne.s32.totalorder %s8118_s15, %s7153_s20  ;;  %p7158_p1 = scmp.lt.u32.totalorder %s8118_s15, %s8194_s3 }
 0x41c   : > { %p7159_p3 = scmp.lt.u32.totalorder %s7157_s9, %s7153_s20  ;;  %p7161_p7 = scmp.lt.u32.totalorder %s7153_s20, %s8118_s15 }
 0x41d   : > { %p7155_p0 = pnand %p7154_p10, %p8228_p9 }
 0x41e   : > { %p7160_p13 = por %p7159_p3, %p7158_p1 }
 0x41f   : > { %p7156_p4 = pneg %p7155_p0 }
 0x420   : > { %p7162_p11 = por %p7161_p7, %p7160_p13 }
 0x422   : > { %p7163_p5 = pnand %p7162_p11, %p7156_p4 }
 0x424   : > { %7166 = shalt.err (!%p7163_p5)
}
 0x425   : > { %s7278_s7 = smov 128   ;;  %s7279_s5 = smov 8  }
 0x426   : > { %6787 = dma.vmem_to_hbm [thread:$0]  (%p8228_p9), %s8120_s19, 2048, %s8118_s15, %s8130_s10, %s7278_s7, %s7278_s7, %s7279_s5  }
 0x427 PF: > { %s8229_s6 = sld [smem:[#allocation15_spill]]  ;;  %s8230_s18 = sld [smem:[#allocation17_spill]] }
 0x428   : > { %p6809_p8 = scmp.ge.s32.totalorder %s7265_s22, 2 }
 0x42d   : > { %s5833_s1 = sand.u32 1, %s8229_s6   ;;  %p8231_p12 = scmp.ne.s32.totalorder %s8230_s18, 0 }
 0x42e   : > { %s5834_s29 = scalar_lea.sflag [#allocation7], %s5833_s1 }
 0x42f   : > { %p6801_p2 = pnand %p6809_p8, %p8231_p12 }
 0x431   : > { %7220 = dma.done.wait (!%p6801_p2), %s5834_s29, 2048  }
 0x432   : > { %7222 = vsyncadd (!%p6801_p2), %s5834_s29, 4294965248  ;;  %s20_s22 = sadd.s32 1, %s7265_s22   ;;  %s8232_s18 = sld [smem:[#allocation16_spill]] }
 0x433   : > { %p17_p6 = scmp.ge.s32.totalorder %s20_s22, 6   ;;  %s8233_s20 = sld [smem:[#allocation18_spill]] }
 0x434   : > { %s8234_s12 = smov %s7229_s13  ;;  %s8235_s13 = smov %s7233_s14 }
 0x435   : > { %s8236_s14 = smov %s7475_s2  ;;  %s8237_s15 = smov %s7241_s16 }
 0x436   : > { %s8238_s16 = smov %s7245_s17  ;;  %s8239_s17 = smov %s7470_s26 }
 0x437   : > { %s8240_s19 = smov %s7261_s21  ;;  %s8241_s21 = smov %s8247_s11 }
 0x438   :  { %19 = sbr.rel (!%p17_p6) target bundleno = 13 (0xd), region = 110 }
 0x43f   :  { %5839 = vsyncpa [#allocation6], 1 }
 0x440   :  { %5841 = vsyncpa [#allocation6 + $0x1], 1 }
 0x441   :  { %5842 = vsyncpa [#allocation9], 1 }
 0x442   :  { %5843 = vsyncpa [#allocation7], 1 }
 0x443   :  { %5845 = vsyncpa [#allocation7 + $0x1], 1 }

</bundles_post_ra>
